<compile_context>
chip_gen: v7x
topology: tpu7x:2x2x1
jax: 0.10.0
libtpu: 0.0.40
codegen_flags: <defaults>
</compile_context>

<pallas_src>
import functools

import jax
import jax.numpy as jnp
import numpy as np
from jax.experimental import pallas as pl
from jax.experimental.pallas import tpu as pltpu


def _round_up(v, m):
    return ((v + m - 1) // m) * m


# ---------------------------------------------------------------------------
# Fused Pallas kernel: one batch block (B samples) per grid step.
# ---------------------------------------------------------------------------
def _fused_forward_kernel(x_ref, btoep_ref, w2bd_ref, sh2_ref, p4s_ref,
                          w3bd_ref, sh3_ref, mcls_ref, bcls_ref, o_ref,
                          *, B, F1, F1D, F2, Ks, T1p, T3p, n_classes):
    f32, bf16 = jnp.float32, jnp.bfloat16

    def elu(v):  # ELU(alpha=1): v if v > 0 else exp(v) - 1
        return jnp.where(v > 0.0, v, jnp.exp(jnp.minimum(v, 0.0)) - 1.0)

    xb = x_ref[...]                                  # (B*C, T) bf16, rows (b, c)

    # ---- conv1 (Toeplitz matmul) + conv2, BN1/BN2 folded --------------------
    # Accumulate over the F1 temporal filters; every term is an MXU matmul.
    acc2 = jnp.zeros((B * F1D, T1p), f32)
    for f in range(F1):
        x1f = jnp.dot(xb, btoep_ref[f], preferred_element_type=f32)     # (B*C, T1p)
        acc2 = acc2 + jnp.dot(w2bd_ref[f], x1f.astype(bf16),
                              preferred_element_type=f32)               # (B*F1D, T1p)
    h2 = elu(acc2 + sh2_ref[...])                    # rows (b, fd)
    h2b = h2.astype(bf16)

    # ---- AvgPool(1,4) + conv3a∘conv3b, BN3 folded ---------------------------
    # Pool + window-selection folded into p4s[k]; accumulate over Ks taps.
    acc3 = jnp.zeros((F2 * B, T3p), f32)
    for k in range(Ks):
        yk = jnp.dot(h2b, p4s_ref[k], preferred_element_type=f32)       # (B*F1D, T3p)
        acc3 = acc3 + jnp.dot(w3bd_ref[k], yk.astype(bf16),
                              preferred_element_type=f32)               # (F2*B, T3p)
    h3 = elu(acc3 + sh3_ref[...])                    # rows (f2, b)

    # ---- AvgPool(1,8) + flatten + Linear∘Linear (all folded into mcls) ------
    logits = jnp.zeros((B, n_classes), f32)
    for f2 in range(F2):
        logits = logits + jnp.dot(h3[f2 * B:(f2 + 1) * B, :], mcls_ref[f2],
                                  preferred_element_type=f32)           # (B, n_cls)
    o_ref[...] = logits + bcls_ref[...]


# ---------------------------------------------------------------------------
# Parameter init (deterministic, synthetic)
# ---------------------------------------------------------------------------
def init_params(key, *, num_channels, temp_kernel_length, spac_kernel_length,
                F1, D, F2, l1, l2, n_classes):
    F1D = F1 * D
    ks = jax.random.split(key, 24)

    def nrm(k, shape, s=0.1):
        return jax.random.normal(k, shape, jnp.float32) * s

    return {
        # conv1: Conv2d(1, F1, (1, Kt)) + BatchNorm2d(F1)
        "W1": nrm(ks[0], (F1, 1, 1, temp_kernel_length)),
        "b1": nrm(ks[1], (F1,)),
        "bn1_gamma": 1.0 + nrm(ks[2], (F1,)),
        "bn1_beta": nrm(ks[3], (F1,)),
        "bn1_mean": nrm(ks[4], (F1,)),
        "bn1_var": 1.0 + jnp.abs(nrm(ks[5], (F1,))),
        # conv2: Conv2d(F1, F1*D, (C, 1)) + BatchNorm2d(F1*D) + ELU + AvgPool(1,4)
        "W2": nrm(ks[6], (F1D, F1, num_channels, 1)),
        "b2": nrm(ks[7], (F1D,)),
        "bn2_gamma": 1.0 + nrm(ks[8], (F1D,)),
        "bn2_beta": nrm(ks[9], (F1D,)),
        "bn2_mean": nrm(ks[10], (F1D,)),
        "bn2_var": 1.0 + jnp.abs(nrm(ks[11], (F1D,))),
        # conv3: Conv2d(F1D, F1D, (1, Ks)) -> Conv2d(F1D, F2, 1) + BN + ELU + AvgPool(1,8)
        "W3a": nrm(ks[12], (F1D, F1D, 1, spac_kernel_length)),
        "b3a": nrm(ks[13], (F1D,)),
        "W3b": nrm(ks[14], (F2, F1D, 1, 1)),
        "b3b": nrm(ks[15], (F2,)),
        "bn3_gamma": 1.0 + nrm(ks[16], (F2,)),
        "bn3_beta": nrm(ks[17], (F2,)),
        "bn3_mean": nrm(ks[18], (F2,)),
        "bn3_var": 1.0 + jnp.abs(nrm(ks[19], (F2,))),
        # classifier: Linear(l1, l2) -> Linear(l2, n_classes)   (no activation between)
        "Wfc1": nrm(ks[20], (l2, l1)),
        "bfc1": nrm(ks[21], (l2,)),
        "Wfc2": nrm(ks[22], (n_classes, l2)),
        "bfc2": nrm(ks[23], (n_classes,)),
    }


# ---------------------------------------------------------------------------
# Pallas-backed forward pass (eval-mode semantics).
# ---------------------------------------------------------------------------
def cnn2d_forward(params, x, *, num_channels, temp_kernel_length,
                  spac_kernel_length, F1, D, F2, n_classes, batch_block=8):
    f32, bf16 = jnp.float32, jnp.bfloat16
    N, C, T = x.shape
    assert C == num_channels
    F1D = F1 * D
    Kt, Ks = temp_kernel_length, spac_kernel_length
    eps = 1e-5

    B = min(batch_block, N)
    assert N % B == 0, "batch must be divisible by the batch block"

    T1 = T - Kt + 1            # after conv1
    T2 = T1 // 4               # after AvgPool(1, 4)
    T3 = T2 - Ks + 1           # after conv3a
    T4 = T3 // 8               # after AvgPool(1, 8)
    T1p = _round_up(T1, 128)   # lane-padded (padded columns are masked out)
    T3p = _round_up(T3, 128)

    # ---- fold BN1 into conv1 -------------------------------------------------
    s1 = params["bn1_gamma"] / jnp.sqrt(params["bn1_var"] + eps)
    w1f = params["W1"].reshape(F1, Kt) * s1[:, None]                     # (F1, Kt)
    shift1 = (params["b1"] - params["bn1_mean"]) * s1 + params["bn1_beta"]

    # Per-temporal-filter banded/Toeplitz matrices: btoep[f, t, t1] = w1f[f, t-t1]
    t_idx = jnp.arange(T)[:, None]
    t1_idx = jnp.arange(T1p)[None, :]
    diff = t_idx - t1_idx
    valid1 = (diff >= 0) & (diff < Kt) & (t1_idx < T1)
    btoep = jnp.where(valid1[None, :, :],
                      w1f[:, jnp.clip(diff, 0, Kt - 1)], 0.0)            # (F1, T, T1p)

    # ---- fold BN2 into conv2; block-diagonal over the batch block ------------
    s2 = params["bn2_gamma"] / jnp.sqrt(params["bn2_var"] + eps)
    W2m = params["W2"].reshape(F1D, F1, C)                               # [fd, f, c]
    A2 = jnp.einsum("d,dfc->fdc", s2, W2m)                               # [f, fd, c]
    eyeB = jnp.eye(B, dtype=f32)
    w2bd = jnp.einsum("fdc,bp->fbdpc", A2, eyeB).reshape(F1, B * F1D, B * C)
    shift2 = (s2 * (params["b2"] + jnp.einsum("dfc,f->d", W2m, shift1)
                    - params["bn2_mean"]) + params["bn2_beta"])          # (F1D,)
    sh2 = jnp.tile(shift2, B).reshape(B * F1D, 1)                        # rows (b, fd)

    # ---- AvgPool(1,4) + conv3 window selection folded into one matrix per tap
    k_idx = jnp.arange(Ks)[:, None, None]
    t1g = jnp.arange(T1p)[None, :, None]
    t3g = jnp.arange(T3p)[None, None, :]
    start = 4 * (t3g + k_idx)
    pmask = (t3g < T3) & (t1g >= start) & (t1g < start + 4)
    p4s = jnp.where(pmask, 0.25, 0.0)                                    # (Ks, T1p, T3p)

    # ---- fuse conv3a∘conv3b, fold BN3; block-diagonal over batch ------------
    W3a = params["W3a"].reshape(F1D, F1D, Ks)                            # [fd_out, fd_in, k]
    W3b = params["W3b"].reshape(F2, F1D)
    W3c = jnp.einsum("ep,pdk->edk", W3b, W3a)                            # [f2, fd, k]
    b3c = W3b @ params["b3a"] + params["b3b"]
    s3 = params["bn3_gamma"] / jnp.sqrt(params["bn3_var"] + eps)
    shift3 = s3 * (b3c - params["bn3_mean"]) + params["bn3_beta"]        # (F2,)
    A3 = jnp.einsum("e,edk->ked", s3, W3c)                               # [k, f2, fd]
    w3bd = jnp.einsum("ked,bp->kebpd", A3, eyeB).reshape(Ks, F2 * B, B * F1D)
    sh3 = jnp.repeat(shift3, B).reshape(F2 * B, 1)                       # rows (f2, b)

    # ---- AvgPool(1,8) + flatten + composed classifier -----------------------
    Wcomb = params["Wfc1"].T @ params["Wfc2"].T                          # (F2*T4, n_cls)
    bcomb = params["Wfc2"] @ params["bfc1"] + params["bfc2"]
    Wc3 = Wcomb.reshape(F2, T4, n_classes)
    t3v = jnp.arange(T3p)
    mvalid = (t3v < 8 * T4)[None, :, None]
    mcls = jnp.where(mvalid, Wc3[:, jnp.clip(t3v // 8, 0, T4 - 1), :] / 8.0, 0.0)
    bcls = bcomb.reshape(1, n_classes)

    x2d = x.astype(bf16).reshape(N * C, T)                               # rows (b, c)

    kernel = functools.partial(
        _fused_forward_kernel, B=B, F1=F1, F1D=F1D, F2=F2, Ks=Ks,
        T1p=T1p, T3p=T3p, n_classes=n_classes)

    logits = pl.pallas_call(
        kernel,
        out_shape=jax.ShapeDtypeStruct((N, n_classes), f32),
        grid=(N // B,),
        in_specs=[
            pl.BlockSpec((B * C, T), lambda i: (i, 0)),                  # x (batch block)
            pl.BlockSpec((F1, T, T1p), lambda i: (0, 0, 0)),             # conv1 Toeplitz
            pl.BlockSpec((F1, B * F1D, B * C), lambda i: (0, 0, 0)),     # conv2 blockdiag
            pl.BlockSpec((B * F1D, 1), lambda i: (0, 0)),                # shift2
            pl.BlockSpec((Ks, T1p, T3p), lambda i: (0, 0, 0)),           # pool4+window
            pl.BlockSpec((Ks, F2 * B, B * F1D), lambda i: (0, 0, 0)),    # conv3 blockdiag
            pl.BlockSpec((F2 * B, 1), lambda i: (0, 0)),                 # shift3
            pl.BlockSpec((F2, T3p, n_classes), lambda i: (0, 0, 0)),     # pool8+classifier
            pl.BlockSpec((1, n_classes), lambda i: (0, 0)),              # classifier bias
        ],
        out_specs=pl.BlockSpec((B, n_classes), lambda i: (i, 0)),
        compiler_params=pltpu.CompilerParams(
            dimension_semantics=("parallel",)),
    )(x2d, btoep.astype(bf16), w2bd.astype(bf16), sh2.astype(f32),
      p4s.astype(bf16), w3bd.astype(bf16), sh3.astype(f32),
      mcls.astype(f32), bcls.astype(f32))
    return logits


# ---------------------------------------------------------------------------
# Pure-JAX reference (mirrors the PyTorch ops directly) for a sanity check.
# ---------------------------------------------------------------------------
def reference_forward(params, x):
    eps = 1e-5

    def conv(h, w, b):
        y = jax.lax.conv_general_dilated(
            h, w, window_strides=(1, 1), padding="VALID",
            dimension_numbers=("NCHW", "OIHW", "NCHW"),
            precision=jax.lax.Precision.HIGHEST)
        return y + b.reshape(1, -1, 1, 1)

    def bn(h, g, bt, m, v):
        c = lambda a: a.reshape(1, -1, 1, 1)
        return (h - c(m)) / jnp.sqrt(c(v) + eps) * c(g) + c(bt)

    def elu(h):
        return jnp.where(h > 0.0, h, jnp.exp(jnp.minimum(h, 0.0)) - 1.0)

    def avgpool_w(h, w):
        n, c, hh, ww = h.shape
        n_out = (ww - w) // w + 1
        return h[..., : n_out * w].reshape(n, c, hh, n_out, w).mean(-1)

    h = x[:, None]                                           # unsqueeze -> (N,1,C,T)
    h = bn(conv(h, params["W1"], params["b1"]),
           params["bn1_gamma"], params["bn1_beta"], params["bn1_mean"], params["bn1_var"])
    h = conv(h, params["W2"], params["b2"])
    h = bn(h, params["bn2_gamma"], params["bn2_beta"], params["bn2_mean"], params["bn2_var"])
    h = avgpool_w(elu(h), 4)
    h = conv(h, params["W3a"], params["b3a"])
    h = conv(h, params["W3b"], params["b3b"])
    h = bn(h, params["bn3_gamma"], params["bn3_beta"], params["bn3_mean"], params["bn3_var"])
    h = avgpool_w(elu(h), 8)
    flat = h.reshape(h.shape[0], -1)
    y = flat @ params["Wfc1"].T + params["bfc1"]
    y = y @ params["Wfc2"].T + params["bfc2"]
    return y


if __name__ == "__main__":
    # Small config consistent with CNN2D.__init__ (scaled-down defaults).
    N = 16                     # batch (blocked B=8 per grid step -> 2 parallel blocks)
    num_channels = 4
    T = 128
    temp_kernel_length = 16
    spac_kernel_length = 8
    F1, D, F2, l2, n_classes = 8, 2, 16, 32, 2
    batch_block = 8

    # Replicate the dummy-trace that computes l1 in __init__:
    T1 = T - temp_kernel_length + 1          # after conv1
    T2 = T1 // 4                             # after AvgPool(1,4)
    T3 = T2 - spac_kernel_length + 1         # after conv3a
    T4 = T3 // 8                             # after AvgPool(1,8)
    l1 = F2 * 1 * T4

    key = jax.random.PRNGKey(0)
    kx, kp = jax.random.split(key)
    x = jax.random.normal(kx, (N, num_channels, T), jnp.float32)
    params = init_params(kp, num_channels=num_channels,
                         temp_kernel_length=temp_kernel_length,
                         spac_kernel_length=spac_kernel_length,
                         F1=F1, D=D, F2=F2, l1=l1, l2=l2, n_classes=n_classes)

    fwd = jax.jit(functools.partial(
        cnn2d_forward, num_channels=num_channels,
        temp_kernel_length=temp_kernel_length,
        spac_kernel_length=spac_kernel_length,
        F1=F1, D=D, F2=F2, n_classes=n_classes, batch_block=batch_block))

    out = jax.block_until_ready(fwd(params, x))
    assert out.shape == (N, n_classes)

    ref = jax.block_until_ready(reference_forward(params, x))
    # bf16 MXU operands (f32 accumulation) with folded BN / composed weights
    # -> slightly looser tolerance than pure f32.
    np.testing.assert_allclose(np.asarray(out), np.asarray(ref), rtol=3e-2, atol=3e-2)

    print("KERNEL_OK")
</pallas_src>

<mosaic_0001>
module attributes {stable_mosaic.version = 11 : i64} {
  func.func @_fused_forward_kernel(%arg0: i32, %arg1: memref<32x128xbf16, #tpu.memory_space<vmem>>, %arg2: memref<8x128x128xbf16, #tpu.memory_space<vmem>>, %arg3: memref<8x128x32xbf16, #tpu.memory_space<vmem>>, %arg4: memref<128x1xf32, #tpu.memory_space<vmem>>, %arg5: memref<8x128x128xbf16, #tpu.memory_space<vmem>>, %arg6: memref<8x128x128xbf16, #tpu.memory_space<vmem>>, %arg7: memref<128x1xf32, #tpu.memory_space<vmem>>, %arg8: memref<16x128x2xf32, #tpu.memory_space<vmem>>, %arg9: memref<1x2xf32, #tpu.memory_space<vmem>>, %arg10: memref<8x2xf32, #tpu.memory_space<vmem>>) attributes {dimension_semantics = [#tpu.dimension_semantics<parallel>], iteration_bounds = array<i64: 2>, scalar_prefetch = 0 : i64, scratch_operands = 0 : i64, tpu.core_type = #tpu.core_type<tc>, window_params = [{transform_indices = @transform_0, window_bounds = array<i64: 32, 128>}, {pipeline_mode = #tpu.pipeline_mode<synchronous>, transform_indices = @transform_1, window_bounds = array<i64: 8, 128, 128>}, {pipeline_mode = #tpu.pipeline_mode<synchronous>, transform_indices = @transform_2, window_bounds = array<i64: 8, 128, 32>}, {pipeline_mode = #tpu.pipeline_mode<synchronous>, transform_indices = @transform_3, window_bounds = array<i64: 128, 1>}, {pipeline_mode = #tpu.pipeline_mode<synchronous>, transform_indices = @transform_4, window_bounds = array<i64: 8, 128, 128>}, {pipeline_mode = #tpu.pipeline_mode<synchronous>, transform_indices = @transform_5, window_bounds = array<i64: 8, 128, 128>}, {pipeline_mode = #tpu.pipeline_mode<synchronous>, transform_indices = @transform_6, window_bounds = array<i64: 128, 1>}, {pipeline_mode = #tpu.pipeline_mode<synchronous>, transform_indices = @transform_7, window_bounds = array<i64: 16, 128, 2>}, {pipeline_mode = #tpu.pipeline_mode<synchronous>, transform_indices = @transform_8, window_bounds = array<i64: 1, 2>}, {transform_indices = @transform_9, window_bounds = array<i64: 8, 2>}]} {
    %c0 = arith.constant 0 : index
    %c0_0 = arith.constant 0 : index
    %0 = vector.load %arg1[%c0, %c0_0] : memref<32x128xbf16, #tpu.memory_space<vmem>>, vector<32x128xbf16>
    %cst = arith.constant 0.000000e+00 : f32
    %1 = vector.broadcast %cst : f32 to vector<128x128xf32>
    %c0_1 = arith.constant 0 : index
    %c0_2 = arith.constant 0 : index
    %c0_3 = arith.constant 0 : index
    %2 = vector.load %arg2[%c0_1, %c0_2, %c0_3] : memref<8x128x128xbf16, #tpu.memory_space<vmem>>, vector<1x128x128xbf16>
    %3 = vector.shape_cast %2 : vector<1x128x128xbf16> to vector<128x128xbf16>
    %cst_4 = arith.constant dense<0.000000e+00> : vector<32x128xf32>
    %4 = tpu.matmul %0, %3, %cst_4 {dimension_numbers = #tpu.dot_dimension_numbers<[1], [0], [0], [1], [0, 0, 1, 1], [], []>} : vector<32x128xbf16>, vector<128x128xbf16>, vector<32x128xf32> -> vector<32x128xf32>
    %c0_5 = arith.constant 0 : index
    %c0_6 = arith.constant 0 : index
    %c0_7 = arith.constant 0 : index
    %5 = vector.load %arg3[%c0_5, %c0_6, %c0_7] : memref<8x128x32xbf16, #tpu.memory_space<vmem>>, vector<1x128x32xbf16>
    %6 = vector.shape_cast %5 : vector<1x128x32xbf16> to vector<128x32xbf16>
    %7 = arith.truncf %4 : vector<32x128xf32> to vector<32x128xbf16>
    %cst_8 = arith.constant dense<0.000000e+00> : vector<128x128xf32>
    %8 = tpu.matmul %6, %7, %cst_8 {dimension_numbers = #tpu.dot_dimension_numbers<[1], [0], [0], [1], [0, 0, 1, 1], [], []>} : vector<128x32xbf16>, vector<32x128xbf16>, vector<128x128xf32> -> vector<128x128xf32>
    %9 = arith.addf %1, %8 : vector<128x128xf32>
    %c1 = arith.constant 1 : index
    %c0_9 = arith.constant 0 : index
    %c0_10 = arith.constant 0 : index
    %10 = vector.load %arg2[%c1, %c0_9, %c0_10] : memref<8x128x128xbf16, #tpu.memory_space<vmem>>, vector<1x128x128xbf16>
    %11 = vector.shape_cast %10 : vector<1x128x128xbf16> to vector<128x128xbf16>
    %cst_11 = arith.constant dense<0.000000e+00> : vector<32x128xf32>
    %12 = tpu.matmul %0, %11, %cst_11 {dimension_numbers = #tpu.dot_dimension_numbers<[1], [0], [0], [1], [0, 0, 1, 1], [], []>} : vector<32x128xbf16>, vector<128x128xbf16>, vector<32x128xf32> -> vector<32x128xf32>
    %c1_12 = arith.constant 1 : index
    %c0_13 = arith.constant 0 : index
    %c0_14 = arith.constant 0 : index
    %13 = vector.load %arg3[%c1_12, %c0_13, %c0_14] : memref<8x128x32xbf16, #tpu.memory_space<vmem>>, vector<1x128x32xbf16>
    %14 = vector.shape_cast %13 : vector<1x128x32xbf16> to vector<128x32xbf16>
    %15 = arith.truncf %12 : vector<32x128xf32> to vector<32x128xbf16>
    %cst_15 = arith.constant dense<0.000000e+00> : vector<128x128xf32>
    %16 = tpu.matmul %14, %15, %cst_15 {dimension_numbers = #tpu.dot_dimension_numbers<[1], [0], [0], [1], [0, 0, 1, 1], [], []>} : vector<128x32xbf16>, vector<32x128xbf16>, vector<128x128xf32> -> vector<128x128xf32>
    %17 = arith.addf %9, %16 : vector<128x128xf32>
    %c2 = arith.constant 2 : index
    %c0_16 = arith.constant 0 : index
    %c0_17 = arith.constant 0 : index
    %18 = vector.load %arg2[%c2, %c0_16, %c0_17] : memref<8x128x128xbf16, #tpu.memory_space<vmem>>, vector<1x128x128xbf16>
    %19 = vector.shape_cast %18 : vector<1x128x128xbf16> to vector<128x128xbf16>
    %cst_18 = arith.constant dense<0.000000e+00> : vector<32x128xf32>
    %20 = tpu.matmul %0, %19, %cst_18 {dimension_numbers = #tpu.dot_dimension_numbers<[1], [0], [0], [1], [0, 0, 1, 1], [], []>} : vector<32x128xbf16>, vector<128x128xbf16>, vector<32x128xf32> -> vector<32x128xf32>
    %c2_19 = arith.constant 2 : index
    %c0_20 = arith.constant 0 : index
    %c0_21 = arith.constant 0 : index
    %21 = vector.load %arg3[%c2_19, %c0_20, %c0_21] : memref<8x128x32xbf16, #tpu.memory_space<vmem>>, vector<1x128x32xbf16>
    %22 = vector.shape_cast %21 : vector<1x128x32xbf16> to vector<128x32xbf16>
    %23 = arith.truncf %20 : vector<32x128xf32> to vector<32x128xbf16>
    %cst_22 = arith.constant dense<0.000000e+00> : vector<128x128xf32>
    %24 = tpu.matmul %22, %23, %cst_22 {dimension_numbers = #tpu.dot_dimension_numbers<[1], [0], [0], [1], [0, 0, 1, 1], [], []>} : vector<128x32xbf16>, vector<32x128xbf16>, vector<128x128xf32> -> vector<128x128xf32>
    %25 = arith.addf %17, %24 : vector<128x128xf32>
    %c3 = arith.constant 3 : index
    %c0_23 = arith.constant 0 : index
    %c0_24 = arith.constant 0 : index
    %26 = vector.load %arg2[%c3, %c0_23, %c0_24] : memref<8x128x128xbf16, #tpu.memory_space<vmem>>, vector<1x128x128xbf16>
    %27 = vector.shape_cast %26 : vector<1x128x128xbf16> to vector<128x128xbf16>
    %cst_25 = arith.constant dense<0.000000e+00> : vector<32x128xf32>
    %28 = tpu.matmul %0, %27, %cst_25 {dimension_numbers = #tpu.dot_dimension_numbers<[1], [0], [0], [1], [0, 0, 1, 1], [], []>} : vector<32x128xbf16>, vector<128x128xbf16>, vector<32x128xf32> -> vector<32x128xf32>
    %c3_26 = arith.constant 3 : index
    %c0_27 = arith.constant 0 : index
    %c0_28 = arith.constant 0 : index
    %29 = vector.load %arg3[%c3_26, %c0_27, %c0_28] : memref<8x128x32xbf16, #tpu.memory_space<vmem>>, vector<1x128x32xbf16>
    %30 = vector.shape_cast %29 : vector<1x128x32xbf16> to vector<128x32xbf16>
    %31 = arith.truncf %28 : vector<32x128xf32> to vector<32x128xbf16>
    %cst_29 = arith.constant dense<0.000000e+00> : vector<128x128xf32>
    %32 = tpu.matmul %30, %31, %cst_29 {dimension_numbers = #tpu.dot_dimension_numbers<[1], [0], [0], [1], [0, 0, 1, 1], [], []>} : vector<128x32xbf16>, vector<32x128xbf16>, vector<128x128xf32> -> vector<128x128xf32>
    %33 = arith.addf %25, %32 : vector<128x128xf32>
    %c4 = arith.constant 4 : index
    %c0_30 = arith.constant 0 : index
    %c0_31 = arith.constant 0 : index
    %34 = vector.load %arg2[%c4, %c0_30, %c0_31] : memref<8x128x128xbf16, #tpu.memory_space<vmem>>, vector<1x128x128xbf16>
    %35 = vector.shape_cast %34 : vector<1x128x128xbf16> to vector<128x128xbf16>
    %cst_32 = arith.constant dense<0.000000e+00> : vector<32x128xf32>
    %36 = tpu.matmul %0, %35, %cst_32 {dimension_numbers = #tpu.dot_dimension_numbers<[1], [0], [0], [1], [0, 0, 1, 1], [], []>} : vector<32x128xbf16>, vector<128x128xbf16>, vector<32x128xf32> -> vector<32x128xf32>
    %c4_33 = arith.constant 4 : index
    %c0_34 = arith.constant 0 : index
    %c0_35 = arith.constant 0 : index
    %37 = vector.load %arg3[%c4_33, %c0_34, %c0_35] : memref<8x128x32xbf16, #tpu.memory_space<vmem>>, vector<1x128x32xbf16>
    %38 = vector.shape_cast %37 : vector<1x128x32xbf16> to vector<128x32xbf16>
    %39 = arith.truncf %36 : vector<32x128xf32> to vector<32x128xbf16>
    %cst_36 = arith.constant dense<0.000000e+00> : vector<128x128xf32>
    %40 = tpu.matmul %38, %39, %cst_36 {dimension_numbers = #tpu.dot_dimension_numbers<[1], [0], [0], [1], [0, 0, 1, 1], [], []>} : vector<128x32xbf16>, vector<32x128xbf16>, vector<128x128xf32> -> vector<128x128xf32>
    %41 = arith.addf %33, %40 : vector<128x128xf32>
    %c5 = arith.constant 5 : index
    %c0_37 = arith.constant 0 : index
    %c0_38 = arith.constant 0 : index
    %42 = vector.load %arg2[%c5, %c0_37, %c0_38] : memref<8x128x128xbf16, #tpu.memory_space<vmem>>, vector<1x128x128xbf16>
    %43 = vector.shape_cast %42 : vector<1x128x128xbf16> to vector<128x128xbf16>
    %cst_39 = arith.constant dense<0.000000e+00> : vector<32x128xf32>
    %44 = tpu.matmul %0, %43, %cst_39 {dimension_numbers = #tpu.dot_dimension_numbers<[1], [0], [0], [1], [0, 0, 1, 1], [], []>} : vector<32x128xbf16>, vector<128x128xbf16>, vector<32x128xf32> -> vector<32x128xf32>
    %c5_40 = arith.constant 5 : index
    %c0_41 = arith.constant 0 : index
    %c0_42 = arith.constant 0 : index
    %45 = vector.load %arg3[%c5_40, %c0_41, %c0_42] : memref<8x128x32xbf16, #tpu.memory_space<vmem>>, vector<1x128x32xbf16>
    %46 = vector.shape_cast %45 : vector<1x128x32xbf16> to vector<128x32xbf16>
    %47 = arith.truncf %44 : vector<32x128xf32> to vector<32x128xbf16>
    %cst_43 = arith.constant dense<0.000000e+00> : vector<128x128xf32>
    %48 = tpu.matmul %46, %47, %cst_43 {dimension_numbers = #tpu.dot_dimension_numbers<[1], [0], [0], [1], [0, 0, 1, 1], [], []>} : vector<128x32xbf16>, vector<32x128xbf16>, vector<128x128xf32> -> vector<128x128xf32>
    %49 = arith.addf %41, %48 : vector<128x128xf32>
    %c6 = arith.constant 6 : index
    %c0_44 = arith.constant 0 : index
    %c0_45 = arith.constant 0 : index
    %50 = vector.load %arg2[%c6, %c0_44, %c0_45] : memref<8x128x128xbf16, #tpu.memory_space<vmem>>, vector<1x128x128xbf16>
    %51 = vector.shape_cast %50 : vector<1x128x128xbf16> to vector<128x128xbf16>
    %cst_46 = arith.constant dense<0.000000e+00> : vector<32x128xf32>
    %52 = tpu.matmul %0, %51, %cst_46 {dimension_numbers = #tpu.dot_dimension_numbers<[1], [0], [0], [1], [0, 0, 1, 1], [], []>} : vector<32x128xbf16>, vector<128x128xbf16>, vector<32x128xf32> -> vector<32x128xf32>
    %c6_47 = arith.constant 6 : index
    %c0_48 = arith.constant 0 : index
    %c0_49 = arith.constant 0 : index
    %53 = vector.load %arg3[%c6_47, %c0_48, %c0_49] : memref<8x128x32xbf16, #tpu.memory_space<vmem>>, vector<1x128x32xbf16>
    %54 = vector.shape_cast %53 : vector<1x128x32xbf16> to vector<128x32xbf16>
    %55 = arith.truncf %52 : vector<32x128xf32> to vector<32x128xbf16>
    %cst_50 = arith.constant dense<0.000000e+00> : vector<128x128xf32>
    %56 = tpu.matmul %54, %55, %cst_50 {dimension_numbers = #tpu.dot_dimension_numbers<[1], [0], [0], [1], [0, 0, 1, 1], [], []>} : vector<128x32xbf16>, vector<32x128xbf16>, vector<128x128xf32> -> vector<128x128xf32>
    %57 = arith.addf %49, %56 : vector<128x128xf32>
    %c7 = arith.constant 7 : index
    %c0_51 = arith.constant 0 : index
    %c0_52 = arith.constant 0 : index
    %58 = vector.load %arg2[%c7, %c0_51, %c0_52] : memref<8x128x128xbf16, #tpu.memory_space<vmem>>, vector<1x128x128xbf16>
    %59 = vector.shape_cast %58 : vector<1x128x128xbf16> to vector<128x128xbf16>
    %cst_53 = arith.constant dense<0.000000e+00> : vector<32x128xf32>
    %60 = tpu.matmul %0, %59, %cst_53 {dimension_numbers = #tpu.dot_dimension_numbers<[1], [0], [0], [1], [0, 0, 1, 1], [], []>} : vector<32x128xbf16>, vector<128x128xbf16>, vector<32x128xf32> -> vector<32x128xf32>
    %c7_54 = arith.constant 7 : index
    %c0_55 = arith.constant 0 : index
    %c0_56 = arith.constant 0 : index
    %61 = vector.load %arg3[%c7_54, %c0_55, %c0_56] : memref<8x128x32xbf16, #tpu.memory_space<vmem>>, vector<1x128x32xbf16>
    %62 = vector.shape_cast %61 : vector<1x128x32xbf16> to vector<128x32xbf16>
    %63 = arith.truncf %60 : vector<32x128xf32> to vector<32x128xbf16>
    %cst_57 = arith.constant dense<0.000000e+00> : vector<128x128xf32>
    %64 = tpu.matmul %62, %63, %cst_57 {dimension_numbers = #tpu.dot_dimension_numbers<[1], [0], [0], [1], [0, 0, 1, 1], [], []>} : vector<128x32xbf16>, vector<32x128xbf16>, vector<128x128xf32> -> vector<128x128xf32>
    %65 = arith.addf %57, %64 : vector<128x128xf32>
    %c0_58 = arith.constant 0 : index
    %c0_59 = arith.constant 0 : index
    %66 = vector.load %arg4[%c0_58, %c0_59] : memref<128x1xf32, #tpu.memory_space<vmem>>, vector<128x1xf32>
    %67 = vector.broadcast %66 : vector<128x1xf32> to vector<128x128xf32>
    %68 = arith.addf %65, %67 : vector<128x128xf32>
    %cst_60 = arith.constant 0.000000e+00 : f32
    %69 = vector.broadcast %cst_60 : f32 to vector<128x128xf32>
    %70 = arith.cmpf ogt, %68, %69 : vector<128x128xf32>
    %cst_61 = arith.constant 0.000000e+00 : f32
    %71 = vector.broadcast %cst_61 : f32 to vector<128x128xf32>
    %72 = arith.minimumf %68, %71 : vector<128x128xf32>
    %73 = math.exp %72 : vector<128x128xf32>
    %cst_62 = arith.constant 1.000000e+00 : f32
    %74 = vector.broadcast %cst_62 : f32 to vector<128x128xf32>
    %75 = arith.subf %73, %74 : vector<128x128xf32>
    %76 = arith.select %70, %68, %75 : vector<128x128xi1>, vector<128x128xf32>
    %77 = arith.truncf %76 : vector<128x128xf32> to vector<128x128xbf16>
    %cst_63 = arith.constant 0.000000e+00 : f32
    %78 = vector.broadcast %cst_63 : f32 to vector<128x128xf32>
    %c0_64 = arith.constant 0 : index
    %c0_65 = arith.constant 0 : index
    %c0_66 = arith.constant 0 : index
    %79 = vector.load %arg5[%c0_64, %c0_65, %c0_66] : memref<8x128x128xbf16, #tpu.memory_space<vmem>>, vector<1x128x128xbf16>
    %80 = vector.shape_cast %79 : vector<1x128x128xbf16> to vector<128x128xbf16>
    %cst_67 = arith.constant dense<0.000000e+00> : vector<128x128xf32>
    %81 = tpu.matmul %77, %80, %cst_67 {dimension_numbers = #tpu.dot_dimension_numbers<[1], [0], [0], [1], [0, 0, 1, 1], [], []>} : vector<128x128xbf16>, vector<128x128xbf16>, vector<128x128xf32> -> vector<128x128xf32>
    %c0_68 = arith.constant 0 : index
    %c0_69 = arith.constant 0 : index
    %c0_70 = arith.constant 0 : index
    %82 = vector.load %arg6[%c0_68, %c0_69, %c0_70] : memref<8x128x128xbf16, #tpu.memory_space<vmem>>, vector<1x128x128xbf16>
    %83 = vector.shape_cast %82 : vector<1x128x128xbf16> to vector<128x128xbf16>
    %84 = arith.truncf %81 : vector<128x128xf32> to vector<128x128xbf16>
    %cst_71 = arith.constant dense<0.000000e+00> : vector<128x128xf32>
    %85 = tpu.matmul %83, %84, %cst_71 {dimension_numbers = #tpu.dot_dimension_numbers<[1], [0], [0], [1], [0, 0, 1, 1], [], []>} : vector<128x128xbf16>, vector<128x128xbf16>, vector<128x128xf32> -> vector<128x128xf32>
    %86 = arith.addf %78, %85 : vector<128x128xf32>
    %c1_72 = arith.constant 1 : index
    %c0_73 = arith.constant 0 : index
    %c0_74 = arith.constant 0 : index
    %87 = vector.load %arg5[%c1_72, %c0_73, %c0_74] : memref<8x128x128xbf16, #tpu.memory_space<vmem>>, vector<1x128x128xbf16>
    %88 = vector.shape_cast %87 : vector<1x128x128xbf16> to vector<128x128xbf16>
    %cst_75 = arith.constant dense<0.000000e+00> : vector<128x128xf32>
    %89 = tpu.matmul %77, %88, %cst_75 {dimension_numbers = #tpu.dot_dimension_numbers<[1], [0], [0], [1], [0, 0, 1, 1], [], []>} : vector<128x128xbf16>, vector<128x128xbf16>, vector<128x128xf32> -> vector<128x128xf32>
    %c1_76 = arith.constant 1 : index
    %c0_77 = arith.constant 0 : index
    %c0_78 = arith.constant 0 : index
    %90 = vector.load %arg6[%c1_76, %c0_77, %c0_78] : memref<8x128x128xbf16, #tpu.memory_space<vmem>>, vector<1x128x128xbf16>
    %91 = vector.shape_cast %90 : vector<1x128x128xbf16> to vector<128x128xbf16>
    %92 = arith.truncf %89 : vector<128x128xf32> to vector<128x128xbf16>
    %cst_79 = arith.constant dense<0.000000e+00> : vector<128x128xf32>
    %93 = tpu.matmul %91, %92, %cst_79 {dimension_numbers = #tpu.dot_dimension_numbers<[1], [0], [0], [1], [0, 0, 1, 1], [], []>} : vector<128x128xbf16>, vector<128x128xbf16>, vector<128x128xf32> -> vector<128x128xf32>
    %94 = arith.addf %86, %93 : vector<128x128xf32>
    %c2_80 = arith.constant 2 : index
    %c0_81 = arith.constant 0 : index
    %c0_82 = arith.constant 0 : index
    %95 = vector.load %arg5[%c2_80, %c0_81, %c0_82] : memref<8x128x128xbf16, #tpu.memory_space<vmem>>, vector<1x128x128xbf16>
    %96 = vector.shape_cast %95 : vector<1x128x128xbf16> to vector<128x128xbf16>
    %cst_83 = arith.constant dense<0.000000e+00> : vector<128x128xf32>
    %97 = tpu.matmul %77, %96, %cst_83 {dimension_numbers = #tpu.dot_dimension_numbers<[1], [0], [0], [1], [0, 0, 1, 1], [], []>} : vector<128x128xbf16>, vector<128x128xbf16>, vector<128x128xf32> -> vector<128x128xf32>
    %c2_84 = arith.constant 2 : index
    %c0_85 = arith.constant 0 : index
    %c0_86 = arith.constant 0 : index
    %98 = vector.load %arg6[%c2_84, %c0_85, %c0_86] : memref<8x128x128xbf16, #tpu.memory_space<vmem>>, vector<1x128x128xbf16>
    %99 = vector.shape_cast %98 : vector<1x128x128xbf16> to vector<128x128xbf16>
    %100 = arith.truncf %97 : vector<128x128xf32> to vector<128x128xbf16>
    %cst_87 = arith.constant dense<0.000000e+00> : vector<128x128xf32>
    %101 = tpu.matmul %99, %100, %cst_87 {dimension_numbers = #tpu.dot_dimension_numbers<[1], [0], [0], [1], [0, 0, 1, 1], [], []>} : vector<128x128xbf16>, vector<128x128xbf16>, vector<128x128xf32> -> vector<128x128xf32>
    %102 = arith.addf %94, %101 : vector<128x128xf32>
    %c3_88 = arith.constant 3 : index
    %c0_89 = arith.constant 0 : index
    %c0_90 = arith.constant 0 : index
    %103 = vector.load %arg5[%c3_88, %c0_89, %c0_90] : memref<8x128x128xbf16, #tpu.memory_space<vmem>>, vector<1x128x128xbf16>
    %104 = vector.shape_cast %103 : vector<1x128x128xbf16> to vector<128x128xbf16>
    %cst_91 = arith.constant dense<0.000000e+00> : vector<128x128xf32>
    %105 = tpu.matmul %77, %104, %cst_91 {dimension_numbers = #tpu.dot_dimension_numbers<[1], [0], [0], [1], [0, 0, 1, 1], [], []>} : vector<128x128xbf16>, vector<128x128xbf16>, vector<128x128xf32> -> vector<128x128xf32>
    %c3_92 = arith.constant 3 : index
    %c0_93 = arith.constant 0 : index
    %c0_94 = arith.constant 0 : index
    %106 = vector.load %arg6[%c3_92, %c0_93, %c0_94] : memref<8x128x128xbf16, #tpu.memory_space<vmem>>, vector<1x128x128xbf16>
    %107 = vector.shape_cast %106 : vector<1x128x128xbf16> to vector<128x128xbf16>
    %108 = arith.truncf %105 : vector<128x128xf32> to vector<128x128xbf16>
    %cst_95 = arith.constant dense<0.000000e+00> : vector<128x128xf32>
    %109 = tpu.matmul %107, %108, %cst_95 {dimension_numbers = #tpu.dot_dimension_numbers<[1], [0], [0], [1], [0, 0, 1, 1], [], []>} : vector<128x128xbf16>, vector<128x128xbf16>, vector<128x128xf32> -> vector<128x128xf32>
    %110 = arith.addf %102, %109 : vector<128x128xf32>
    %c4_96 = arith.constant 4 : index
    %c0_97 = arith.constant 0 : index
    %c0_98 = arith.constant 0 : index
    %111 = vector.load %arg5[%c4_96, %c0_97, %c0_98] : memref<8x128x128xbf16, #tpu.memory_space<vmem>>, vector<1x128x128xbf16>
    %112 = vector.shape_cast %111 : vector<1x128x128xbf16> to vector<128x128xbf16>
    %cst_99 = arith.constant dense<0.000000e+00> : vector<128x128xf32>
    %113 = tpu.matmul %77, %112, %cst_99 {dimension_numbers = #tpu.dot_dimension_numbers<[1], [0], [0], [1], [0, 0, 1, 1], [], []>} : vector<128x128xbf16>, vector<128x128xbf16>, vector<128x128xf32> -> vector<128x128xf32>
    %c4_100 = arith.constant 4 : index
    %c0_101 = arith.constant 0 : index
    %c0_102 = arith.constant 0 : index
    %114 = vector.load %arg6[%c4_100, %c0_101, %c0_102] : memref<8x128x128xbf16, #tpu.memory_space<vmem>>, vector<1x128x128xbf16>
    %115 = vector.shape_cast %114 : vector<1x128x128xbf16> to vector<128x128xbf16>
    %116 = arith.truncf %113 : vector<128x128xf32> to vector<128x128xbf16>
    %cst_103 = arith.constant dense<0.000000e+00> : vector<128x128xf32>
    %117 = tpu.matmul %115, %116, %cst_103 {dimension_numbers = #tpu.dot_dimension_numbers<[1], [0], [0], [1], [0, 0, 1, 1], [], []>} : vector<128x128xbf16>, vector<128x128xbf16>, vector<128x128xf32> -> vector<128x128xf32>
    %118 = arith.addf %110, %117 : vector<128x128xf32>
    %c5_104 = arith.constant 5 : index
    %c0_105 = arith.constant 0 : index
    %c0_106 = arith.constant 0 : index
    %119 = vector.load %arg5[%c5_104, %c0_105, %c0_106] : memref<8x128x128xbf16, #tpu.memory_space<vmem>>, vector<1x128x128xbf16>
    %120 = vector.shape_cast %119 : vector<1x128x128xbf16> to vector<128x128xbf16>
    %cst_107 = arith.constant dense<0.000000e+00> : vector<128x128xf32>
    %121 = tpu.matmul %77, %120, %cst_107 {dimension_numbers = #tpu.dot_dimension_numbers<[1], [0], [0], [1], [0, 0, 1, 1], [], []>} : vector<128x128xbf16>, vector<128x128xbf16>, vector<128x128xf32> -> vector<128x128xf32>
    %c5_108 = arith.constant 5 : index
    %c0_109 = arith.constant 0 : index
    %c0_110 = arith.constant 0 : index
    %122 = vector.load %arg6[%c5_108, %c0_109, %c0_110] : memref<8x128x128xbf16, #tpu.memory_space<vmem>>, vector<1x128x128xbf16>
    %123 = vector.shape_cast %122 : vector<1x128x128xbf16> to vector<128x128xbf16>
    %124 = arith.truncf %121 : vector<128x128xf32> to vector<128x128xbf16>
    %cst_111 = arith.constant dense<0.000000e+00> : vector<128x128xf32>
    %125 = tpu.matmul %123, %124, %cst_111 {dimension_numbers = #tpu.dot_dimension_numbers<[1], [0], [0], [1], [0, 0, 1, 1], [], []>} : vector<128x128xbf16>, vector<128x128xbf16>, vector<128x128xf32> -> vector<128x128xf32>
    %126 = arith.addf %118, %125 : vector<128x128xf32>
    %c6_112 = arith.constant 6 : index
    %c0_113 = arith.constant 0 : index
    %c0_114 = arith.constant 0 : index
    %127 = vector.load %arg5[%c6_112, %c0_113, %c0_114] : memref<8x128x128xbf16, #tpu.memory_space<vmem>>, vector<1x128x128xbf16>
    %128 = vector.shape_cast %127 : vector<1x128x128xbf16> to vector<128x128xbf16>
    %cst_115 = arith.constant dense<0.000000e+00> : vector<128x128xf32>
    %129 = tpu.matmul %77, %128, %cst_115 {dimension_numbers = #tpu.dot_dimension_numbers<[1], [0], [0], [1], [0, 0, 1, 1], [], []>} : vector<128x128xbf16>, vector<128x128xbf16>, vector<128x128xf32> -> vector<128x128xf32>
    %c6_116 = arith.constant 6 : index
    %c0_117 = arith.constant 0 : index
    %c0_118 = arith.constant 0 : index
    %130 = vector.load %arg6[%c6_116, %c0_117, %c0_118] : memref<8x128x128xbf16, #tpu.memory_space<vmem>>, vector<1x128x128xbf16>
    %131 = vector.shape_cast %130 : vector<1x128x128xbf16> to vector<128x128xbf16>
    %132 = arith.truncf %129 : vector<128x128xf32> to vector<128x128xbf16>
    %cst_119 = arith.constant dense<0.000000e+00> : vector<128x128xf32>
    %133 = tpu.matmul %131, %132, %cst_119 {dimension_numbers = #tpu.dot_dimension_numbers<[1], [0], [0], [1], [0, 0, 1, 1], [], []>} : vector<128x128xbf16>, vector<128x128xbf16>, vector<128x128xf32> -> vector<128x128xf32>
    %134 = arith.addf %126, %133 : vector<128x128xf32>
    %c7_120 = arith.constant 7 : index
    %c0_121 = arith.constant 0 : index
    %c0_122 = arith.constant 0 : index
    %135 = vector.load %arg5[%c7_120, %c0_121, %c0_122] : memref<8x128x128xbf16, #tpu.memory_space<vmem>>, vector<1x128x128xbf16>
    %136 = vector.shape_cast %135 : vector<1x128x128xbf16> to vector<128x128xbf16>
    %cst_123 = arith.constant dense<0.000000e+00> : vector<128x128xf32>
    %137 = tpu.matmul %77, %136, %cst_123 {dimension_numbers = #tpu.dot_dimension_numbers<[1], [0], [0], [1], [0, 0, 1, 1], [], []>} : vector<128x128xbf16>, vector<128x128xbf16>, vector<128x128xf32> -> vector<128x128xf32>
    %c7_124 = arith.constant 7 : index
    %c0_125 = arith.constant 0 : index
    %c0_126 = arith.constant 0 : index
    %138 = vector.load %arg6[%c7_124, %c0_125, %c0_126] : memref<8x128x128xbf16, #tpu.memory_space<vmem>>, vector<1x128x128xbf16>
    %139 = vector.shape_cast %138 : vector<1x128x128xbf16> to vector<128x128xbf16>
    %140 = arith.truncf %137 : vector<128x128xf32> to vector<128x128xbf16>
    %cst_127 = arith.constant dense<0.000000e+00> : vector<128x128xf32>
    %141 = tpu.matmul %139, %140, %cst_127 {dimension_numbers = #tpu.dot_dimension_numbers<[1], [0], [0], [1], [0, 0, 1, 1], [], []>} : vector<128x128xbf16>, vector<128x128xbf16>, vector<128x128xf32> -> vector<128x128xf32>
    %142 = arith.addf %134, %141 : vector<128x128xf32>
    %c0_128 = arith.constant 0 : index
    %c0_129 = arith.constant 0 : index
    %143 = vector.load %arg7[%c0_128, %c0_129] : memref<128x1xf32, #tpu.memory_space<vmem>>, vector<128x1xf32>
    %144 = vector.broadcast %143 : vector<128x1xf32> to vector<128x128xf32>
    %145 = arith.addf %142, %144 : vector<128x128xf32>
    %cst_130 = arith.constant 0.000000e+00 : f32
    %146 = vector.broadcast %cst_130 : f32 to vector<128x128xf32>
    %147 = arith.cmpf ogt, %145, %146 : vector<128x128xf32>
    %cst_131 = arith.constant 0.000000e+00 : f32
    %148 = vector.broadcast %cst_131 : f32 to vector<128x128xf32>
    %149 = arith.minimumf %145, %148 : vector<128x128xf32>
    %150 = math.exp %149 : vector<128x128xf32>
    %cst_132 = arith.constant 1.000000e+00 : f32
    %151 = vector.broadcast %cst_132 : f32 to vector<128x128xf32>
    %152 = arith.subf %150, %151 : vector<128x128xf32>
    %153 = arith.select %147, %145, %152 : vector<128x128xi1>, vector<128x128xf32>
    %cst_133 = arith.constant 0.000000e+00 : f32
    %154 = vector.broadcast %cst_133 : f32 to vector<8x2xf32>
    %155 = vector.extract_strided_slice %153 {offsets = [0, 0], sizes = [8, 128], strides = [1, 1]} : vector<128x128xf32> to vector<8x128xf32>
    %c0_134 = arith.constant 0 : index
    %c0_135 = arith.constant 0 : index
    %c0_136 = arith.constant 0 : index
    %156 = vector.load %arg8[%c0_134, %c0_135, %c0_136] : memref<16x128x2xf32, #tpu.memory_space<vmem>>, vector<1x128x2xf32>
    %157 = vector.shape_cast %156 : vector<1x128x2xf32> to vector<128x2xf32>
    %cst_137 = arith.constant dense<0.000000e+00> : vector<8x2xf32>
    %158 = tpu.matmul %155, %157, %cst_137 {dimension_numbers = #tpu.dot_dimension_numbers<[1], [0], [0], [1], [0, 0, 1, 1], [], []>} : vector<8x128xf32>, vector<128x2xf32>, vector<8x2xf32> -> vector<8x2xf32>
    %159 = arith.addf %154, %158 : vector<8x2xf32>
    %160 = vector.extract_strided_slice %153 {offsets = [8, 0], sizes = [8, 128], strides = [1, 1]} : vector<128x128xf32> to vector<8x128xf32>
    %c1_138 = arith.constant 1 : index
    %c0_139 = arith.constant 0 : index
    %c0_140 = arith.constant 0 : index
    %161 = vector.load %arg8[%c1_138, %c0_139, %c0_140] : memref<16x128x2xf32, #tpu.memory_space<vmem>>, vector<1x128x2xf32>
    %162 = vector.shape_cast %161 : vector<1x128x2xf32> to vector<128x2xf32>
    %cst_141 = arith.constant dense<0.000000e+00> : vector<8x2xf32>
    %163 = tpu.matmul %160, %162, %cst_141 {dimension_numbers = #tpu.dot_dimension_numbers<[1], [0], [0], [1], [0, 0, 1, 1], [], []>} : vector<8x128xf32>, vector<128x2xf32>, vector<8x2xf32> -> vector<8x2xf32>
    %164 = arith.addf %159, %163 : vector<8x2xf32>
    %165 = vector.extract_strided_slice %153 {offsets = [16, 0], sizes = [8, 128], strides = [1, 1]} : vector<128x128xf32> to vector<8x128xf32>
    %c2_142 = arith.constant 2 : index
    %c0_143 = arith.constant 0 : index
    %c0_144 = arith.constant 0 : index
    %166 = vector.load %arg8[%c2_142, %c0_143, %c0_144] : memref<16x128x2xf32, #tpu.memory_space<vmem>>, vector<1x128x2xf32>
    %167 = vector.shape_cast %166 : vector<1x128x2xf32> to vector<128x2xf32>
    %cst_145 = arith.constant dense<0.000000e+00> : vector<8x2xf32>
    %168 = tpu.matmul %165, %167, %cst_145 {dimension_numbers = #tpu.dot_dimension_numbers<[1], [0], [0], [1], [0, 0, 1, 1], [], []>} : vector<8x128xf32>, vector<128x2xf32>, vector<8x2xf32> -> vector<8x2xf32>
    %169 = arith.addf %164, %168 : vector<8x2xf32>
    %170 = vector.extract_strided_slice %153 {offsets = [24, 0], sizes = [8, 128], strides = [1, 1]} : vector<128x128xf32> to vector<8x128xf32>
    %c3_146 = arith.constant 3 : index
    %c0_147 = arith.constant 0 : index
    %c0_148 = arith.constant 0 : index
    %171 = vector.load %arg8[%c3_146, %c0_147, %c0_148] : memref<16x128x2xf32, #tpu.memory_space<vmem>>, vector<1x128x2xf32>
    %172 = vector.shape_cast %171 : vector<1x128x2xf32> to vector<128x2xf32>
    %cst_149 = arith.constant dense<0.000000e+00> : vector<8x2xf32>
    %173 = tpu.matmul %170, %172, %cst_149 {dimension_numbers = #tpu.dot_dimension_numbers<[1], [0], [0], [1], [0, 0, 1, 1], [], []>} : vector<8x128xf32>, vector<128x2xf32>, vector<8x2xf32> -> vector<8x2xf32>
    %174 = arith.addf %169, %173 : vector<8x2xf32>
    %175 = vector.extract_strided_slice %153 {offsets = [32, 0], sizes = [8, 128], strides = [1, 1]} : vector<128x128xf32> to vector<8x128xf32>
    %c4_150 = arith.constant 4 : index
    %c0_151 = arith.constant 0 : index
    %c0_152 = arith.constant 0 : index
    %176 = vector.load %arg8[%c4_150, %c0_151, %c0_152] : memref<16x128x2xf32, #tpu.memory_space<vmem>>, vector<1x128x2xf32>
    %177 = vector.shape_cast %176 : vector<1x128x2xf32> to vector<128x2xf32>
    %cst_153 = arith.constant dense<0.000000e+00> : vector<8x2xf32>
    %178 = tpu.matmul %175, %177, %cst_153 {dimension_numbers = #tpu.dot_dimension_numbers<[1], [0], [0], [1], [0, 0, 1, 1], [], []>} : vector<8x128xf32>, vector<128x2xf32>, vector<8x2xf32> -> vector<8x2xf32>
    %179 = arith.addf %174, %178 : vector<8x2xf32>
    %180 = vector.extract_strided_slice %153 {offsets = [40, 0], sizes = [8, 128], strides = [1, 1]} : vector<128x128xf32> to vector<8x128xf32>
    %c5_154 = arith.constant 5 : index
    %c0_155 = arith.constant 0 : index
    %c0_156 = arith.constant 0 : index
    %181 = vector.load %arg8[%c5_154, %c0_155, %c0_156] : memref<16x128x2xf32, #tpu.memory_space<vmem>>, vector<1x128x2xf32>
    %182 = vector.shape_cast %181 : vector<1x128x2xf32> to vector<128x2xf32>
    %cst_157 = arith.constant dense<0.000000e+00> : vector<8x2xf32>
    %183 = tpu.matmul %180, %182, %cst_157 {dimension_numbers = #tpu.dot_dimension_numbers<[1], [0], [0], [1], [0, 0, 1, 1], [], []>} : vector<8x128xf32>, vector<128x2xf32>, vector<8x2xf32> -> vector<8x2xf32>
    %184 = arith.addf %179, %183 : vector<8x2xf32>
    %185 = vector.extract_strided_slice %153 {offsets = [48, 0], sizes = [8, 128], strides = [1, 1]} : vector<128x128xf32> to vector<8x128xf32>
    %c6_158 = arith.constant 6 : index
    %c0_159 = arith.constant 0 : index
    %c0_160 = arith.constant 0 : index
    %186 = vector.load %arg8[%c6_158, %c0_159, %c0_160] : memref<16x128x2xf32, #tpu.memory_space<vmem>>, vector<1x128x2xf32>
    %187 = vector.shape_cast %186 : vector<1x128x2xf32> to vector<128x2xf32>
    %cst_161 = arith.constant dense<0.000000e+00> : vector<8x2xf32>
    %188 = tpu.matmul %185, %187, %cst_161 {dimension_numbers = #tpu.dot_dimension_numbers<[1], [0], [0], [1], [0, 0, 1, 1], [], []>} : vector<8x128xf32>, vector<128x2xf32>, vector<8x2xf32> -> vector<8x2xf32>
    %189 = arith.addf %184, %188 : vector<8x2xf32>
    %190 = vector.extract_strided_slice %153 {offsets = [56, 0], sizes = [8, 128], strides = [1, 1]} : vector<128x128xf32> to vector<8x128xf32>
    %c7_162 = arith.constant 7 : index
    %c0_163 = arith.constant 0 : index
    %c0_164 = arith.constant 0 : index
    %191 = vector.load %arg8[%c7_162, %c0_163, %c0_164] : memref<16x128x2xf32, #tpu.memory_space<vmem>>, vector<1x128x2xf32>
    %192 = vector.shape_cast %191 : vector<1x128x2xf32> to vector<128x2xf32>
    %cst_165 = arith.constant dense<0.000000e+00> : vector<8x2xf32>
    %193 = tpu.matmul %190, %192, %cst_165 {dimension_numbers = #tpu.dot_dimension_numbers<[1], [0], [0], [1], [0, 0, 1, 1], [], []>} : vector<8x128xf32>, vector<128x2xf32>, vector<8x2xf32> -> vector<8x2xf32>
    %194 = arith.addf %189, %193 : vector<8x2xf32>
    %195 = vector.extract_strided_slice %153 {offsets = [64, 0], sizes = [8, 128], strides = [1, 1]} : vector<128x128xf32> to vector<8x128xf32>
    %c8 = arith.constant 8 : index
    %c0_166 = arith.constant 0 : index
    %c0_167 = arith.constant 0 : index
    %196 = vector.load %arg8[%c8, %c0_166, %c0_167] : memref<16x128x2xf32, #tpu.memory_space<vmem>>, vector<1x128x2xf32>
    %197 = vector.shape_cast %196 : vector<1x128x2xf32> to vector<128x2xf32>
    %cst_168 = arith.constant dense<0.000000e+00> : vector<8x2xf32>
    %198 = tpu.matmul %195, %197, %cst_168 {dimension_numbers = #tpu.dot_dimension_numbers<[1], [0], [0], [1], [0, 0, 1, 1], [], []>} : vector<8x128xf32>, vector<128x2xf32>, vector<8x2xf32> -> vector<8x2xf32>
    %199 = arith.addf %194, %198 : vector<8x2xf32>
    %200 = vector.extract_strided_slice %153 {offsets = [72, 0], sizes = [8, 128], strides = [1, 1]} : vector<128x128xf32> to vector<8x128xf32>
    %c9 = arith.constant 9 : index
    %c0_169 = arith.constant 0 : index
    %c0_170 = arith.constant 0 : index
    %201 = vector.load %arg8[%c9, %c0_169, %c0_170] : memref<16x128x2xf32, #tpu.memory_space<vmem>>, vector<1x128x2xf32>
    %202 = vector.shape_cast %201 : vector<1x128x2xf32> to vector<128x2xf32>
    %cst_171 = arith.constant dense<0.000000e+00> : vector<8x2xf32>
    %203 = tpu.matmul %200, %202, %cst_171 {dimension_numbers = #tpu.dot_dimension_numbers<[1], [0], [0], [1], [0, 0, 1, 1], [], []>} : vector<8x128xf32>, vector<128x2xf32>, vector<8x2xf32> -> vector<8x2xf32>
    %204 = arith.addf %199, %203 : vector<8x2xf32>
    %205 = vector.extract_strided_slice %153 {offsets = [80, 0], sizes = [8, 128], strides = [1, 1]} : vector<128x128xf32> to vector<8x128xf32>
    %c10 = arith.constant 10 : index
    %c0_172 = arith.constant 0 : index
    %c0_173 = arith.constant 0 : index
    %206 = vector.load %arg8[%c10, %c0_172, %c0_173] : memref<16x128x2xf32, #tpu.memory_space<vmem>>, vector<1x128x2xf32>
    %207 = vector.shape_cast %206 : vector<1x128x2xf32> to vector<128x2xf32>
    %cst_174 = arith.constant dense<0.000000e+00> : vector<8x2xf32>
    %208 = tpu.matmul %205, %207, %cst_174 {dimension_numbers = #tpu.dot_dimension_numbers<[1], [0], [0], [1], [0, 0, 1, 1], [], []>} : vector<8x128xf32>, vector<128x2xf32>, vector<8x2xf32> -> vector<8x2xf32>
    %209 = arith.addf %204, %208 : vector<8x2xf32>
    %210 = vector.extract_strided_slice %153 {offsets = [88, 0], sizes = [8, 128], strides = [1, 1]} : vector<128x128xf32> to vector<8x128xf32>
    %c11 = arith.constant 11 : index
    %c0_175 = arith.constant 0 : index
    %c0_176 = arith.constant 0 : index
    %211 = vector.load %arg8[%c11, %c0_175, %c0_176] : memref<16x128x2xf32, #tpu.memory_space<vmem>>, vector<1x128x2xf32>
    %212 = vector.shape_cast %211 : vector<1x128x2xf32> to vector<128x2xf32>
    %cst_177 = arith.constant dense<0.000000e+00> : vector<8x2xf32>
    %213 = tpu.matmul %210, %212, %cst_177 {dimension_numbers = #tpu.dot_dimension_numbers<[1], [0], [0], [1], [0, 0, 1, 1], [], []>} : vector<8x128xf32>, vector<128x2xf32>, vector<8x2xf32> -> vector<8x2xf32>
    %214 = arith.addf %209, %213 : vector<8x2xf32>
    %215 = vector.extract_strided_slice %153 {offsets = [96, 0], sizes = [8, 128], strides = [1, 1]} : vector<128x128xf32> to vector<8x128xf32>
    %c12 = arith.constant 12 : index
    %c0_178 = arith.constant 0 : index
    %c0_179 = arith.constant 0 : index
    %216 = vector.load %arg8[%c12, %c0_178, %c0_179] : memref<16x128x2xf32, #tpu.memory_space<vmem>>, vector<1x128x2xf32>
    %217 = vector.shape_cast %216 : vector<1x128x2xf32> to vector<128x2xf32>
    %cst_180 = arith.constant dense<0.000000e+00> : vector<8x2xf32>
    %218 = tpu.matmul %215, %217, %cst_180 {dimension_numbers = #tpu.dot_dimension_numbers<[1], [0], [0], [1], [0, 0, 1, 1], [], []>} : vector<8x128xf32>, vector<128x2xf32>, vector<8x2xf32> -> vector<8x2xf32>
    %219 = arith.addf %214, %218 : vector<8x2xf32>
    %220 = vector.extract_strided_slice %153 {offsets = [104, 0], sizes = [8, 128], strides = [1, 1]} : vector<128x128xf32> to vector<8x128xf32>
    %c13 = arith.constant 13 : index
    %c0_181 = arith.constant 0 : index
    %c0_182 = arith.constant 0 : index
    %221 = vector.load %arg8[%c13, %c0_181, %c0_182] : memref<16x128x2xf32, #tpu.memory_space<vmem>>, vector<1x128x2xf32>
    %222 = vector.shape_cast %221 : vector<1x128x2xf32> to vector<128x2xf32>
    %cst_183 = arith.constant dense<0.000000e+00> : vector<8x2xf32>
    %223 = tpu.matmul %220, %222, %cst_183 {dimension_numbers = #tpu.dot_dimension_numbers<[1], [0], [0], [1], [0, 0, 1, 1], [], []>} : vector<8x128xf32>, vector<128x2xf32>, vector<8x2xf32> -> vector<8x2xf32>
    %224 = arith.addf %219, %223 : vector<8x2xf32>
    %225 = vector.extract_strided_slice %153 {offsets = [112, 0], sizes = [8, 128], strides = [1, 1]} : vector<128x128xf32> to vector<8x128xf32>
    %c14 = arith.constant 14 : index
    %c0_184 = arith.constant 0 : index
    %c0_185 = arith.constant 0 : index
    %226 = vector.load %arg8[%c14, %c0_184, %c0_185] : memref<16x128x2xf32, #tpu.memory_space<vmem>>, vector<1x128x2xf32>
    %227 = vector.shape_cast %226 : vector<1x128x2xf32> to vector<128x2xf32>
    %cst_186 = arith.constant dense<0.000000e+00> : vector<8x2xf32>
    %228 = tpu.matmul %225, %227, %cst_186 {dimension_numbers = #tpu.dot_dimension_numbers<[1], [0], [0], [1], [0, 0, 1, 1], [], []>} : vector<8x128xf32>, vector<128x2xf32>, vector<8x2xf32> -> vector<8x2xf32>
    %229 = arith.addf %224, %228 : vector<8x2xf32>
    %230 = vector.extract_strided_slice %153 {offsets = [120, 0], sizes = [8, 128], strides = [1, 1]} : vector<128x128xf32> to vector<8x128xf32>
    %c15 = arith.constant 15 : index
    %c0_187 = arith.constant 0 : index
    %c0_188 = arith.constant 0 : index
    %231 = vector.load %arg8[%c15, %c0_187, %c0_188] : memref<16x128x2xf32, #tpu.memory_space<vmem>>, vector<1x128x2xf32>
    %232 = vector.shape_cast %231 : vector<1x128x2xf32> to vector<128x2xf32>
    %cst_189 = arith.constant dense<0.000000e+00> : vector<8x2xf32>
    %233 = tpu.matmul %230, %232, %cst_189 {dimension_numbers = #tpu.dot_dimension_numbers<[1], [0], [0], [1], [0, 0, 1, 1], [], []>} : vector<8x128xf32>, vector<128x2xf32>, vector<8x2xf32> -> vector<8x2xf32>
    %234 = arith.addf %229, %233 : vector<8x2xf32>
    %c0_190 = arith.constant 0 : index
    %c0_191 = arith.constant 0 : index
    %235 = vector.load %arg9[%c0_190, %c0_191] : memref<1x2xf32, #tpu.memory_space<vmem>>, vector<1x2xf32>
    %236 = vector.broadcast %235 : vector<1x2xf32> to vector<8x2xf32>
    %237 = arith.addf %234, %236 : vector<8x2xf32>
    %c0_192 = arith.constant 0 : index
    %c0_193 = arith.constant 0 : index
    %238 = vector.load %arg10[%c0_192, %c0_193] : memref<8x2xf32, #tpu.memory_space<vmem>>, vector<8x2xf32>
    tpu.vector_store %arg10[%c0_192, %c0_193], %237 {strides = array<i32>} : memref<8x2xf32, #tpu.memory_space<vmem>>, vector<8x2xf32>,
    return
  }
  func.func @transform_0(%arg0: i32) -> (i32, i32) {
    %c0_i32 = arith.constant 0 : i32
    %c0_i32_0 = arith.constant 0 : i32
    return %arg0, %c0_i32 : i32, i32
  }
  func.func @transform_1(%arg0: i32) -> (i32, i32, i32) {
    %c0_i32 = arith.constant 0 : i32
    %c0_i32_0 = arith.constant 0 : i32
    %c0_i32_1 = arith.constant 0 : i32
    %c0_i32_2 = arith.constant 0 : i32
    return %c0_i32, %c0_i32_0, %c0_i32_1 : i32, i32, i32
  }
  func.func @transform_2(%arg0: i32) -> (i32, i32, i32) {
    %c0_i32 = arith.constant 0 : i32
    %c0_i32_0 = arith.constant 0 : i32
    %c0_i32_1 = arith.constant 0 : i32
    %c0_i32_2 = arith.constant 0 : i32
    return %c0_i32, %c0_i32_0, %c0_i32_1 : i32, i32, i32
  }
  func.func @transform_3(%arg0: i32) -> (i32, i32) {
    %c0_i32 = arith.constant 0 : i32
    %c0_i32_0 = arith.constant 0 : i32
    %c0_i32_1 = arith.constant 0 : i32
    return %c0_i32, %c0_i32_0 : i32, i32
  }
  func.func @transform_4(%arg0: i32) -> (i32, i32, i32) {
    %c0_i32 = arith.constant 0 : i32
    %c0_i32_0 = arith.constant 0 : i32
    %c0_i32_1 = arith.constant 0 : i32
    %c0_i32_2 = arith.constant 0 : i32
    return %c0_i32, %c0_i32_0, %c0_i32_1 : i32, i32, i32
  }
  func.func @transform_5(%arg0: i32) -> (i32, i32, i32) {
    %c0_i32 = arith.constant 0 : i32
    %c0_i32_0 = arith.constant 0 : i32
    %c0_i32_1 = arith.constant 0 : i32
    %c0_i32_2 = arith.constant 0 : i32
    return %c0_i32, %c0_i32_0, %c0_i32_1 : i32, i32, i32
  }
  func.func @transform_6(%arg0: i32) -> (i32, i32) {
    %c0_i32 = arith.constant 0 : i32
    %c0_i32_0 = arith.constant 0 : i32
    %c0_i32_1 = arith.constant 0 : i32
    return %c0_i32, %c0_i32_0 : i32, i32
  }
  func.func @transform_7(%arg0: i32) -> (i32, i32, i32) {
    %c0_i32 = arith.constant 0 : i32
    %c0_i32_0 = arith.constant 0 : i32
    %c0_i32_1 = arith.constant 0 : i32
    %c0_i32_2 = arith.constant 0 : i32
    return %c0_i32, %c0_i32_0, %c0_i32_1 : i32, i32, i32
  }
  func.func @transform_8(%arg0: i32) -> (i32, i32) {
    %c0_i32 = arith.constant 0 : i32
    %c0_i32_0 = arith.constant 0 : i32
    %c0_i32_1 = arith.constant 0 : i32
    return %c0_i32, %c0_i32_0 : i32, i32
  }
  func.func @transform_9(%arg0: i32) -> (i32, i32) {
    %c0_i32 = arith.constant 0 : i32
    %c0_i32_0 = arith.constant 0 : i32
    return %arg0, %c0_i32 : i32, i32
  }
}

</mosaic_0001>

<bundles_post_ra>
// kernel: tile.8
= control target key start
LH: loop header
LB: loop body
LE: loop exit
PB: predicated region body
PF: predicated region fallthrough
CT: control target
= control target key end

     0   :  { %s22_s0 = inlined_call_operand.vmem [shape: f32[16], index: 0, kind: input, shape index: {}]   ;;  %s23_s1 = inlined_call_operand.vmem [shape: f32[8,16], index: 1, kind: output, shape index: {}]  }
   0x1   :  { %v4_v0 = vld [vmem:[%s22_s0] ss:$0 sm:$0xff] }
   0x2   :  { %5 = vst [vmem:[%s23_s1] sm:$0xff] %v4_v0 }

// kernel: tile.0
= control target key start
LH: loop header
LB: loop body
LE: loop exit
PB: predicated region body
PF: predicated region fallthrough
CT: control target
= control target key end

     0   :  { %vm3_vm0 = vcmask 7168   ;;  %s264_s8 = smov 125   ;;  %s265_s17 = smov 126   ;;  %s547_s0 = inlined_call_operand.vmem [shape: f32[8,16], index: 0, kind: input, shape index: {}]   ;;  %s548_s1 = inlined_call_operand.vmem [shape: f32[128,1], index: 1, kind: output, shape index: {}]  }
   0x1   :  { %v8_v0 = vld [vmem:[%s547_s0] sm:$0xff]   ;;  %s263_s0 = smov 127   ;;  %s266_s18 = smov 124  }
   0x2   :  { %9 = vrot.lane.b32.xlu0 %v8_v0, %s263_s0  ;;  %33 = vrot.lane.b32.xlu1 %v8_v0, %s264_s8  ;;  %4 = vst.msk [vmem:[%s548_s1] ss:$16 sm:$0x3] %vm3_vm0, %v8_v0   ;;  %5 = vst.msk [vmem:[%s548_s1] ss:$16 sm:$0xc] %vm3_vm0, %v8_v0  }
   0x3   :  { %6 = vst.msk [vmem:[%s548_s1] ss:$16 sm:$0x30] %vm3_vm0, %v8_v0   ;;  %7 = vst.msk [vmem:[%s548_s1] ss:$16 sm:$0xc0] %vm3_vm0, %v8_v0  }
   0x4   :  { %s267_s19 = smov 123   ;;  %s268_s20 = smov 122  }
   0x5   :  { %s269_s21 = smov 121   ;;  %s270_s22 = smov 120  }
   0x6   :  { %21 = vrot.lane.b32.xlu0 %v8_v0, %s265_s17  ;;  %45 = vrot.lane.b32.xlu1 %v8_v0, %s266_s18  ;;  %s271_s23 = smov 119   ;;  %s272_s24 = smov 118  }
   0x7   :  { %s273_s25 = smov 117   ;;  %s274_s26 = smov 116  }
   0x8   :  { %s275_s27 = smov 115   ;;  %s276_s28 = smov 114  }
   0x9   :  { %s277_s29 = smov 113  }
   0xa   :  { %57 = vrot.lane.b32.xlu0 %v8_v0, %s267_s19  ;;  %69 = vrot.lane.b32.xlu1 %v8_v0, %s268_s20 }
   0xe   :  { %81 = vrot.lane.b32.xlu0 %v8_v0, %s269_s21  ;;  %93 = vrot.lane.b32.xlu1 %v8_v0, %s270_s22 }
  0x12   :  { %105 = vrot.lane.b32.xlu0 %v8_v0, %s271_s23  ;;  %117 = vrot.lane.b32.xlu1 %v8_v0, %s272_s24 }
  0x16   :  { %129 = vrot.lane.b32.xlu0 %v8_v0, %s273_s25  ;;  %141 = vrot.lane.b32.xlu1 %v8_v0, %s274_s26 }
  0x1a   :  { %153 = vrot.lane.b32.xlu0 %v8_v0, %s275_s27  ;;  %165 = vrot.lane.b32.xlu1 %v8_v0, %s276_s28 }
  0x1e   :  { %177 = vrot.lane.b32.xlu0 %v8_v0, %s277_s29 }
  0x74   :  { %v10_v1 = vpop.permute.xlu0 %9   ;;  %v34_v2 = vpop.permute.xlu1 %33  }
  0x75   :  { %188 = vst.msk [vmem:[%s548_s1 + $0x1] ss:$16 sm:$0x3] %vm3_vm0, %v10_v1   ;;  %189 = vst.msk [vmem:[%s548_s1 + $0x1] ss:$16 sm:$0xc] %vm3_vm0, %v10_v1  }
  0x76   :  { %190 = vst.msk [vmem:[%s548_s1 + $0x1] ss:$16 sm:$0x30] %vm3_vm0, %v10_v1   ;;  %191 = vst.msk [vmem:[%s548_s1 + $0x1] ss:$16 sm:$0xc0] %vm3_vm0, %v10_v1  }
  0x77   :  { %196 = vst.msk [vmem:[%s548_s1 + $0x3] ss:$16 sm:$0x3] %vm3_vm0, %v34_v2   ;;  %197 = vst.msk [vmem:[%s548_s1 + $0x3] ss:$16 sm:$0xc] %vm3_vm0, %v34_v2  }
  0x78   :  { %198 = vst.msk [vmem:[%s548_s1 + $0x3] ss:$16 sm:$0x30] %vm3_vm0, %v34_v2   ;;  %199 = vst.msk [vmem:[%s548_s1 + $0x3] ss:$16 sm:$0xc0] %vm3_vm0, %v34_v2   ;;  %v22_v3 = vpop.permute.xlu0 %21   ;;  %v46_v4 = vpop.permute.xlu1 %45  }
  0x79   :  { %192 = vst.msk [vmem:[%s548_s1 + $0x2] ss:$16 sm:$0x3] %vm3_vm0, %v22_v3   ;;  %193 = vst.msk [vmem:[%s548_s1 + $0x2] ss:$16 sm:$0xc] %vm3_vm0, %v22_v3  }
  0x7a   :  { %194 = vst.msk [vmem:[%s548_s1 + $0x2] ss:$16 sm:$0x30] %vm3_vm0, %v22_v3   ;;  %195 = vst.msk [vmem:[%s548_s1 + $0x2] ss:$16 sm:$0xc0] %vm3_vm0, %v22_v3  }
  0x7b   :  { %200 = vst.msk [vmem:[%s548_s1 + $0x4] ss:$16 sm:$0x3] %vm3_vm0, %v46_v4   ;;  %201 = vst.msk [vmem:[%s548_s1 + $0x4] ss:$16 sm:$0xc] %vm3_vm0, %v46_v4  }
  0x7c   :  { %202 = vst.msk [vmem:[%s548_s1 + $0x4] ss:$16 sm:$0x30] %vm3_vm0, %v46_v4   ;;  %203 = vst.msk [vmem:[%s548_s1 + $0x4] ss:$16 sm:$0xc0] %vm3_vm0, %v46_v4   ;;  %v58_v5 = vpop.permute.xlu0 %57   ;;  %v70_v6 = vpop.permute.xlu1 %69  }
  0x7d   :  { %204 = vst.msk [vmem:[%s548_s1 + $0x5] ss:$16 sm:$0x3] %vm3_vm0, %v58_v5   ;;  %205 = vst.msk [vmem:[%s548_s1 + $0x5] ss:$16 sm:$0xc] %vm3_vm0, %v58_v5  }
  0x7e   :  { %206 = vst.msk [vmem:[%s548_s1 + $0x5] ss:$16 sm:$0x30] %vm3_vm0, %v58_v5   ;;  %207 = vst.msk [vmem:[%s548_s1 + $0x5] ss:$16 sm:$0xc0] %vm3_vm0, %v58_v5  }
  0x7f   :  { %208 = vst.msk [vmem:[%s548_s1 + $0x6] ss:$16 sm:$0x3] %vm3_vm0, %v70_v6   ;;  %209 = vst.msk [vmem:[%s548_s1 + $0x6] ss:$16 sm:$0xc] %vm3_vm0, %v70_v6  }
  0x80   :  { %210 = vst.msk [vmem:[%s548_s1 + $0x6] ss:$16 sm:$0x30] %vm3_vm0, %v70_v6   ;;  %211 = vst.msk [vmem:[%s548_s1 + $0x6] ss:$16 sm:$0xc0] %vm3_vm0, %v70_v6   ;;  %v82_v7 = vpop.permute.xlu0 %81   ;;  %v94_v8 = vpop.permute.xlu1 %93  }
  0x81   :  { %212 = vst.msk [vmem:[%s548_s1 + $0x7] ss:$16 sm:$0x3] %vm3_vm0, %v82_v7   ;;  %213 = vst.msk [vmem:[%s548_s1 + $0x7] ss:$16 sm:$0xc] %vm3_vm0, %v82_v7  }
  0x82   :  { %214 = vst.msk [vmem:[%s548_s1 + $0x7] ss:$16 sm:$0x30] %vm3_vm0, %v82_v7   ;;  %215 = vst.msk [vmem:[%s548_s1 + $0x7] ss:$16 sm:$0xc0] %vm3_vm0, %v82_v7  }
  0x83   :  { %216 = vst.msk [vmem:[%s548_s1 + $0x8] ss:$16 sm:$0x3] %vm3_vm0, %v94_v8   ;;  %217 = vst.msk [vmem:[%s548_s1 + $0x8] ss:$16 sm:$0xc] %vm3_vm0, %v94_v8  }
  0x84   :  { %218 = vst.msk [vmem:[%s548_s1 + $0x8] ss:$16 sm:$0x30] %vm3_vm0, %v94_v8   ;;  %219 = vst.msk [vmem:[%s548_s1 + $0x8] ss:$16 sm:$0xc0] %vm3_vm0, %v94_v8   ;;  %v106_v9 = vpop.permute.xlu0 %105   ;;  %v118_v10 = vpop.permute.xlu1 %117  }
  0x85   :  { %220 = vst.msk [vmem:[%s548_s1 + $0x9] ss:$16 sm:$0x3] %vm3_vm0, %v106_v9   ;;  %221 = vst.msk [vmem:[%s548_s1 + $0x9] ss:$16 sm:$0xc] %vm3_vm0, %v106_v9  }
  0x86   :  { %222 = vst.msk [vmem:[%s548_s1 + $0x9] ss:$16 sm:$0x30] %vm3_vm0, %v106_v9   ;;  %223 = vst.msk [vmem:[%s548_s1 + $0x9] ss:$16 sm:$0xc0] %vm3_vm0, %v106_v9  }
  0x87   :  { %224 = vst.msk [vmem:[%s548_s1 + $0xa] ss:$16 sm:$0x3] %vm3_vm0, %v118_v10   ;;  %225 = vst.msk [vmem:[%s548_s1 + $0xa] ss:$16 sm:$0xc] %vm3_vm0, %v118_v10  }
  0x88   :  { %226 = vst.msk [vmem:[%s548_s1 + $0xa] ss:$16 sm:$0x30] %vm3_vm0, %v118_v10   ;;  %227 = vst.msk [vmem:[%s548_s1 + $0xa] ss:$16 sm:$0xc0] %vm3_vm0, %v118_v10   ;;  %v130_v11 = vpop.permute.xlu0 %129   ;;  %v142_v12 = vpop.permute.xlu1 %141  }
  0x89   :  { %228 = vst.msk [vmem:[%s548_s1 + $0xb] ss:$16 sm:$0x3] %vm3_vm0, %v130_v11   ;;  %229 = vst.msk [vmem:[%s548_s1 + $0xb] ss:$16 sm:$0xc] %vm3_vm0, %v130_v11  }
  0x8a   :  { %230 = vst.msk [vmem:[%s548_s1 + $0xb] ss:$16 sm:$0x30] %vm3_vm0, %v130_v11   ;;  %231 = vst.msk [vmem:[%s548_s1 + $0xb] ss:$16 sm:$0xc0] %vm3_vm0, %v130_v11  }
  0x8b   :  { %232 = vst.msk [vmem:[%s548_s1 + $0xc] ss:$16 sm:$0x3] %vm3_vm0, %v142_v12   ;;  %233 = vst.msk [vmem:[%s548_s1 + $0xc] ss:$16 sm:$0xc] %vm3_vm0, %v142_v12  }
  0x8c   :  { %234 = vst.msk [vmem:[%s548_s1 + $0xc] ss:$16 sm:$0x30] %vm3_vm0, %v142_v12   ;;  %235 = vst.msk [vmem:[%s548_s1 + $0xc] ss:$16 sm:$0xc0] %vm3_vm0, %v142_v12   ;;  %v154_v13 = vpop.permute.xlu0 %153   ;;  %v166_v14 = vpop.permute.xlu1 %165  }
  0x8d   :  { %236 = vst.msk [vmem:[%s548_s1 + $0xd] ss:$16 sm:$0x3] %vm3_vm0, %v154_v13   ;;  %237 = vst.msk [vmem:[%s548_s1 + $0xd] ss:$16 sm:$0xc] %vm3_vm0, %v154_v13  }
  0x8e   :  { %238 = vst.msk [vmem:[%s548_s1 + $0xd] ss:$16 sm:$0x30] %vm3_vm0, %v154_v13   ;;  %239 = vst.msk [vmem:[%s548_s1 + $0xd] ss:$16 sm:$0xc0] %vm3_vm0, %v154_v13  }
  0x8f   :  { %240 = vst.msk [vmem:[%s548_s1 + $0xe] ss:$16 sm:$0x3] %vm3_vm0, %v166_v14   ;;  %241 = vst.msk [vmem:[%s548_s1 + $0xe] ss:$16 sm:$0xc] %vm3_vm0, %v166_v14  }
  0x90   :  { %242 = vst.msk [vmem:[%s548_s1 + $0xe] ss:$16 sm:$0x30] %vm3_vm0, %v166_v14   ;;  %243 = vst.msk [vmem:[%s548_s1 + $0xe] ss:$16 sm:$0xc0] %vm3_vm0, %v166_v14   ;;  %v178_v15 = vpop.permute.xlu0 %177  }
  0x91   :  { %244 = vst.msk [vmem:[%s548_s1 + $0xf] ss:$16 sm:$0x3] %vm3_vm0, %v178_v15   ;;  %245 = vst.msk [vmem:[%s548_s1 + $0xf] ss:$16 sm:$0xc] %vm3_vm0, %v178_v15  }
  0x92   :  { %246 = vst.msk [vmem:[%s548_s1 + $0xf] ss:$16 sm:$0x30] %vm3_vm0, %v178_v15   ;;  %247 = vst.msk [vmem:[%s548_s1 + $0xf] ss:$16 sm:$0xc0] %vm3_vm0, %v178_v15  }

// kernel: cnn2d_forward.1
= control target key start
LH: loop header
LB: loop body
LE: loop exit
PB: predicated region body
PF: predicated region fallthrough
CT: control target
= control target key end

     0   :  { %s11580_s30 = smov 0   ;;  %s14091_s0 = inlined_call_operand.vmem [shape: bf16[64,128], index: 0, kind: input, shape index: {}]   ;;  %s14092_s1 = inlined_call_operand.vmem [shape: bf16[8,128,128], index: 1, kind: input, shape index: {}]   ;;  %s14093_s2 = inlined_call_operand.vmem [shape: bf16[8,128,32], index: 2, kind: input, shape index: {}]   ;;  %s14094_s3 = inlined_call_operand.vmem [shape: f32[128,1], index: 3, kind: input, shape index: {}]   ;;  %s14095_s4 = inlined_call_operand.vmem [shape: bf16[8,128,128], index: 4, kind: input, shape index: {}]   ;;  %s14096_s5 = inlined_call_operand.vmem [shape: bf16[8,128,128], index: 5, kind: input, shape index: {}]   ;;  %s14097_s6 = inlined_call_operand.vmem [shape: f32[128,1], index: 6, kind: input, shape index: {}]   ;;  %s14098_s7 = inlined_call_operand.vmem [shape: f32[16,128,2], index: 7, kind: input, shape index: {}]   ;;  %s14099_s8 = inlined_call_operand.vmem [shape: f32[1,2], index: 8, kind: input, shape index: {}]   ;;  %s14100_s9 = inlined_call_operand.vmem [shape: f32[16,2], index: 9, kind: output, shape index: {}]  }
   0x1 LB: > { %s11586_s10 = sadd.s32 4294967295, %s11524_s30   ;;  %p7443_p0 = scmp.ge.s32.totalorder %s11524_s30, 1  ;;  %s11524_s30 = sphi %s11580_s30, %s19_s30  }
   0x2   : > { %p288_p1 = scmp.lt.s32.totalorder %s11524_s30, 3 }
   0x4   : > { %p289_p2 = pnand %p7443_p0, %p288_p1 }
   0x5   : > { %v11194_v0 = vld [vmem:[%s14092_s1] sm:$0xff] (!%p289_p2)   ;;  %s7444_s13 = sshll.u32 (!%p289_p2), %s11586_s10, 2  ;;  %v11195_v1 = vld [vmem:[%s14092_s1 + $0x8] sm:$0xff] (!%p289_p2)   ;;  %v11196_v2 = vld [vmem:[%s14092_s1 + $0x10] sm:$0xff] (!%p289_p2)   ;;  %vm654_vm0 = vcmask (!%p289_p2), 261120   ;;  %p329_p4 = scmp.lt.s32.totalorder (!%p289_p2), %s11586_s10, 1 }
   0x6   : > { %292 = sbr.rel (%p289_p2) target bundleno = 2746 (0xaba), region = 56  ;;  %p324_p3 = scmp.lt.s32.totalorder (!%p289_p2), %s7444_s13, 7  ;;  %9180 = vmatprep.subr.bf16.mxu0 (!%p289_p2), %v11194_v0  ;;  %v11197_v3 = vld [vmem:[%s14092_s1 + $0x18] sm:$0xff] (!%p289_p2)   ;;  %v11198_v5 = vld [vmem:[%s14092_s1 + $0x20] sm:$0xff] (!%p289_p2)   ;;  %v11199_v6 = vld [vmem:[%s14092_s1 + $0x28] sm:$0xff] (!%p289_p2)  }
   0x7   : > { %9181 = vmatpush3.bf16.msra.mxu0 (!%p289_p2), %v11194_v0  ;;  %v11200_v7 = vld [vmem:[%s14092_s1 + $0x30] sm:$0xff] (!%p289_p2)   ;;  %v11201_v8 = vld [vmem:[%s14092_s1 + $0x38] sm:$0xff] (!%p289_p2)   ;;  %v11204_v10 = vld [vmem:[%s14093_s2] sm:$0xff] (!%p289_p2)  }
   0x8   : > { %9182 = vmatprep.subr.bf16.mxu0 (!%p289_p2), %v11195_v1  ;;  %v11207_v11 = vld [vmem:[%s14092_s1 + $0x40] sm:$0xff] (!%p289_p2)   ;;  %v11209_v12 = vld [vmem:[%s14092_s1 + $0x48] sm:$0xff] (!%p289_p2)   ;;  %v11213_v13 = vld [vmem:[%s14092_s1 + $0x50] sm:$0xff] (!%p289_p2)  }
   0x9   : > { %9200 = vmatprep.subr.bf16.mxu1 (!%p289_p2), %v11207_v11  ;;  %v11215_v14 = vld [vmem:[%s14092_s1 + $0x58] sm:$0xff] (!%p289_p2)   ;;  %v11219_v15 = vld [vmem:[%s14092_s1 + $0x60] sm:$0xff] (!%p289_p2)   ;;  %v11221_v16 = vld [vmem:[%s14092_s1 + $0x68] sm:$0xff] (!%p289_p2)  }
   0xa   : > { %9201 = vmatpush3.bf16.msra.mxu1 (!%p289_p2), %v11207_v11  ;;  %v11225_v17 = vld [vmem:[%s14092_s1 + $0x70] sm:$0xff] (!%p289_p2)   ;;  %v11227_v18 = vld [vmem:[%s14092_s1 + $0x78] sm:$0xff] (!%p289_p2)   ;;  %v11206_v25 = vld [vmem:[%s14092_s1 + $0x80] sm:$0xff] (!%p289_p2)  }
   0xb   : > { %9183 = vmatpush3.bf16.msra.mxu0 (!%p289_p2), %v11195_v1  ;;  %9202 = vmatprep.subr.bf16.mxu1 (!%p289_p2), %v11209_v12  ;;  %v11205_v26 = vld [vmem:[%s14093_s2 + $0x8] sm:$0xff] (!%p289_p2)   ;;  %v11210_v27 = vld [vmem:[%s14093_s2 + $0x10] sm:$0xff] (!%p289_p2)   ;;  %v11211_v30 = vld [vmem:[%s14093_s2 + $0x18] sm:$0xff] (!%p289_p2)  }
   0xc   : > { %9184 = vmatprep.subr.bf16.mxu0 (!%p289_p2), %v11196_v2  ;;  %v11208_v28 = vld [vmem:[%s14092_s1 + $0x88] sm:$0xff] (!%p289_p2)   ;;  %v11212_v29 = vld [vmem:[%s14092_s1 + $0x90] sm:$0xff] (!%p289_p2)   ;;  %v11216_v31 = vld [vmem:[%s14093_s2 + $0x20] sm:$0xff] (!%p289_p2)  }
   0xd   : > { %s14102_s13 = smov (!%p324_p3, %s7444_s13), 7  ;;  %v11214_v32 = vld [vmem:[%s14092_s1 + $0x98] sm:$0xff]   ;;  %v11218_v33 = vld [vmem:[%s14092_s1 + $0xa0] sm:$0xff]   ;;  %v11217_v34 = vld [vmem:[%s14093_s2 + $0x28] sm:$0xff]   ;;  %s14104_s10 = smov (!%p329_p4, %s11586_s10), 1 }
   0xe   : > { %s7445_s18 = sshll.u32 %s14102_s13, 2  ;;  %9203 = vmatpush3.bf16.msra.mxu1 %v11209_v12  ;;  %v11222_v35 = vld [vmem:[%s14093_s2 + $0x30] sm:$0xff]   ;;  %v11220_v36 = vld [vmem:[%s14092_s1 + $0xa8] sm:$0xff]   ;;  %v11223_v38 = vld [vmem:[%s14093_s2 + $0x38] sm:$0xff]   ;;  %s7446_s24 = sshll.u32 %s14104_s10, 3 }
   0xf   : > { %s11603_s21 = scalar_lea.vmem %s14091_s0, %s7445_s18  ;;  %9185 = vmatpush3.bf16.msra.mxu0 %v11196_v2  ;;  %9204 = vmatprep.subr.bf16.mxu1 %v11213_v13  ;;  %v11224_v37 = vld [vmem:[%s14092_s1 + $0xb0] sm:$0xff]   ;;  %v11226_v39 = vld [vmem:[%s14092_s1 + $0xb8] sm:$0xff]   ;;  %v11228_v48 = vld [vmem:[%s14093_s2 + $0x80] sm:$0xff]   ;;  %s332_s28 = scalar_lea.vmem %s14100_s9, %s7446_s24 }
  0x10   : > { %v11202_v4 = vld [vmem:[%s11603_s21] sm:$0xff]   ;;  %9186 = vmatprep.subr.bf16.mxu0 %v11197_v3  ;;  %v11203_v9 = vld [vmem:[%s11603_s21 + $0x8] sm:$0xff]   ;;  %v11239_v53 = vld [vmem:[%s14093_s2 + $0x50] sm:$0xff]  }
  0x11   : > { %9196 = vmatprep.mubr.bf16.mxu0 %v11202_v4  ;;  %9216 = vmatprep.mubr.bf16.mxu1 %v11202_v4  ;;  %v11703_v40 = vld [vmem:[%s11603_s21] sm:$0xff]   ;;  %v11707_v41 = vld [vmem:[%s11603_s21 + $0x8] sm:$0xff]   ;;  %v11240_v54 = vld [vmem:[%s14093_s2 + $0x58] sm:$0xff]  }
  0x12   : > { %9205 = vmatpush3.bf16.msra.mxu1 %v11213_v13  ;;  %v11231_v49 = vld [vmem:[%s14093_s2 + $0x40] sm:$0xff]   ;;  %v11232_v50 = vld [vmem:[%s14093_s2 + $0x48] sm:$0xff]   ;;  %v11241_v55 = vld [vmem:[%s14092_s1 + $0x110] sm:$0xff]  }
  0x13   : > { %9187 = vmatpush3.bf16.msra.mxu0 %v11197_v3  ;;  %9206 = vmatprep.subr.bf16.mxu1 %v11215_v14  ;;  %v11233_v51 = vld [vmem:[%s14092_s1 + $0x100] sm:$0xff]   ;;  %v11235_v52 = vld [vmem:[%s14092_s1 + $0x108] sm:$0xff]   ;;  %v11243_v56 = vld [vmem:[%s14092_s1 + $0x118] sm:$0xff]  }
  0x14   : > { %9188 = vmatprep.subr.bf16.mxu0 %v11198_v5  ;;  %v11247_v57 = vld [vmem:[%s14093_s2 + $0x60] sm:$0xff]   ;;  %v11248_v58 = vld [vmem:[%s14093_s2 + $0x68] sm:$0xff]   ;;  %v11255_v61 = vld [vmem:[%s14093_s2 + $0x70] sm:$0xff]  }
  0x15   : > { %v11249_v59 = vld [vmem:[%s14092_s1 + $0x120] sm:$0xff]   ;;  %v11251_v60 = vld [vmem:[%s14092_s1 + $0x128] sm:$0xff]   ;;  %v11256_v62 = vld [vmem:[%s14093_s2 + $0x78] sm:$0xff]  }
  0x16   : > { %9207 = vmatpush3.bf16.msra.mxu1 %v11215_v14  ;;  %v11257_v63 = vld [vmem:[%s14092_s1 + $0x130] sm:$0xff]   ;;  %v11259_v0 = vld [vmem:[%s14092_s1 + $0x138] sm:$0xff]   ;;  %v11244_v13 = vld [vmem:[%s14093_s2 + $0xa0] sm:$0xff]  }
  0x17   : > { %9189 = vmatpush3.bf16.msra.mxu0 %v11198_v5  ;;  %9208 = vmatprep.subr.bf16.mxu1 %v11219_v15  ;;  %v11238_v11 = vld [vmem:[%s14092_s1 + $0xd0] sm:$0xff]   ;;  %v11237_v12 = vld [vmem:[%s14093_s2 + $0x98] sm:$0xff]  }
  0x18   : > { %9190 = vmatprep.subr.bf16.mxu0 %v11199_v6  ;;  %v11242_v14 = vld [vmem:[%s14092_s1 + $0xd8] sm:$0xff]  }
  0x1a   : > { %9209 = vmatpush3.bf16.msra.mxu1 %v11219_v15  ;;  %v11246_v15 = vld [vmem:[%s14092_s1 + $0xe0] sm:$0xff]  }
  0x1b   : > { %9191 = vmatpush3.bf16.msra.mxu0 %v11199_v6  ;;  %9210 = vmatprep.subr.bf16.mxu1 %v11221_v16 }
  0x1c   : > { %9192 = vmatprep.subr.bf16.mxu0 %v11200_v7 }
  0x1e   : > { %9211 = vmatpush3.bf16.msra.mxu1 %v11221_v16  ;;  %v11245_v16 = vld [vmem:[%s14093_s2 + $0xa8] sm:$0xff]  }
  0x1f   : > { %9193 = vmatpush3.bf16.msra.mxu0 %v11200_v7  ;;  %9212 = vmatprep.subr.bf16.mxu1 %v11225_v17  ;;  %v11230_v7 = vld [vmem:[%s14092_s1 + $0xc0] sm:$0xff]  }
  0x20   : > { %9194 = vmatprep.subr.bf16.mxu0 %v11201_v8 }
  0x22   : > { %9213 = vmatpush3.bf16.msra.mxu1 %v11225_v17  ;;  %v11252_v17 = vld [vmem:[%s14093_s2 + $0xb0] sm:$0xff]  }
  0x23   : > { %9195 = vmatpush3.bf16.msra.mxu0 %v11201_v8  ;;  %9214 = vmatprep.subr.bf16.mxu1 %v11227_v18  ;;  %v11229_v8 = vld [vmem:[%s14093_s2 + $0x88] sm:$0xff]  }
  0x26   : > { %9197 = vmatmul.mubr.bf16.vlgmr.msra.gmra.mrb[0].mxu0 %v11203_v9  ;;  %9215 = vmatpush3.bf16.msra.mxu1 %v11227_v18  ;;  %v11250_v18 = vld [vmem:[%s14092_s1 + $0xe8] sm:$0xff]  }
  0x27   : > { %9244 = vmatprep.mubr.msk.bf16.mxu0 %vm654_vm0, %v11204_v10  ;;  %v11234_v10 = vld [vmem:[%s14092_s1 + $0xc8] sm:$0xff]  }
  0x29   : > { %9217 = vmatmul.mubr.bf16.vlgmr.msra.gmra.mrb[0].mxu1 %v11203_v9  ;;  %v11236_v9 = vld [vmem:[%s14093_s2 + $0x90] sm:$0xff]  }
  0x2a   : > { %9224 = vmatprep.mubr.msk.bf16.mxu1 %vm654_vm0, %v11231_v49  ;;  %v11265_v49 = vld [vmem:[%s14092_s1 + $0x180] sm:$0xff]  }
  0xf9   : > { %v9198_v19 = vpop.f32.mrb[0].mxu0 }
  0xfa   : > { %v448_v20 = vpop.f32.mrb[1].mxu0 }
  0xfb   : > { %v9199_v21 = vpop.f32.mrb[2].mxu0 }
  0xfc   : > { %v480_v22 = vpack.c.bf16 %v9199_v21, %v9198_v19  ;;  %v451_v23 = vpop.f32.mrb[3].mxu0  ;;  %v9218_v42 = vpop.f32.mrb[0].mxu1  ;;  %v11254_v19 = vld [vmem:[%s14092_s1 + $0xf0] sm:$0xff]   ;;  %v11258_v21 = vld [vmem:[%s14092_s1 + $0xf8] sm:$0xff]  }
  0xfd   : > { %v479_v24 = vpack.c.bf16 %v451_v23, %v448_v20  ;;  %v580_v43 = vpop.f32.mrb[1].mxu1  ;;  %v11253_v20 = vld [vmem:[%s14093_s2 + $0xb8] sm:$0xff]  }
  0xfe   : > { %v9219_v44 = vpop.f32.mrb[2].mxu1 }
  0xff   : > { %9240 = vmatprep.subr.bf16.mxu0 %v479_v24  ;;  %v613_v45 = vpack.c.bf16 %v9219_v44, %v9218_v42  ;;  %v583_v46 = vpop.f32.mrb[3].mxu1 }
 0x100   : > { %9241 = vmatpush3.bf16.msra.mxu0 %v479_v24  ;;  %v612_v47 = vpack.c.bf16 %v583_v46, %v580_v43  ;;  %v11260_v46 = vld [vmem:[%s14093_s2 + $0xc0] sm:$0xff]  }
 0x101   : > { %9242 = vmatprep.subr.bf16.mxu0 %v480_v22 }
 0x102   : > { %9220 = vmatprep.subr.bf16.mxu1 %v612_v47 }
 0x103   : > { %9221 = vmatpush3.bf16.msra.mxu1 %v612_v47  ;;  %v11263_v47 = vld [vmem:[%s14093_s2 + $0x100] sm:$0xff]  }
 0x104   : > { %9243 = vmatpush3.bf16.msra.mxu0 %v480_v22  ;;  %9222 = vmatprep.subr.bf16.mxu1 %v613_v45 }
 0x105   : > { %9260 = vmatprep.subr.bf16.mxu0 %v11206_v25 }
 0x107   : > { %9245 = vmatmul.mubr.msk.bf16.vlgmr.msra.gmra.mrb[4].mxu0 %vm654_vm0, %v11205_v26  ;;  %9223 = vmatpush3.bf16.msra.mxu1 %v613_v45 }
 0x108   : > { %9261 = vmatpush3.bf16.msra.mxu0 %v11206_v25  ;;  %9248 = vmatprep.mubr.msk.bf16.mxu0 %vm654_vm0, %v11210_v27 }
 0x109   : > { %9262 = vmatprep.subr.bf16.mxu0 %v11208_v28  ;;  %9340 = vmatprep.subr.bf16.mxu1 %v11233_v51 }
 0x10a   : > { %9225 = vmatmul.mubr.msk.bf16.vlgmr.msra.gmra.mrb[4].mxu1 %vm654_vm0, %v11232_v50  ;;  %v11267_v50 = vld [vmem:[%s14092_s1 + $0x188] sm:$0xff]  }
 0x10b   : > { %9341 = vmatpush3.bf16.msra.mxu1 %v11233_v51  ;;  %9228 = vmatprep.mubr.msk.bf16.mxu1 %vm654_vm0, %v11239_v53  ;;  %v11271_v51 = vld [vmem:[%s14093_s2 + $0x110] sm:$0xff]  }
 0x10c   : > { %9263 = vmatpush3.bf16.msra.mxu0 %v11208_v28  ;;  %9342 = vmatprep.subr.bf16.mxu1 %v11235_v52  ;;  %v11273_v53 = vld [vmem:[%s14092_s1 + $0x190] sm:$0xff]  }
 0x10d   : > { %9264 = vmatprep.subr.bf16.mxu0 %v11212_v29 }
 0x10f   : > { %9249 = vmatmul.mubr.msk.bf16.gmra.mrb[8].mxu0 %vm654_vm0, %v11211_v30  ;;  %9343 = vmatpush3.bf16.msra.mxu1 %v11235_v52  ;;  %v11272_v52 = vld [vmem:[%s14093_s2 + $0x118] sm:$0xff]  }
 0x110   : > { %9265 = vmatpush3.bf16.msra.mxu0 %v11212_v29  ;;  %9252 = vmatprep.mubr.msk.bf16.mxu0 %vm654_vm0, %v11216_v31 }
 0x111   : > { %9266 = vmatprep.subr.bf16.mxu0 %v11214_v32  ;;  %9344 = vmatprep.subr.bf16.mxu1 %v11241_v55 }
 0x112   : > { %9229 = vmatmul.mubr.msk.bf16.gmra.mrb[8].mxu1 %vm654_vm0, %v11240_v54  ;;  %v11275_v54 = vld [vmem:[%s14092_s1 + $0x198] sm:$0xff]  }
 0x113   : > { %9345 = vmatpush3.bf16.msra.mxu1 %v11241_v55  ;;  %9232 = vmatprep.mubr.msk.bf16.mxu1 %vm654_vm0, %v11247_v57  ;;  %v11279_v55 = vld [vmem:[%s14093_s2 + $0x120] sm:$0xff]  }
 0x114   : > { %9267 = vmatpush3.bf16.msra.mxu0 %v11214_v32  ;;  %9346 = vmatprep.subr.bf16.mxu1 %v11243_v56  ;;  %v11281_v57 = vld [vmem:[%s14092_s1 + $0x1a0] sm:$0xff]  }
 0x115   : > { %9268 = vmatprep.subr.bf16.mxu0 %v11218_v33 }
 0x117   : > { %9253 = vmatmul.mubr.msk.bf16.gmra.mrb[12].mxu0 %vm654_vm0, %v11217_v34  ;;  %9347 = vmatpush3.bf16.msra.mxu1 %v11243_v56  ;;  %v11280_v56 = vld [vmem:[%s14093_s2 + $0x128] sm:$0xff]  }
 0x118   : > { %9269 = vmatpush3.bf16.msra.mxu0 %v11218_v33  ;;  %9256 = vmatprep.mubr.msk.bf16.mxu0 %vm654_vm0, %v11222_v35 }
 0x119   : > { %9270 = vmatprep.subr.bf16.mxu0 %v11220_v36  ;;  %9348 = vmatprep.subr.bf16.mxu1 %v11249_v59 }
 0x11a   : > { %9233 = vmatmul.mubr.msk.bf16.gmra.mrb[12].mxu1 %vm654_vm0, %v11248_v58  ;;  %v11283_v58 = vld [vmem:[%s14092_s1 + $0x1a8] sm:$0xff]  }
 0x11b   : > { %9349 = vmatpush3.bf16.msra.mxu1 %v11249_v59  ;;  %9236 = vmatprep.mubr.msk.bf16.mxu1 %vm654_vm0, %v11255_v61  ;;  %v11287_v59 = vld [vmem:[%s14093_s2 + $0x130] sm:$0xff]  }
 0x11c   : > { %9271 = vmatpush3.bf16.msra.mxu0 %v11220_v36  ;;  %9350 = vmatprep.subr.bf16.mxu1 %v11251_v60  ;;  %v11289_v61 = vld [vmem:[%s14092_s1 + $0x1b0] sm:$0xff]  }
 0x11d   : > { %9272 = vmatprep.subr.bf16.mxu0 %v11224_v37 }
 0x11f   : > { %9257 = vmatmul.mubr.msk.bf16.gmra.mrb[16].mxu0 %vm654_vm0, %v11223_v38  ;;  %9351 = vmatpush3.bf16.msra.mxu1 %v11251_v60  ;;  %v11288_v60 = vld [vmem:[%s14093_s2 + $0x138] sm:$0xff]  }
 0x120   : > { %9273 = vmatpush3.bf16.msra.mxu0 %v11224_v37  ;;  %9276 = vmatprep.mubr.bf16.mxu0 %v11703_v40 }
 0x121   : > { %9274 = vmatprep.subr.bf16.mxu0 %v11226_v39  ;;  %9352 = vmatprep.subr.bf16.mxu1 %v11257_v63 }
 0x122   : > { %9237 = vmatmul.mubr.msk.bf16.gmra.mrb[16].mxu1 %vm654_vm0, %v11256_v62  ;;  %v11291_v62 = vld [vmem:[%s14092_s1 + $0x1b8] sm:$0xff]  }
 0x123   : > { %9353 = vmatpush3.bf16.msra.mxu1 %v11257_v63  ;;  %9356 = vmatprep.mubr.bf16.mxu1 %v11703_v40 }
 0x124   : > { %9275 = vmatpush3.bf16.msra.mxu0 %v11226_v39  ;;  %9354 = vmatprep.subr.bf16.mxu1 %v11259_v0 }
 0x127   : > { %9277 = vmatmul.mubr.bf16.vlgmr.msra.gmra.mrb[20].mxu0 %v11707_v41  ;;  %9355 = vmatpush3.bf16.msra.mxu1 %v11259_v0 }
 0x128   : > { %9284 = vmatprep.mubr.msk.bf16.mxu0 %vm654_vm0, %v11228_v48  ;;  %v11264_v48 = vld [vmem:[%s14093_s2 + $0x108] sm:$0xff]  }
 0x12a   : > { %9357 = vmatmul.mubr.bf16.vlgmr.msra.gmra.mrb[20].mxu1 %v11707_v41 }
 0x12b   : > { %9364 = vmatprep.mubr.msk.bf16.mxu1 %vm654_vm0, %v11263_v47 }
 0x1dd   : > { %v11826_v22 = vpop.f32.mrb[4].mxu1 }
 0x1de   : > { %v11828_v23 = vpop.f32.mrb[5].mxu1 }
 0x1df   : > { %v11830_v24 = vpop.f32.mrb[6].mxu1 }
 0x1e0   : > { %v11832_v25 = vpop.f32.mrb[7].mxu1 }
 0x1e5   : > { %v11834_v26 = vpop.f32.mrb[8].mxu1 }
 0x1e6   : > { %v11836_v27 = vpop.f32.mrb[9].mxu1 }
 0x1e7   : > { %v11838_v28 = vpop.f32.mrb[10].mxu1 }
 0x1e8   : > { %v11840_v29 = vpop.f32.mrb[11].mxu1 }
 0x1ed   : > { %v11842_v30 = vpop.f32.mrb[12].mxu1 }
 0x1ee   : > { %v11844_v31 = vpop.f32.mrb[13].mxu1 }
 0x1ef   : > { %v11846_v32 = vpop.f32.mrb[14].mxu1 }
 0x1f0   : > { %v11848_v33 = vpop.f32.mrb[15].mxu1 }
 0x1f5   : > { %v11850_v34 = vpop.f32.mrb[16].mxu1 }
 0x1f6   : > { %v11852_v35 = vpop.f32.mrb[17].mxu1 }
 0x1f7   : > { %v11854_v36 = vpop.f32.mrb[18].mxu1 }
 0x1f8   : > { %v11856_v37 = vpop.f32.mrb[19].mxu1 }
 0x1fa   : > { %v9278_v1 = vpop.f32.mrb[20].mxu0 }
 0x1fb   : > { %v1036_v2 = vpop.f32.mrb[21].mxu0 }
 0x1fc   : > { %v9279_v3 = vpop.f32.mrb[22].mxu0 }
 0x1fd   : > { %v1069_v4 = vpack.c.bf16 %v9279_v3, %v9278_v1  ;;  %v1039_v5 = vpop.f32.mrb[23].mxu0  ;;  %v9358_v38 = vpop.f32.mrb[20].mxu1 }
 0x1fe   : > { %v1068_v6 = vpack.c.bf16 %v1039_v5, %v1036_v2  ;;  %v1656_v39 = vpop.f32.mrb[21].mxu1  ;;  %v11262_v5 = vld [vmem:[%s14092_s1 + $0x140] sm:$0xff]  }
 0x1ff   : > { %v9359_v42 = vpop.f32.mrb[22].mxu1 }
 0x200   : > { %9280 = vmatprep.subr.bf16.mxu0 %v1068_v6  ;;  %v1689_v43 = vpack.c.bf16 %v9359_v42, %v9358_v38  ;;  %v1659_v44 = vpop.f32.mrb[23].mxu1 }
 0x201   : > { %9281 = vmatpush3.bf16.msra.mxu0 %v1068_v6  ;;  %v1688_v45 = vpack.c.bf16 %v1659_v44, %v1656_v39  ;;  %v11261_v6 = vld [vmem:[%s14093_s2 + $0xc8] sm:$0xff]  }
 0x202   : > { %9282 = vmatprep.subr.bf16.mxu0 %v1069_v4 }
 0x203   : > { %9360 = vmatprep.subr.bf16.mxu1 %v1688_v45 }
 0x204   : > { %9361 = vmatpush3.bf16.msra.mxu1 %v1688_v45 }
 0x205   : > { %9283 = vmatpush3.bf16.msra.mxu0 %v1069_v4  ;;  %9362 = vmatprep.subr.bf16.mxu1 %v1689_v43 }
 0x206   : > { %9300 = vmatprep.subr.bf16.mxu0 %v11230_v7 }
 0x208   : > { %9285 = vmatmul.mubr.msk.bf16.vlgmr.msra.gmra.mrb[4].mxu0 %vm654_vm0, %v11229_v8  ;;  %9363 = vmatpush3.bf16.msra.mxu1 %v1689_v43  ;;  %v11266_v8 = vld [vmem:[%s14092_s1 + $0x148] sm:$0xff]  }
 0x209   : > { %9301 = vmatpush3.bf16.msra.mxu0 %v11230_v7  ;;  %9288 = vmatprep.mubr.msk.bf16.mxu0 %vm654_vm0, %v11236_v9  ;;  %v11268_v7 = vld [vmem:[%s14093_s2 + $0xd0] sm:$0xff]  }
 0x20a   : > { %9302 = vmatprep.subr.bf16.mxu0 %v11234_v10  ;;  %9420 = vmatprep.subr.bf16.mxu1 %v11265_v49  ;;  %v11270_v9 = vld [vmem:[%s14092_s1 + $0x150] sm:$0xff]  }
 0x20b   : > { %9365 = vmatmul.mubr.msk.bf16.vlgmr.msra.gmra.mrb[24].mxu1 %vm654_vm0, %v11264_v48 }
 0x20c   : > { %9421 = vmatpush3.bf16.msra.mxu1 %v11265_v49  ;;  %9368 = vmatprep.mubr.msk.bf16.mxu1 %vm654_vm0, %v11271_v51 }
 0x20d   : > { %9303 = vmatpush3.bf16.msra.mxu0 %v11234_v10  ;;  %9422 = vmatprep.subr.bf16.mxu1 %v11267_v50  ;;  %v11269_v10 = vld [vmem:[%s14093_s2 + $0xd8] sm:$0xff]  }
 0x20e   : > { %9304 = vmatprep.subr.bf16.mxu0 %v11238_v11 }
 0x210   : > { %9289 = vmatmul.mubr.msk.bf16.gmra.mrb[8].mxu0 %vm654_vm0, %v11237_v12  ;;  %9423 = vmatpush3.bf16.msra.mxu1 %v11267_v50  ;;  %v11274_v12 = vld [vmem:[%s14092_s1 + $0x158] sm:$0xff]  }
 0x211   : > { %9305 = vmatpush3.bf16.msra.mxu0 %v11238_v11  ;;  %9292 = vmatprep.mubr.msk.bf16.mxu0 %vm654_vm0, %v11244_v13  ;;  %v11276_v11 = vld [vmem:[%s14093_s2 + $0xe0] sm:$0xff]  }
 0x212   : > { %9306 = vmatprep.subr.bf16.mxu0 %v11242_v14  ;;  %9424 = vmatprep.subr.bf16.mxu1 %v11273_v53  ;;  %v11278_v13 = vld [vmem:[%s14092_s1 + $0x160] sm:$0xff]  }
 0x213   : > { %9369 = vmatmul.mubr.msk.bf16.gmra.mrb[28].mxu1 %vm654_vm0, %v11272_v52 }
 0x214   : > { %9425 = vmatpush3.bf16.msra.mxu1 %v11273_v53  ;;  %9372 = vmatprep.mubr.msk.bf16.mxu1 %vm654_vm0, %v11279_v55 }
 0x215   : > { %9307 = vmatpush3.bf16.msra.mxu0 %v11242_v14  ;;  %9426 = vmatprep.subr.bf16.mxu1 %v11275_v54  ;;  %v11277_v14 = vld [vmem:[%s14093_s2 + $0xe8] sm:$0xff]  }
 0x216   : > { %9308 = vmatprep.subr.bf16.mxu0 %v11246_v15 }
 0x218   : > { %9293 = vmatmul.mubr.msk.bf16.gmra.mrb[12].mxu0 %vm654_vm0, %v11245_v16  ;;  %9427 = vmatpush3.bf16.msra.mxu1 %v11275_v54  ;;  %v11282_v16 = vld [vmem:[%s14092_s1 + $0x168] sm:$0xff]  }
 0x219   : > { %9309 = vmatpush3.bf16.msra.mxu0 %v11246_v15  ;;  %9296 = vmatprep.mubr.msk.bf16.mxu0 %vm654_vm0, %v11252_v17  ;;  %v11284_v15 = vld [vmem:[%s14093_s2 + $0xf0] sm:$0xff]  }
 0x21a   : > { %9310 = vmatprep.subr.bf16.mxu0 %v11250_v18  ;;  %9428 = vmatprep.subr.bf16.mxu1 %v11281_v57  ;;  %v11286_v17 = vld [vmem:[%s14092_s1 + $0x170] sm:$0xff]  }
 0x21b   : > { %9373 = vmatmul.mubr.msk.bf16.gmra.mrb[32].mxu1 %vm654_vm0, %v11280_v56 }
 0x21c   : > { %9429 = vmatpush3.bf16.msra.mxu1 %v11281_v57  ;;  %9376 = vmatprep.mubr.msk.bf16.mxu1 %vm654_vm0, %v11287_v59 }
 0x21d   : > { %9311 = vmatpush3.bf16.msra.mxu0 %v11250_v18  ;;  %9430 = vmatprep.subr.bf16.mxu1 %v11283_v58  ;;  %v11285_v18 = vld [vmem:[%s14093_s2 + $0xf8] sm:$0xff]  }
 0x21e   : > { %9312 = vmatprep.subr.bf16.mxu0 %v11254_v19 }
 0x220   : > { %9297 = vmatmul.mubr.msk.bf16.gmra.mrb[16].mxu0 %vm654_vm0, %v11253_v20  ;;  %9431 = vmatpush3.bf16.msra.mxu1 %v11283_v58 }
 0x221   : > { %9313 = vmatpush3.bf16.msra.mxu0 %v11254_v19  ;;  %9316 = vmatprep.mubr.bf16.mxu0 %v11703_v40  ;;  %v11290_v19 = vld [vmem:[%s14092_s1 + $0x178] sm:$0xff]  }
 0x222   : > { %9314 = vmatprep.subr.bf16.mxu0 %v11258_v21  ;;  %9432 = vmatprep.subr.bf16.mxu1 %v11289_v61 }
 0x223   : > { %9377 = vmatmul.mubr.msk.bf16.gmra.mrb[36].mxu1 %vm654_vm0, %v11288_v60  ;;  %v11292_v60 = vld [vmem:[%s14093_s2 + $0x140] sm:$0xff]  }
 0x224   : > { %9433 = vmatpush3.bf16.msra.mxu1 %v11289_v61  ;;  %9436 = vmatprep.mubr.bf16.mxu1 %v11703_v40  ;;  %v11295_v61 = vld [vmem:[%s14093_s2 + $0x180] sm:$0xff]  }
 0x225   : > { %9315 = vmatpush3.bf16.msra.mxu0 %v11258_v21  ;;  %9434 = vmatprep.subr.bf16.mxu1 %v11291_v62 }
 0x228   : > { %9317 = vmatmul.mubr.bf16.vlgmr.msra.gmra.mrb[24].mxu0 %v11707_v41  ;;  %9435 = vmatpush3.bf16.msra.mxu1 %v11291_v62  ;;  %v11296_v62 = vld [vmem:[%s14093_s2 + $0x188] sm:$0xff]  }
 0x229   : > { %9324 = vmatprep.mubr.msk.bf16.mxu0 %vm654_vm0, %v11260_v46 }
 0x22b   : > { %9437 = vmatmul.mubr.bf16.vlgmr.msra.gmra.mrb[40].mxu1 %v11707_v41 }
 0x22c   : > { %9444 = vmatprep.mubr.msk.bf16.mxu1 %vm654_vm0, %v11295_v61 }
 0x2de   : > { %v9366_v20 = vpop.f32.mrb[24].mxu1 }
 0x2df   : > { %v1788_v21 = vpop.f32.mrb[25].mxu1 }
 0x2e0   : > { %v9367_v38 = vpop.f32.mrb[26].mxu1 }
 0x2e1   : > { %v1791_v39 = vpop.f32.mrb[27].mxu1 }
 0x2e6   : > { %v9370_v42 = vpop.f32.mrb[28].mxu1 }
 0x2e7   : > { %v1804_v43 = vpop.f32.mrb[29].mxu1 }
 0x2e8   : > { %v9371_v44 = vpop.f32.mrb[30].mxu1 }
 0x2e9   : > { %v1807_v45 = vpop.f32.mrb[31].mxu1 }
 0x2ee   : > { %v11974_v46 = vpop.f32.mrb[32].mxu1 }
 0x2ef   : > { %v11976_v47 = vpop.f32.mrb[33].mxu1 }
 0x2f0   : > { %v11978_v48 = vpop.f32.mrb[34].mxu1 }
 0x2f1   : > { %v11980_v49 = vpop.f32.mrb[35].mxu1 }
 0x2f6   : > { %v11982_v50 = vpop.f32.mrb[36].mxu1 }
 0x2f7   : > { %v11984_v51 = vpop.f32.mrb[37].mxu1 }
 0x2f8   : > { %v11986_v52 = vpop.f32.mrb[38].mxu1 }
 0x2f9   : > { %v11988_v53 = vpop.f32.mrb[39].mxu1 }
 0x2fb   : > { %v9318_v63 = vpop.f32.mrb[24].mxu0 }
 0x2fc   : > { %v1346_v0 = vpop.f32.mrb[25].mxu0 }
 0x2fd   : > { %v9319_v1 = vpop.f32.mrb[26].mxu0 }
 0x2fe   : > { %v1379_v2 = vpack.c.bf16 %v9319_v1, %v9318_v63  ;;  %v1349_v3 = vpop.f32.mrb[27].mxu0  ;;  %v9438_v54 = vpop.f32.mrb[40].mxu1  ;;  %v11301_v63 = vld [vmem:[%s14093_s2 + $0x190] sm:$0xff]   ;;  %v11307_v1 = vld [vmem:[%s14093_s2 + $0x1a0] sm:$0xff]  }
 0x2ff   : > { %v1378_v4 = vpack.c.bf16 %v1349_v3, %v1346_v0  ;;  %v2276_v55 = vpop.f32.mrb[41].mxu1  ;;  %v11302_v0 = vld [vmem:[%s14093_s2 + $0x198] sm:$0xff]   ;;  %v11313_v3 = vld [vmem:[%s14093_s2 + $0x1b0] sm:$0xff]  }
 0x300   : > { %v9439_v56 = vpop.f32.mrb[42].mxu1 }
 0x301   : > { %9320 = vmatprep.subr.bf16.mxu0 %v1378_v4  ;;  %v2309_v57 = vpack.c.bf16 %v9439_v56, %v9438_v54  ;;  %v2279_v58 = vpop.f32.mrb[43].mxu1 }
 0x302   : > { %9321 = vmatpush3.bf16.msra.mxu0 %v1378_v4  ;;  %v2308_v59 = vpack.c.bf16 %v2279_v58, %v2276_v55  ;;  %v11314_v4 = vld [vmem:[%s14093_s2 + $0x1b8] sm:$0xff]  }
 0x303   : > { %9322 = vmatprep.subr.bf16.mxu0 %v1379_v2 }
 0x304   : > { %9440 = vmatprep.subr.bf16.mxu1 %v2308_v59 }
 0x305   : > { %9441 = vmatpush3.bf16.msra.mxu1 %v2308_v59 }
 0x306   : > { %9323 = vmatpush3.bf16.msra.mxu0 %v1379_v2  ;;  %9442 = vmatprep.subr.bf16.mxu1 %v2309_v57  ;;  %v11308_v2 = vld [vmem:[%s14093_s2 + $0x1a8] sm:$0xff]  }
 0x307   : > { %9380 = vmatprep.subr.bf16.mxu0 %v11262_v5 }
 0x309   : > { %9325 = vmatmul.mubr.msk.bf16.vlgmr.msra.gmra.mrb[4].mxu0 %vm654_vm0, %v11261_v6  ;;  %9443 = vmatpush3.bf16.msra.mxu1 %v2309_v57 }
 0x30a   : > { %9381 = vmatpush3.bf16.msra.mxu0 %v11262_v5  ;;  %9328 = vmatprep.mubr.msk.bf16.mxu0 %vm654_vm0, %v11268_v7 }
 0x30b   : > { %9382 = vmatprep.subr.bf16.mxu0 %v11266_v8 }
 0x30c   : > { %9445 = vmatmul.mubr.msk.bf16.vlgmr.msra.gmra.mrb[44].mxu1 %vm654_vm0, %v11296_v62 }
 0x30d   : > { %9448 = vmatprep.mubr.msk.bf16.mxu1 %vm654_vm0, %v11301_v63 }
 0x30e   : > { %9383 = vmatpush3.bf16.msra.mxu0 %v11266_v8 }
 0x30f   : > { %9384 = vmatprep.subr.bf16.mxu0 %v11270_v9 }
 0x311   : > { %9329 = vmatmul.mubr.msk.bf16.gmra.mrb[8].mxu0 %vm654_vm0, %v11269_v10 }
 0x312   : > { %9385 = vmatpush3.bf16.msra.mxu0 %v11270_v9  ;;  %9332 = vmatprep.mubr.msk.bf16.mxu0 %vm654_vm0, %v11276_v11 }
 0x313   : > { %9386 = vmatprep.subr.bf16.mxu0 %v11274_v12 }
 0x314   : > { %9449 = vmatmul.mubr.msk.bf16.gmra.mrb[48].mxu1 %vm654_vm0, %v11302_v0 }
 0x315   : > { %9452 = vmatprep.mubr.msk.bf16.mxu1 %vm654_vm0, %v11307_v1 }
 0x316   : > { %9387 = vmatpush3.bf16.msra.mxu0 %v11274_v12 }
 0x317   : > { %9388 = vmatprep.subr.bf16.mxu0 %v11278_v13 }
 0x319   : > { %9333 = vmatmul.mubr.msk.bf16.gmra.mrb[12].mxu0 %vm654_vm0, %v11277_v14 }
 0x31a   : > { %9389 = vmatpush3.bf16.msra.mxu0 %v11278_v13  ;;  %9336 = vmatprep.mubr.msk.bf16.mxu0 %vm654_vm0, %v11284_v15 }
 0x31b   : > { %9390 = vmatprep.subr.bf16.mxu0 %v11282_v16 }
 0x31c   : > { %9453 = vmatmul.mubr.msk.bf16.gmra.mrb[52].mxu1 %vm654_vm0, %v11308_v2  ;;  %v11299_v2 = vld [vmem:[%s14093_s2 + $0x158] sm:$0xff]  }
 0x31d   : > { %9456 = vmatprep.mubr.msk.bf16.mxu1 %vm654_vm0, %v11313_v3  ;;  %v11304_v3 = vld [vmem:[%s14093_s2 + $0x160] sm:$0xff]  }
 0x31e   : > { %9391 = vmatpush3.bf16.msra.mxu0 %v11282_v16 }
 0x31f   : > { %9392 = vmatprep.subr.bf16.mxu0 %v11286_v17 }
 0x321   : > { %9337 = vmatmul.mubr.msk.bf16.gmra.mrb[16].mxu0 %vm654_vm0, %v11285_v18 }
 0x322   : > { %9393 = vmatpush3.bf16.msra.mxu0 %v11286_v17  ;;  %9396 = vmatprep.mubr.bf16.mxu0 %v11703_v40 }
 0x323   : > { %9394 = vmatprep.subr.bf16.mxu0 %v11290_v19 }
 0x324   : > { %9457 = vmatmul.mubr.msk.bf16.gmra.mrb[56].mxu1 %vm654_vm0, %v11314_v4  ;;  %v11303_v4 = vld [vmem:[%s14092_s1 + $0x1d8] sm:$0xff]  }
 0x326   : > { %9395 = vmatpush3.bf16.msra.mxu0 %v11290_v19 }
 0x329   : > { %9397 = vmatmul.mubr.bf16.vlgmr.msra.gmra.mrb[28].mxu0 %v11707_v41 }
 0x32a   : > { %9404 = vmatprep.mubr.msk.bf16.mxu0 %vm654_vm0, %v11292_v60 }
 0x3dc   : > { %v9326_v5 = vpop.f32.mrb[4].mxu0 }
 0x3dd   : > { %v10956_v6 = vadd.f32 %v9326_v5, %v11826_v22  ;;  %v1478_v7 = vpop.f32.mrb[5].mxu0  ;;  %v11306_v5 = vld [vmem:[%s14092_s1 + $0x1e0] sm:$0xff]  }
 0x3de   : > { %v10961_v8 = vadd.f32 %v1478_v7, %v11828_v23  ;;  %v9327_v9 = vpop.f32.mrb[6].mxu0  ;;  %v11310_v7 = vld [vmem:[%s14093_s2 + $0x170] sm:$0xff]  }
 0x3df   : > { %v10966_v10 = vadd.f32 %v9327_v9, %v11830_v24  ;;  %v12029_v11 = vadd.f32 %v10956_v6, %v9366_v20  ;;  %v1481_v12 = vpop.f32.mrb[7].mxu0  ;;  %v11305_v6 = vld [vmem:[%s14093_s2 + $0x168] sm:$0xff]   ;;  %v11312_v9 = vld [vmem:[%s14092_s1 + $0x1f0] sm:$0xff]  }
 0x3e0   : > { %v10971_v13 = vadd.f32 %v1481_v12, %v11832_v25  ;;  %v12032_v14 = vadd.f32 %v10961_v8, %v1788_v21  ;;  %v11309_v8 = vld [vmem:[%s14092_s1 + $0x1e8] sm:$0xff]   ;;  %v11315_v12 = vld [vmem:[%s14092_s1 + $0x1f8] sm:$0xff]  }
 0x3e1   : > { %v12034_v15 = vadd.f32 %v10966_v10, %v9367_v38  ;;  %v11311_v10 = vld [vmem:[%s14093_s2 + $0x178] sm:$0xff]  }
 0x3e2   : > { %v12036_v16 = vadd.f32 %v10971_v13, %v1791_v39  ;;  %v12136_v13 = vpop.f32.mrb[44].mxu1 }
 0x3e4   : > { %v9330_v17 = vpop.f32.mrb[8].mxu0 }
 0x3e5   : > { %v10976_v22 = vadd.f32 %v9330_v17, %v11834_v26  ;;  %v1494_v18 = vpop.f32.mrb[9].mxu0  ;;  %v12138_v17 = vpop.f32.mrb[45].mxu1 }
 0x3e6   : > { %v10981_v23 = vadd.f32 %v1494_v18, %v11836_v27  ;;  %v9331_v19 = vpop.f32.mrb[10].mxu0 }
 0x3e7   : > { %v10986_v24 = vadd.f32 %v9331_v19, %v11838_v28  ;;  %v12041_v20 = vadd.f32 %v10976_v22, %v9370_v42  ;;  %v1497_v54 = vpop.f32.mrb[11].mxu0  ;;  %v12140_v22 = vpop.f32.mrb[46].mxu1 }
 0x3e8   : > { %v10991_v25 = vadd.f32 %v1497_v54, %v11840_v29  ;;  %v12044_v21 = vadd.f32 %v10981_v23, %v1804_v43  ;;  %v12142_v18 = vpop.f32.mrb[47].mxu1 }
 0x3e9   : > { %v12046_v38 = vadd.f32 %v10986_v24, %v9371_v44  ;;  %v12144_v23 = vpop.f32.mrb[48].mxu1 }
 0x3ea   : > { %v12048_v39 = vadd.f32 %v10991_v25, %v1807_v45  ;;  %v12146_v19 = vpop.f32.mrb[49].mxu1 }
 0x3eb   : > { %v12148_v24 = vpop.f32.mrb[50].mxu1 }
 0x3ec   : > { %v9334_v55 = vpop.f32.mrb[12].mxu0  ;;  %v12150_v54 = vpop.f32.mrb[51].mxu1 }
 0x3ed   : > { %v10996_v26 = vadd.f32 %v9334_v55, %v11842_v30  ;;  %v1510_v56 = vpop.f32.mrb[13].mxu0 }
 0x3ee   : > { %v11001_v27 = vadd.f32 %v1510_v56, %v11844_v31  ;;  %v9335_v57 = vpop.f32.mrb[14].mxu0 }
 0x3ef   : > { %v11006_v28 = vadd.f32 %v9335_v57, %v11846_v32  ;;  %v12054_v42 = vadd.f32 %v10996_v26, %v11974_v46  ;;  %v1513_v58 = vpop.f32.mrb[15].mxu0 }
 0x3f0   : > { %v11011_v29 = vadd.f32 %v1513_v58, %v11848_v33  ;;  %v12058_v43 = vadd.f32 %v11001_v27, %v11976_v47  ;;  %v11526_v58 = vmov 0  }
 0x3f1   : > { %v12061_v44 = vadd.f32 %v11006_v28, %v11978_v48  ;;  %v11316_v28 = vld [vmem:[%s14093_s2 + $0x1c0] sm:$0xff]   ;;  %11192 = vset.pattern.permute.xlu0 %v11526_v58  ;;  %11193 = vset.pattern.permute.xlu1 %v11526_v58 }
 0x3f2   : > { %v12064_v30 = vadd.f32 %v11011_v29, %v11980_v49  ;;  %v2797_v29 = vld [vmem:[%s14094_s3] sm:$0xff] }
 0x3f3   : > { %2815 = vperm.xlu0 %11192, %v2797_v29   ;;  %v5777_v29 = vld [vmem:[%s14097_s6 + $0x70] sm:$0xff] }
 0x3f4   : > { %v9338_v45 = vpop.f32.mrb[16].mxu0 }
 0x3f5   : > { %v11016_v31 = vadd.f32 %v9338_v45, %v11850_v34  ;;  %v1526_v59 = vpop.f32.mrb[17].mxu0  ;;  %v2799_v45 = vld [vmem:[%s14094_s3 + $0x10] sm:$0xff] }
 0x3f6   : > { %v11021_v32 = vadd.f32 %v1526_v59, %v11852_v35  ;;  %v9339_v46 = vpop.f32.mrb[18].mxu0  ;;  %2825 = vperm.xlu1 %11193, %v2799_v45   ;;  %v2800_v59 = vld [vmem:[%s14094_s3 + $0x18] sm:$0xff] }
 0x3f7   : > { %v11026_v60 = vadd.f32 %v9339_v46, %v11854_v36  ;;  %v12070_v33 = vadd.f32 %v11016_v31, %v11982_v50  ;;  %v1529_v47 = vpop.f32.mrb[19].mxu0  ;;  %v11293_v50 = vld [vmem:[%s14093_s2 + $0x148] sm:$0xff]   ;;  %v5778_v45 = vld [vmem:[%s14097_s6 + $0x78] sm:$0xff] }
 0x3f8   : > { %v11031_v61 = vadd.f32 %v1529_v47, %v11856_v37  ;;  %v12074_v48 = vadd.f32 %v11021_v32, %v11984_v51  ;;  %v11294_v37 = vld [vmem:[%s14092_s1 + $0x1c0] sm:$0xff]   ;;  %v11298_v51 = vld [vmem:[%s14093_s2 + $0x150] sm:$0xff]   ;;  %v2798_v31 = vld [vmem:[%s14094_s3 + $0x8] sm:$0xff] }
 0x3f9   : > { %v12077_v49 = vadd.f32 %v11026_v60, %v11986_v52  ;;  %v11297_v52 = vld [vmem:[%s14092_s1 + $0x1c8] sm:$0xff]   ;;  %2820 = vperm.xlu0 %11192, %v2798_v31   ;;  %v2801_v32 = vld [vmem:[%s14094_s3 + $0x20] sm:$0xff]  ;;  %v2803_v60 = vld [vmem:[%s14094_s3 + $0x30] sm:$0xff] }
 0x3fa   : > { %v12080_v34 = vadd.f32 %v11031_v61, %v11988_v53  ;;  %v11300_v53 = vld [vmem:[%s14092_s1 + $0x1d0] sm:$0xff]   ;;  %2830 = vperm.xlu1 %11193, %v2800_v59   ;;  %v2802_v46 = vld [vmem:[%s14094_s3 + $0x28] sm:$0xff]  ;;  %v2804_v47 = vld [vmem:[%s14094_s3 + $0x38] sm:$0xff] }
 0x3fb   : > { %v2805_v61 = vld [vmem:[%s14094_s3 + $0x40] sm:$0xff] }
 0x3fc   : > { %v9398_v62 = vpop.f32.mrb[28].mxu0 }
 0x3fd   : > { %v1966_v35 = vpop.f32.mrb[29].mxu0  ;;  %2835 = vperm.xlu0 %11192, %v2801_v32  }
 0x3fe   : > { %v9399_v63 = vpop.f32.mrb[30].mxu0  ;;  %2840 = vperm.xlu1 %11193, %v2802_v46  }
 0x3ff   : > { %v1999_v0 = vpack.c.bf16 %v9399_v63, %v9398_v62  ;;  %v1969_v36 = vpop.f32.mrb[31].mxu0  ;;  %v2806_v62 = vld [vmem:[%s14094_s3 + $0x48] sm:$0xff]  ;;  %v2808_v63 = vld [vmem:[%s14094_s3 + $0x58] sm:$0xff] }
 0x400   : > { %v1998_v1 = vpack.c.bf16 %v1969_v36, %v1966_v35  ;;  %v2807_v35 = vld [vmem:[%s14094_s3 + $0x50] sm:$0xff]  ;;  %v2810_v36 = vld [vmem:[%s14094_s3 + $0x68] sm:$0xff] }
 0x401   : > { %2845 = vperm.xlu0 %11192, %v2803_v60  }
 0x402   : > { %9400 = vmatprep.subr.bf16.mxu0 %v1998_v1  ;;  %2850 = vperm.xlu1 %11193, %v2804_v47  }
 0x403   : > { %9401 = vmatpush3.bf16.msra.mxu0 %v1998_v1  ;;  %v2811_v1 = vld [vmem:[%s14094_s3 + $0x70] sm:$0xff] }
 0x404   : > { %9402 = vmatprep.subr.bf16.mxu0 %v1999_v0 }
 0x405   : > { %2855 = vperm.xlu0 %11192, %v2805_v61  }
 0x406   : > { %2860 = vperm.xlu1 %11193, %v2806_v62  }
 0x407   : > { %9403 = vmatpush3.bf16.msra.mxu0 %v1999_v0  ;;  %v2809_v0 = vld [vmem:[%s14094_s3 + $0x60] sm:$0xff] }
 0x408   : > { %9460 = vmatprep.subr.bf16.mxu0 %v11294_v37 }
 0x409   : > { %2865 = vperm.xlu0 %11192, %v2807_v35  }
 0x40a   : > { %9405 = vmatmul.mubr.msk.bf16.vlgmr.msra.gmra.mrb[32].mxu0 %vm654_vm0, %v11293_v50  ;;  %2870 = vperm.xlu1 %11193, %v2808_v63   ;;  %v5764_v50 = vld [vmem:[%s14097_s6 + $0x8] sm:$0xff] }
 0x40b   : > { %9461 = vmatpush3.bf16.msra.mxu0 %v11294_v37  ;;  %9408 = vmatprep.mubr.msk.bf16.mxu0 %vm654_vm0, %v11298_v51  ;;  %v2812_v37 = vld [vmem:[%s14094_s3 + $0x78] sm:$0xff]  ;;  %v5763_v51 = vld [vmem:[%s14097_s6] sm:$0xff] }
 0x40c   : > { %9462 = vmatprep.subr.bf16.mxu0 %v11297_v52 }
 0x40d   : > { %2875 = vperm.xlu0 %11192, %v2809_v0  }
 0x40e   : > { %2880 = vperm.xlu1 %11193, %v2810_v36  }
 0x40f   : > { %9463 = vmatpush3.bf16.msra.mxu0 %v11297_v52  ;;  %v5765_v52 = vld [vmem:[%s14097_s6 + $0x10] sm:$0xff] }
 0x410   : > { %9464 = vmatprep.subr.bf16.mxu0 %v11300_v53 }
 0x411   : > { %2885 = vperm.xlu0 %11192, %v2811_v1  }
 0x412   : > { %9409 = vmatmul.mubr.msk.bf16.gmra.mrb[36].mxu0 %vm654_vm0, %v11299_v2  ;;  %2890 = vperm.xlu1 %11193, %v2812_v37   ;;  %v5767_v2 = vld [vmem:[%s14097_s6 + $0x20] sm:$0xff] }
 0x413   : > { %9465 = vmatpush3.bf16.msra.mxu0 %v11300_v53  ;;  %9412 = vmatprep.mubr.msk.bf16.mxu0 %vm654_vm0, %v11304_v3  ;;  %v5766_v53 = vld [vmem:[%s14097_s6 + $0x18] sm:$0xff]  ;;  %v5768_v3 = vld [vmem:[%s14097_s6 + $0x28] sm:$0xff] }
 0x414   : > { %9466 = vmatprep.subr.bf16.mxu0 %v11303_v4 }
 0x415   : > { %5786 = vperm.xlu0 %11192, %v5764_v50  }
 0x416   : > { %5781 = vperm.xlu1 %11193, %v5763_v51  }
 0x417   : > { %9467 = vmatpush3.bf16.msra.mxu0 %v11303_v4  ;;  %v5769_v4 = vld [vmem:[%s14097_s6 + $0x30] sm:$0xff] }
 0x418   : > { %9468 = vmatprep.subr.bf16.mxu0 %v11306_v5 }
 0x419   : > { %5791 = vperm.xlu0 %11192, %v5765_v52  }
 0x41a   : > { %9413 = vmatmul.mubr.msk.bf16.gmra.mrb[40].mxu0 %vm654_vm0, %v11305_v6  ;;  %5796 = vperm.xlu1 %11193, %v5766_v53   ;;  %v5771_v6 = vld [vmem:[%s14097_s6 + $0x40] sm:$0xff] }
 0x41b   : > { %9469 = vmatpush3.bf16.msra.mxu0 %v11306_v5  ;;  %9416 = vmatprep.mubr.msk.bf16.mxu0 %vm654_vm0, %v11310_v7  ;;  %v5770_v5 = vld [vmem:[%s14097_s6 + $0x38] sm:$0xff]  ;;  %v5772_v7 = vld [vmem:[%s14097_s6 + $0x48] sm:$0xff] }
 0x41c   : > { %9470 = vmatprep.subr.bf16.mxu0 %v11309_v8 }
 0x41d   : > { %5801 = vperm.xlu0 %11192, %v5767_v2  }
 0x41e   : > { %5806 = vperm.xlu1 %11193, %v5768_v3  }
 0x41f   : > { %9471 = vmatpush3.bf16.msra.mxu0 %v11309_v8  ;;  %v5773_v8 = vld [vmem:[%s14097_s6 + $0x50] sm:$0xff] }
 0x420   : > { %9472 = vmatprep.subr.bf16.mxu0 %v11312_v9 }
 0x421   : > { %5811 = vperm.xlu0 %11192, %v5769_v4  }
 0x422   : > { %9417 = vmatmul.mubr.msk.bf16.gmra.mrb[44].mxu0 %vm654_vm0, %v11311_v10  ;;  %5816 = vperm.xlu1 %11193, %v5770_v5   ;;  %v5775_v10 = vld [vmem:[%s14097_s6 + $0x60] sm:$0xff] }
 0x423   : > { %9473 = vmatpush3.bf16.msra.mxu0 %v11312_v9  ;;  %9476 = vmatprep.mubr.bf16.mxu0 %v11703_v40  ;;  %v12152_v40 = vpop.f32.mrb[52].mxu1  ;;  %v5774_v9 = vld [vmem:[%s14097_s6 + $0x58] sm:$0xff] }
 0x424   : > { %9474 = vmatprep.subr.bf16.mxu0 %v11315_v12  ;;  %v12154_v25 = vpop.f32.mrb[53].mxu1 }
 0x425   : > { %5821 = vperm.xlu0 %11192, %v5771_v6  }
 0x426   : > { %5826 = vperm.xlu1 %11193, %v5772_v7  }
 0x427   : > { %9475 = vmatpush3.bf16.msra.mxu0 %v11315_v12  ;;  %v5776_v12 = vld [vmem:[%s14097_s6 + $0x68] sm:$0xff] }
 0x429   : > { %5831 = vperm.xlu0 %11192, %v5773_v8  }
 0x42a   : > { %9477 = vmatmul.mubr.bf16.vlgmr.msra.gmra.mrb[48].mxu0 %v11707_v41  ;;  %v12156_v41 = vpop.f32.mrb[54].mxu1  ;;  %5836 = vperm.xlu1 %11193, %v5774_v9  }
 0x42b   : > { %v12158_v55 = vpop.f32.mrb[55].mxu1  ;;  %9484 = vmatprep.mubr.msk.bf16.mxu0 %vm654_vm0, %v11316_v28  ;;  %v11324_v28 = vld [vmem:[%s14095_s4] sm:$0xff]  }
 0x42c   : > { %v12160_v26 = vpop.f32.mrb[56].mxu1  ;;  %9500 = vmatprep.subr.bf16.mxu1 %v11324_v28 }
 0x42d   : > { %v12162_v56 = vpop.f32.mrb[57].mxu1  ;;  %5841 = vperm.xlu0 %11192, %v5775_v10   ;;  %9501 = vmatpush3.bf16.msra.mxu1 %v11324_v28  ;;  %v11322_v10 = vld [vmem:[%s14093_s2 + $0x1f0] sm:$0xff]   ;;  %v11325_v28 = vld [vmem:[%s14095_s4 + $0x8] sm:$0xff]  }
 0x42e   : > { %v12164_v27 = vpop.f32.mrb[58].mxu1  ;;  %5846 = vperm.xlu1 %11193, %v5776_v12   ;;  %v11323_v12 = vld [vmem:[%s14093_s2 + $0x1f8] sm:$0xff]   ;;  %9502 = vmatprep.subr.bf16.mxu1 %v11325_v28 }
 0x42f   : > { %v12166_v57 = vpop.f32.mrb[59].mxu1 }
 0x431   : > { %5851 = vperm.xlu0 %11192, %v5777_v29   ;;  %9503 = vmatpush3.bf16.msra.mxu1 %v11325_v28  ;;  %v11327_v29 = vld [vmem:[%s14095_s4 + $0x18] sm:$0xff]  }
 0x432   : > { %5856 = vperm.xlu1 %11193, %v5778_v45   ;;  %v11328_v45 = vld [vmem:[%s14095_s4 + $0x20] sm:$0xff]  }
 0x4dd   : > { %v9406_v58 = vpop.f32.mrb[32].mxu0 }
 0x4de   : > { %v10958_v31 = vadd.f32 %v12029_v11, %v9406_v58  ;;  %v2098_v59 = vpop.f32.mrb[33].mxu0  ;;  %v11326_v58 = vld [vmem:[%s14095_s4 + $0x10] sm:$0xff]  }
 0x4df   : > { %v10963_v32 = vadd.f32 %v12032_v14, %v2098_v59  ;;  %v9407_v46 = vpop.f32.mrb[34].mxu0  ;;  %9504 = vmatprep.subr.bf16.mxu1 %v11326_v58  ;;  %v11330_v59 = vld [vmem:[%s14095_s4 + $0x30] sm:$0xff]  }
 0x4e0   : > { %v10968_v60 = vadd.f32 %v12034_v15, %v9407_v46  ;;  %v12275_v47 = vadd.f32 %v10958_v31, %v12136_v13  ;;  %v2101_v61 = vpop.f32.mrb[35].mxu0  ;;  %9505 = vmatpush3.bf16.msra.mxu1 %v11326_v58  ;;  %v11329_v31 = vld [vmem:[%s14095_s4 + $0x28] sm:$0xff]   ;;  %v12387_v46 = vld [vmem:[%s14095_s4 + $0x40] sm:$0xff]  }
 0x4e1   : > { %v10973_v62 = vadd.f32 %v12036_v16, %v2101_v61  ;;  %v12279_v35 = vadd.f32 %v10963_v32, %v12138_v17  ;;  %9506 = vmatprep.subr.bf16.mxu1 %v11327_v29  ;;  %v11331_v32 = vld [vmem:[%s14095_s4 + $0x38] sm:$0xff]   ;;  %v2826_v61 = vpop.permute.xlu1 %2825 }
 0x4e2   : > { %v12282_v11 = vadd.f32 %v10968_v60, %v12140_v22  ;;  %v2816_v60 = vpop.permute.xlu0 %2815 }
 0x4e3   : > { %v12285_v63 = vadd.f32 %v10973_v62, %v12142_v18 }
 0x4e4   : > { %9507 = vmatpush3.bf16.msra.mxu1 %v11327_v29 }
 0x4e5   : > { %v9410_v14 = vpop.f32.mrb[36].mxu0  ;;  %9508 = vmatprep.subr.bf16.mxu1 %v11328_v45 }
 0x4e6   : > { %v10978_v15 = vadd.f32 %v12041_v20, %v9410_v14  ;;  %v2114_v0 = vpop.f32.mrb[37].mxu0  ;;  %v2821_v62 = vpop.permute.xlu0 %2820 }
 0x4e7   : > { %v10983_v13 = vadd.f32 %v12044_v21, %v2114_v0  ;;  %v9411_v36 = vpop.f32.mrb[38].mxu0  ;;  %v2831_v14 = vpop.permute.xlu1 %2830 }
 0x4e8   : > { %v10988_v1 = vadd.f32 %v12046_v38, %v9411_v36  ;;  %v12291_v16 = vadd.f32 %v10978_v15, %v12144_v23  ;;  %v2117_v17 = vpop.f32.mrb[39].mxu0  ;;  %9509 = vmatpush3.bf16.msra.mxu1 %v11328_v45 }
 0x4e9   : > { %v10993_v37 = vadd.f32 %v12048_v39, %v2117_v17  ;;  %v12295_v22 = vadd.f32 %v10983_v13, %v12146_v19  ;;  %9510 = vmatprep.subr.bf16.mxu1 %v11329_v31 }
 0x4ea   : > { %v12298_v18 = vadd.f32 %v10988_v1, %v12148_v24  ;;  %v2836_v15 = vpop.permute.xlu0 %2835 }
 0x4eb   : > { %v12301_v20 = vadd.f32 %v10993_v37, %v12150_v54  ;;  %v2841_v0 = vpop.permute.xlu1 %2840 }
 0x4ec   : > { %9511 = vmatpush3.bf16.msra.mxu1 %v11329_v31 }
 0x4ed   : > { %v9414_v50 = vpop.f32.mrb[40].mxu0  ;;  %9512 = vmatprep.subr.bf16.mxu1 %v11330_v59 }
 0x4ee   : > { %v10998_v21 = vadd.f32 %v12054_v42, %v9414_v50  ;;  %v2130_v51 = vpop.f32.mrb[41].mxu0  ;;  %v2846_v17 = vpop.permute.xlu0 %2845 }
 0x4ef   : > { %v11003_v38 = vadd.f32 %v12058_v43, %v2130_v51  ;;  %v9415_v23 = vpop.f32.mrb[42].mxu0 }
 0x4f0   : > { %v11008_v52 = vadd.f32 %v12061_v44, %v9415_v23  ;;  %v12307_v39 = vadd.f32 %v10998_v21, %v12152_v40  ;;  %v2133_v19 = vpop.f32.mrb[43].mxu0  ;;  %9513 = vmatpush3.bf16.msra.mxu1 %v11330_v59 }
 0x4f1   : > { %v11013_v53 = vadd.f32 %v12064_v30, %v2133_v19  ;;  %v12311_v24 = vadd.f32 %v11003_v38, %v12154_v25  ;;  %9514 = vmatprep.subr.bf16.mxu1 %v11331_v32  ;;  %v2851_v19 = vpop.permute.xlu1 %2850 }
 0x4f2   : > { %v12314_v54 = vadd.f32 %v11008_v52, %v12156_v41 }
 0x4f3   : > { %v12317_v42 = vadd.f32 %v11013_v53, %v12158_v55 }
 0x4f4   : > { %9515 = vmatpush3.bf16.msra.mxu1 %v11331_v32 }
 0x4f5   : > { %v9418_v2 = vpop.f32.mrb[44].mxu0  ;;  %9532 = vmatprep.subr.bf16.mxu1 %v12387_v46 }
 0x4f6   : > { %v11018_v43 = vadd.f32 %v12070_v33, %v9418_v2  ;;  %v2146_v3 = vpop.f32.mrb[45].mxu0 }
 0x4f7   : > { %v11023_v44 = vadd.f32 %v12074_v48, %v2146_v3  ;;  %v9419_v40 = vpop.f32.mrb[46].mxu0 }
 0x4f8   : > { %v11028_v4 = vadd.f32 %v12077_v49, %v9419_v40  ;;  %v12323_v30 = vadd.f32 %v11018_v43, %v12160_v26  ;;  %v2149_v25 = vpop.f32.mrb[47].mxu0  ;;  %v11318_v26 = vld [vmem:[%s14093_s2 + $0x1d0] sm:$0xff]  }
 0x4f9   : > { %v11033_v5 = vadd.f32 %v12080_v34, %v2149_v25  ;;  %v12327_v41 = vadd.f32 %v11023_v44, %v12162_v56  ;;  %v11317_v34 = vld [vmem:[%s14093_s2 + $0x1c8] sm:$0xff]   ;;  %v11319_v56 = vld [vmem:[%s14093_s2 + $0x1d8] sm:$0xff]   ;;  %v2856_v44 = vpop.permute.xlu0 %2855 }
 0x4fa   : > { %v12330_v55 = vadd.f32 %v11028_v4, %v12164_v27  ;;  %v11320_v27 = vld [vmem:[%s14093_s2 + $0x1e0] sm:$0xff]  }
 0x4fb   : > { %v12333_v33 = vadd.f32 %v11033_v5, %v12166_v57  ;;  %v11321_v57 = vld [vmem:[%s14093_s2 + $0x1e8] sm:$0xff]  }
 0x4fd   : > { %v9478_v6 = vpop.f32.mrb[48].mxu0 }
 0x4fe   : > { %v2586_v48 = vpop.f32.mrb[49].mxu0 }
 0x4ff   : > { %v9479_v7 = vpop.f32.mrb[50].mxu0 }
 0x500   : > { %v2619_v8 = vpack.c.bf16 %v9479_v7, %v9478_v6  ;;  %v2589_v49 = vpop.f32.mrb[51].mxu0 }
 0x501   : > { %v2618_v9 = vpack.c.bf16 %v2589_v49, %v2586_v48 }
 0x503   : > { %9480 = vmatprep.subr.bf16.mxu0 %v2618_v9 }
 0x504   : > { %9481 = vmatpush3.bf16.msra.mxu0 %v2618_v9 }
 0x505   : > { %9482 = vmatprep.subr.bf16.mxu0 %v2619_v8 }
 0x508   : > { %9483 = vmatpush3.bf16.msra.mxu0 %v2619_v8  ;;  %v2861_v8 = vpop.permute.xlu1 %2860 }
 0x50b   : > { %9485 = vmatmul.mubr.msk.bf16.vlgmr.msra.gmra.mrb[52].mxu0 %vm654_vm0, %v11317_v34 }
 0x50c   : > { %9488 = vmatprep.mubr.msk.bf16.mxu0 %vm654_vm0, %v11318_v26  ;;  %v2871_v45 = vpop.permute.xlu1 %2870 }
 0x513   : > { %9489 = vmatmul.mubr.msk.bf16.gmra.mrb[56].mxu0 %vm654_vm0, %v11319_v56 }
 0x514   : > { %9492 = vmatprep.mubr.msk.bf16.mxu0 %vm654_vm0, %v11320_v27 }
 0x51b   : > { %9493 = vmatmul.mubr.msk.bf16.gmra.mrb[60].mxu0 %vm654_vm0, %v11321_v57  ;;  %v2866_v57 = vpop.permute.xlu0 %2865 }
 0x51c   : > { %9496 = vmatprep.mubr.msk.bf16.mxu0 %vm654_vm0, %v11322_v10 }
 0x523   : > { %9497 = vmatmul.mubr.msk.bf16.gmra.mrb[64].mxu0 %vm654_vm0, %v11323_v12 }
 0x5de   : > { %v9486_v13 = vpop.f32.mrb[52].mxu0 }
 0x5df   : > { %v10960_v36 = vadd.f32 %v12275_v47, %v9486_v13  ;;  %v2718_v1 = vpop.f32.mrb[53].mxu0 }
 0x5e0   : > { %v10965_v37 = vadd.f32 %v12279_v35, %v2718_v1  ;;  %v9487_v50 = vpop.f32.mrb[54].mxu0 }
 0x5e1   : > { %v12392_v21 = vadd.f32 %v10960_v36, %v2826_v61  ;;  %v10970_v51 = vadd.f32 %v12282_v11, %v9487_v50  ;;  %v2721_v38 = vpop.f32.mrb[55].mxu0  ;;  %v2876_v36 = vpop.permute.xlu0 %2875 }
 0x5e2   : > { %v12395_v23 = vadd.f32 %v10965_v37, %v2816_v60  ;;  %v10975_v52 = vadd.f32 %v12285_v63, %v2721_v38 }
 0x5e3   : > { %v2927_v53 = vmin.f32 %v12392_v21, 0.0  ;;  %v12399_v2 = vadd.f32 %v10970_v51, %v2831_v14  ;;  %vm2911_vm1 = vcmp.gt.f32.partialorder %v12392_v21, 0.0 }
 0x5e4   : > { %v2925_v47 = vmin.f32 %v12395_v23, 0.0  ;;  %v12402_v43 = vadd.f32 %v10975_v52, %v2821_v62  ;;  %vm2909_vm2 = vcmp.gt.f32.partialorder %v12395_v23, 0.0 }
 0x5e5   : > { %v2945_v35 = vmul.f32 1.442695, %v2927_v53  ;;  %v2928_v3 = vmin.f32 %v12399_v2, 0.0  ;;  %vm2912_vm3 = vcmp.gt.f32.partialorder %v12399_v2, 0.0 }
 0x5e6   : > { %v2941_v40 = vmul.f32 1.442695, %v2925_v47  ;;  %v2926_v11 = vmin.f32 %v12402_v43, 0.0  ;;  %v9490_v4 = vpop.f32.mrb[56].mxu0  ;;  %vm2910_vm4 = vcmp.gt.f32.partialorder %v12402_v43, 0.0 }
 0x5e7   : > { %11452 = vpow2.f32 %v2945_v35  ;;  %v2947_v25 = vmul.f32 1.442695, %v2928_v3  ;;  %v10980_v63 = vadd.f32 %v12291_v16, %v9490_v4  ;;  %v2734_v5 = vpop.f32.mrb[57].mxu0 }
 0x5e8   : > { %11454 = vpow2.f32 %v2941_v40  ;;  %v2943_v6 = vmul.f32 1.442695, %v2926_v11  ;;  %v10985_v48 = vadd.f32 %v12295_v22, %v2734_v5  ;;  %v9491_v7 = vpop.f32.mrb[58].mxu0 }
 0x5e9   : > { %11456 = vpow2.f32 %v2947_v25  ;;  %v12408_v49 = vadd.f32 %v10980_v63, %v2846_v17  ;;  %v10990_v9 = vadd.f32 %v12298_v18, %v9491_v7  ;;  %v2737_v34 = vpop.f32.mrb[59].mxu0 }
 0x5ea   : > { %11458 = vpow2.f32 %v2943_v6  ;;  %v12411_v26 = vadd.f32 %v10985_v48, %v2836_v15  ;;  %v10995_v56 = vadd.f32 %v12301_v20, %v2737_v34  ;;  %v2886_v6 = vpop.permute.xlu0 %2885 }
 0x5eb   : > { %v2931_v16 = vmin.f32 %v12408_v49, 0.0  ;;  %v12415_v27 = vadd.f32 %v10990_v9, %v2851_v19  ;;  %v2881_v19 = vpop.permute.xlu1 %2880  ;;  %vm2915_vm5 = vcmp.gt.f32.partialorder %v12408_v49, 0.0 }
 0x5ec   : > { %v2929_v22 = vmin.f32 %v12411_v26, 0.0  ;;  %v12418_v10 = vadd.f32 %v10995_v56, %v2841_v0  ;;  %vm2913_vm6 = vcmp.gt.f32.partialorder %v12411_v26, 0.0 }
 0x5ed   : > { %v2953_v12 = vmul.f32 1.442695, %v2931_v16  ;;  %v2932_v28 = vmin.f32 %v12415_v27, 0.0  ;;  %vm2916_vm7 = vcmp.gt.f32.partialorder %v12415_v27, 0.0 }
 0x5ee   : > { %v2949_v58 = vmul.f32 1.442695, %v2929_v22  ;;  %v2930_v18 = vmin.f32 %v12418_v10, 0.0  ;;  %v9494_v29 = vpop.f32.mrb[60].mxu0  ;;  %vm2914_vm8 = vcmp.gt.f32.partialorder %v12418_v10, 0.0 }
 0x5ef   : > { %11460 = vpow2.f32 %v2953_v12  ;;  %v2955_v31 = vmul.f32 1.442695, %v2932_v28  ;;  %v11000_v20 = vadd.f32 %v12307_v39, %v9494_v29  ;;  %v2750_v59 = vpop.f32.mrb[61].mxu0  ;;  %v2891_v28 = vpop.permute.xlu1 %2890 }
 0x5f0   : > { %11462 = vpow2.f32 %v2949_v58  ;;  %v2951_v32 = vmul.f32 1.442695, %v2930_v18  ;;  %v11005_v60 = vadd.f32 %v12311_v24, %v2750_v59  ;;  %v9495_v61 = vpop.f32.mrb[62].mxu0  ;;  %v11334_v59 = vld [vmem:[%s14095_s4 + $0x50] sm:$0xff]  }
 0x5f1   : > { %v11453_v62 = vpop.eup %11452  ;;  %11464 = vpow2.f32 %v2955_v31  ;;  %v12425_v14 = vadd.f32 %v11000_v20, %v2866_v57  ;;  %v11010_v15 = vadd.f32 %v12314_v54, %v9495_v61  ;;  %v2753_v0 = vpop.f32.mrb[63].mxu0 }
 0x5f2   : > { %v11455_v13 = vpop.eup %11454  ;;  %v7867_v1 = vadd.f32 -1.0, %v11453_v62  ;;  %11466 = vpow2.f32 %v2951_v32  ;;  %v12428_v39 = vadd.f32 %v11005_v60, %v2856_v44  ;;  %v11015_v17 = vadd.f32 %v12317_v42, %v2753_v0 }
 0x5f3   : > { %v11457_v37 = vpop.eup %11456  ;;  %v7865_v24 = vadd.f32 -1.0, %v11455_v13  ;;  %v2935_v50 = vmin.f32 %v12425_v14, 0.0  ;;  %v12433_v51 = vadd.f32 %v11010_v15, %v2871_v45  ;;  %vm2919_vm9 = vcmp.gt.f32.partialorder %v12425_v14, 0.0 }
 0x5f4   : > { %v11459_v38 = vpop.eup %11458  ;;  %v7868_v54 = vadd.f32 -1.0, %v11457_v37  ;;  %v2933_v52 = vmin.f32 %v12428_v39, 0.0  ;;  %v2991_v42 = vsel %vm2911_vm1, %v12392_v21, %v7867_v1  ;;  %v12444_v11 = vadd.f32 %v11015_v17, %v2861_v8 }
 0x5f5   : > { %v2989_v53 = vsel %vm2909_vm2, %v12395_v23, %v7865_v24  ;;  %v7866_v47 = vadd.f32 -1.0, %v11459_v38  ;;  %v2961_v35 = vmul.f32 1.442695, %v2935_v50  ;;  %v2936_v40 = vmin.f32 %v12433_v51, 0.0 }
 0x5f6   : > { %v2992_v3 = vsel %vm2912_vm3, %v12399_v2, %v7868_v54  ;;  %v2957_v44 = vmul.f32 1.442695, %v2933_v52  ;;  %v9498_v4 = vpop.f32.mrb[64].mxu0  ;;  %v2934_v9 = vmin.f32 %v12444_v11, 0.0  ;;  %v11336_v54 = vld [vmem:[%s14095_s4 + $0x60] sm:$0xff]   ;;  %vm2920_vm10 = vcmp.gt.f32.partialorder %v12433_v51, 0.0 }
 0x5f7   : > { %v12446_v25 = vpack.c.bf16 %v2992_v3, %v2991_v42  ;;  %v2990_v63 = vsel %vm2910_vm4, %v12402_v43, %v7866_v47  ;;  %11468 = vpow2.f32 %v2961_v35  ;;  %v11020_v5 = vadd.f32 %v12323_v30, %v9498_v4  ;;  %v2766_v21 = vpop.f32.mrb[65].mxu0  ;;  %v11333_v30 = vld [vmem:[%s14095_s4 + $0x48] sm:$0xff]  }
 0x5f8   : > { %v12450_v23 = vpack.c.bf16 %v2990_v63, %v2989_v53  ;;  %11470 = vpow2.f32 %v2957_v44  ;;  %v2963_v48 = vmul.f32 1.442695, %v2936_v40  ;;  %v9499_v2 = vpop.f32.mrb[66].mxu0  ;;  %v11025_v34 = vadd.f32 %v12327_v41, %v2766_v21  ;;  %v11337_v44 = vld [vmem:[%s14095_s4 + $0x68] sm:$0xff]   ;;  %v11338_v21 = vld [vmem:[%s14095_s4 + $0x70] sm:$0xff]  }
 0x5f9   : > { %v11461_v7 = vpop.eup %11460  ;;  %v12453_v8 = vadd.f32 %v11020_v5, %v2886_v6  ;;  %v11030_v56 = vadd.f32 %v12330_v55, %v9499_v2  ;;  %v2769_v43 = vpop.f32.mrb[67].mxu0  ;;  %v2959_v55 = vmul.f32 1.442695, %v2934_v9  ;;  %vm2917_vm11 = vcmp.gt.f32.partialorder %v12428_v39, 0.0 }
 0x5fa   : > { %v11463_v16 = vpop.eup %11462  ;;  %v7871_v57 = vadd.f32 -1.0, %v11461_v7  ;;  %11472 = vpow2.f32 %v2963_v48  ;;  %v11035_v22 = vadd.f32 %v12333_v33, %v2769_v43  ;;  %9516 = vmatprep.mubr.bf16.mxu1 %v12450_v23  ;;  %v12467_v45 = vadd.f32 %v11025_v34, %v2876_v36  ;;  %v11339_v34 = vld [vmem:[%s14095_s4 + $0x78] sm:$0xff]  }
 0x5fb   : > { %v11465_v12 = vpop.eup %11464  ;;  %v7869_v41 = vadd.f32 -1.0, %v11463_v16  ;;  %v2939_v58 = vmin.f32 %v12453_v8, 0.0  ;;  %9517 = vmatmul.mubr.bf16.vlgmr.msra.gmra.mrb[60].mxu1 %v12446_v25  ;;  %v12469_v31 = vadd.f32 %v11030_v56, %v2891_v28  ;;  %11474 = vpow2.f32 %v2959_v55  ;;  %v11341_v16 = vld [vmem:[%s14095_s4 + $0x88] sm:$0xff]   ;;  %v11347_v55 = vld [vmem:[%s14095_s4 + $0xb8] sm:$0xff]  }
 0x5fc   : > { %v11467_v18 = vpop.eup %11466  ;;  %v7872_v29 = vadd.f32 -1.0, %v11465_v12  ;;  %9533 = vmatpush3.bf16.msra.mxu1 %v12387_v46  ;;  %v2995_v32 = vsel %vm2915_vm5, %v12408_v49, %v7871_v57  ;;  %v2937_v61 = vmin.f32 %v12467_v45, 0.0  ;;  %v2906_v1 = vadd.f32 %v11035_v22, %v2881_v19  ;;  %v11342_v57 = vld [vmem:[%s14095_s4 + $0x90] sm:$0xff]   ;;  %v11343_v22 = vld [vmem:[%s14095_s4 + $0x98] sm:$0xff]   ;;  %v11344_v12 = vld [vmem:[%s14095_s4 + $0xa0] sm:$0xff]  }
 0x5fd   : > { %v7870_v33 = vadd.f32 -1.0, %v11467_v18  ;;  %v2969_v20 = vmul.f32 1.442695, %v2939_v58  ;;  %9534 = vmatprep.subr.bf16.mxu1 %v11333_v30  ;;  %v2993_v60 = vsel %vm2913_vm6, %v12411_v26, %v7869_v41  ;;  %v2940_v0 = vmin.f32 %v12469_v31, 0.0  ;;  %v11335_v26 = vld [vmem:[%s14095_s4 + $0x58] sm:$0xff]   ;;  %v11345_v28 = vld [vmem:[%s14095_s4 + $0xa8] sm:$0xff]  }
 0x5fe   : > { %v2996_v46 = vsel %vm2916_vm7, %v12415_v27, %v7872_v29  ;;  %v2965_v36 = vmul.f32 1.442695, %v2937_v61  ;;  %v2938_v37 = vmin.f32 %v2906_v1, 0.0  ;;  %vm2918_vm12 = vcmp.gt.f32.partialorder %v12444_v11, 0.0  ;;  %v11346_v41 = vld [vmem:[%s14095_s4 + $0xb0] sm:$0xff]   ;;  %v11348_v58 = vld [vmem:[%s14095_s4 + $0xc0] sm:$0xff]  }
 0x5ff   : > { %v12484_v62 = vpack.c.bf16 %v2996_v46, %v2995_v32  ;;  %v2994_v15 = vsel %vm2914_vm8, %v12418_v10, %v7870_v33  ;;  %11476 = vpow2.f32 %v2969_v20  ;;  %v2971_v17 = vmul.f32 1.442695, %v2940_v0  ;;  %v11349_v18 = vld [vmem:[%s14095_s4 + $0xc8] sm:$0xff]   ;;  %v11350_v29 = vld [vmem:[%s14095_s4 + $0xd0] sm:$0xff]   ;;  %v11356_v32 = vld [vmem:[%s14095_s4 + $0x100] sm:$0xff]  }
 0x600   : > { %v12488_v13 = vpack.c.bf16 %v2994_v15, %v2993_v60  ;;  %9535 = vmatpush3.bf16.msra.mxu1 %v11333_v30  ;;  %11478 = vpow2.f32 %v2965_v36  ;;  %v2967_v50 = vmul.f32 1.442695, %v2938_v37  ;;  %vm2923_vm13 = vcmp.gt.f32.partialorder %v12453_v8, 0.0  ;;  %v11353_v33 = vld [vmem:[%s14095_s4 + $0xe8] sm:$0xff]   ;;  %v11354_v20 = vld [vmem:[%s14095_s4 + $0xf0] sm:$0xff]   ;;  %v11359_v61 = vld [vmem:[%s14095_s4 + $0x118] sm:$0xff]  }
 0x601   : > { %v11469_v49 = vpop.eup %11468  ;;  %9536 = vmatprep.subr.bf16.mxu1 %v11334_v59  ;;  %11480 = vpow2.f32 %v2971_v17  ;;  %vm2924_vm14 = vcmp.gt.f32.partialorder %v12469_v31, 0.0  ;;  %vm2921_vm15 = vcmp.gt.f32.partialorder %v12467_v45, 0.0  ;;  %vm2922_vm0 = vcmp.gt.f32.partialorder %v2906_v1, 0.0  ;;  %v11357_v60 = vld [vmem:[%s14095_s4 + $0x108] sm:$0xff]   ;;  %v11358_v46 = vld [vmem:[%s14095_s4 + $0x110] sm:$0xff]   ;;  %v11360_v15 = vld [vmem:[%s14095_s4 + $0x120] sm:$0xff]  }
 0x602   : > { %v11471_v27 = vpop.eup %11470  ;;  %9520 = vmatprep.mubr.bf16.mxu1 %v12488_v13  ;;  %v7875_v10 = vadd.f32 -1.0, %v11469_v49  ;;  %11482 = vpow2.f32 %v2967_v50  ;;  %v11361_v0 = vld [vmem:[%s14095_s4 + $0x128] sm:$0xff]   ;;  %v11362_v36 = vld [vmem:[%s14095_s4 + $0x130] sm:$0xff]   ;;  %v11364_v49 = vld [vmem:[%s14095_s4 + $0x140] sm:$0xff]   ;;  %vm11528_vm1 = vmmov 0  }
 0x603   : > { %9521 = vmatmul.mubr.bf16.gmra.mrb[64].mxu1 %v12484_v62  ;;  %v7873_v52 = vadd.f32 -1.0, %v11471_v27  ;;  %v11365_v17 = vld [vmem:[%s14095_s4 + $0x148] sm:$0xff]   ;;  %v11367_v27 = vld [vmem:[%s14095_s4 + $0x158] sm:$0xff]   ;;  %v11368_v37 = vld [vmem:[%s14095_s4 + $0x160] sm:$0xff]  }
 0x604   : > { %v11473_v24 = vpop.eup %11472  ;;  %9537 = vmatpush3.bf16.msra.mxu1 %v11334_v59  ;;  %v2999_v42 = vsel %vm2919_vm9, %v12425_v14, %v7875_v10  ;;  %v11355_v59 = vld [vmem:[%s14095_s4 + $0xf8] sm:$0xff]   ;;  %v11369_v10 = vld [vmem:[%s14095_s4 + $0x168] sm:$0xff]  }
 0x605   : > { %v7876_v38 = vadd.f32 -1.0, %v11473_v24  ;;  %9538 = vmatprep.subr.bf16.mxu1 %v11335_v26  ;;  %v11475_v19 = vpop.eup %11474  ;;  %v2997_v40 = vsel %vm2917_vm11, %v12428_v39, %v7873_v52  ;;  %v11370_v24 = vld [vmem:[%s14095_s4 + $0x170] sm:$0xff]   ;;  %v11371_v50 = vld [vmem:[%s14095_s4 + $0x178] sm:$0xff]   ;;  %v11373_v52 = vld [vmem:[%s14095_s4 + $0x188] sm:$0xff]  }
 0x606   : > { %v7874_v35 = vadd.f32 -1.0, %v11475_v19  ;;  %v11374_v19 = vld [vmem:[%s14095_s4 + $0x190] sm:$0xff]  }
 0x607   : > { %v3000_v53 = vsel %vm2920_vm10, %v12433_v51, %v7876_v38  ;;  %v11388_v38 = vld [vmem:[%s14096_s5 + $0x40] sm:$0xff]  }
 0x608   : > { %v12502_v47 = vpack.c.bf16 %v3000_v53, %v2999_v42  ;;  %9539 = vmatpush3.bf16.msra.mxu1 %v11335_v26  ;;  %v2998_v14 = vsel %vm2918_vm12, %v12444_v11, %v7874_v35  ;;  %v11366_v26 = vld [vmem:[%s14095_s4 + $0x150] sm:$0xff]   ;;  %9580 = vmatprep.mubr.bf16.mxu0 %v11388_v38  ;;  %v11375_v42 = vld [vmem:[%s14095_s4 + $0x198] sm:$0xff]   ;;  %v11376_v53 = vld [vmem:[%s14095_s4 + $0x1a0] sm:$0xff]  }
 0x609   : > { %v11477_v3 = vpop.eup %11476  ;;  %9540 = vmatprep.subr.bf16.mxu1 %v11336_v54  ;;  %v12511_v4 = vpack.c.bf16 %v2998_v14, %v2997_v40  ;;  %v11377_v35 = vld [vmem:[%s14095_s4 + $0x1a8] sm:$0xff]   ;;  %v11380_v40 = vld [vmem:[%s14095_s4 + $0x1c0] sm:$0xff]  }
 0x60a   : > { %v11479_v51 = vpop.eup %11478  ;;  %v7879_v63 = vadd.f32 -1.0, %v11477_v3  ;;  %v11378_v3 = vld [vmem:[%s14095_s4 + $0x1b0] sm:$0xff]   ;;  %v11381_v14 = vld [vmem:[%s14095_s4 + $0x1c8] sm:$0xff]  }
 0x60b   : > { %v11481_v5 = vpop.eup %11480  ;;  %9524 = vmatprep.mubr.bf16.mxu1 %v12511_v4  ;;  %v7877_v39 = vadd.f32 -1.0, %v11479_v51  ;;  %v11382_v51 = vld [vmem:[%s14095_s4 + $0x1d0] sm:$0xff]  }
 0x60c   : > { %9541 = vmatpush3.bf16.msra.mxu1 %v11336_v54  ;;  %v7880_v6 = vadd.f32 -1.0, %v11481_v5  ;;  %v11483_v11 = vpop.eup %11482  ;;  %v3003_v48 = vsel %vm2923_vm13, %v12453_v8, %v7879_v63  ;;  %v11340_v8 = vld [vmem:[%s14095_s4 + $0x80] sm:$0xff]   ;;  %v11383_v63 = vld [vmem:[%s14095_s4 + $0x1d8] sm:$0xff]  }
 0x60d   : > { %9542 = vmatprep.subr.bf16.mxu1 %v11337_v44  ;;  %9525 = vmatmul.mubr.bf16.gmra.mrb[68].mxu1 %v12502_v47  ;;  %v7878_v9 = vadd.f32 -1.0, %v11483_v11  ;;  %v3001_v56 = vsel %vm2921_vm15, %v12467_v45, %v7877_v39  ;;  %v11351_v45 = vld [vmem:[%s14095_s4 + $0xd8] sm:$0xff]   ;;  %v11372_v54 = vld [vmem:[%s14095_s4 + $0x180] sm:$0xff]  }
 0x60e   : > { %v3004_v2 = vsel %vm2924_vm14, %v12469_v31, %v7880_v6  ;;  %v11352_v31 = vld [vmem:[%s14095_s4 + $0xe0] sm:$0xff]  }
 0x60f   : > { %v12522_v7 = vpack.c.bf16 %v3004_v2, %v3003_v48  ;;  %v3002_v43 = vsel %vm2922_vm0, %v2906_v1, %v7878_v9  ;;  %v11363_v1 = vld [vmem:[%s14095_s4 + $0x138] sm:$0xff]   ;;  %v11384_v5 = vld [vmem:[%s14095_s4 + $0x1e0] sm:$0xff]   ;;  %v11386_v9 = vld [vmem:[%s14095_s4 + $0x1f0] sm:$0xff]  }
 0x610   : > { %9543 = vmatpush3.bf16.msra.mxu1 %v11337_v44  ;;  %v12529_v30 = vpack.c.bf16 %v3002_v43, %v3001_v56  ;;  %v11379_v44 = vld [vmem:[%s14095_s4 + $0x1b8] sm:$0xff]  }
 0x611   : > { %9544 = vmatprep.subr.bf16.mxu1 %v11338_v21  ;;  %v11387_v56 = vld [vmem:[%s14095_s4 + $0x1f8] sm:$0xff]  }
 0x612   : > { %9528 = vmatprep.mubr.bf16.mxu1 %v12529_v30 }
 0x614   : > { %9545 = vmatpush3.bf16.msra.mxu1 %v11338_v21  ;;  %v11385_v21 = vld [vmem:[%s14095_s4 + $0x1e8] sm:$0xff]  }
 0x615   : > { %9546 = vmatprep.subr.bf16.mxu1 %v11339_v34  ;;  %9529 = vmatmul.mubr.bf16.gmra.mrb[72].mxu1 %v12522_v7 }
 0x616   : > { %9548 = vmatprep.mubr.bf16.mxu1 %v12450_v23 }
 0x618   : > { %9547 = vmatpush3.bf16.msra.mxu1 %v11339_v34 }
 0x619   : > { %9628 = vmatprep.subr.bf16.mxu1 %v11340_v8 }
 0x61d   : > { %9549 = vmatmul.mubr.bf16.vlgmr.msra.gmra.mrb[76].mxu1 %v12446_v25 }
 0x61e   : > { %9552 = vmatprep.mubr.bf16.mxu1 %v12488_v13  ;;  %9629 = vmatpush3.bf16.msra.mxu1 %v11340_v8 }
 0x61f   : > { %9630 = vmatprep.subr.bf16.mxu1 %v11341_v16 }
 0x622   : > { %9631 = vmatpush3.bf16.msra.mxu1 %v11341_v16 }
 0x623   : > { %9632 = vmatprep.subr.bf16.mxu1 %v11342_v57 }
 0x625   : > { %9553 = vmatmul.mubr.bf16.gmra.mrb[80].mxu1 %v12484_v62 }
 0x626   : > { %9556 = vmatprep.mubr.bf16.mxu1 %v12511_v4  ;;  %9633 = vmatpush3.bf16.msra.mxu1 %v11342_v57 }
 0x627   : > { %9634 = vmatprep.subr.bf16.mxu1 %v11343_v22 }
 0x62a   : > { %9635 = vmatpush3.bf16.msra.mxu1 %v11343_v22 }
 0x62b   : > { %9636 = vmatprep.subr.bf16.mxu1 %v11344_v12 }
 0x62d   : > { %9557 = vmatmul.mubr.bf16.gmra.mrb[84].mxu1 %v12502_v47 }
 0x62e   : > { %9560 = vmatprep.mubr.bf16.mxu1 %v12529_v30  ;;  %9637 = vmatpush3.bf16.msra.mxu1 %v11344_v12 }
 0x62f   : > { %9638 = vmatprep.subr.bf16.mxu1 %v11345_v28 }
 0x632   : > { %9639 = vmatpush3.bf16.msra.mxu1 %v11345_v28 }
 0x633   : > { %9640 = vmatprep.subr.bf16.mxu1 %v11346_v41 }
 0x635   : > { %9561 = vmatmul.mubr.bf16.gmra.mrb[88].mxu1 %v12522_v7 }
 0x636   : > { %9641 = vmatpush3.bf16.msra.mxu1 %v11346_v41  ;;  %9644 = vmatprep.mubr.bf16.mxu1 %v12450_v23 }
 0x637   : > { %9642 = vmatprep.subr.bf16.mxu1 %v11347_v55 }
 0x63a   : > { %9643 = vmatpush3.bf16.msra.mxu1 %v11347_v55 }
 0x63b   : > { %9692 = vmatprep.subr.bf16.mxu1 %v11348_v58 }
 0x63d   : > { %9645 = vmatmul.mubr.bf16.vlgmr.msra.gmra.mrb[92].mxu1 %v12446_v25 }
 0x63e   : > { %9648 = vmatprep.mubr.bf16.mxu1 %v12488_v13  ;;  %9693 = vmatpush3.bf16.msra.mxu1 %v11348_v58 }
 0x63f   : > { %9694 = vmatprep.subr.bf16.mxu1 %v11349_v18 }
 0x642   : > { %9695 = vmatpush3.bf16.msra.mxu1 %v11349_v18 }
 0x643   : > { %9696 = vmatprep.subr.bf16.mxu1 %v11350_v29 }
 0x645   : > { %9649 = vmatmul.mubr.bf16.gmra.mrb[96].mxu1 %v12484_v62 }
 0x646   : > { %9652 = vmatprep.mubr.bf16.mxu1 %v12511_v4  ;;  %9697 = vmatpush3.bf16.msra.mxu1 %v11350_v29 }
 0x647   : > { %9698 = vmatprep.subr.bf16.mxu1 %v11351_v45 }
 0x64a   : > { %9699 = vmatpush3.bf16.msra.mxu1 %v11351_v45 }
 0x64b   : > { %9700 = vmatprep.subr.bf16.mxu1 %v11352_v31 }
 0x64d   : > { %9653 = vmatmul.mubr.bf16.gmra.mrb[100].mxu1 %v12502_v47 }
 0x64e   : > { %9656 = vmatprep.mubr.bf16.mxu1 %v12529_v30  ;;  %9701 = vmatpush3.bf16.msra.mxu1 %v11352_v31 }
 0x64f   : > { %9702 = vmatprep.subr.bf16.mxu1 %v11353_v33 }
 0x652   : > { %9703 = vmatpush3.bf16.msra.mxu1 %v11353_v33 }
 0x653   : > { %9704 = vmatprep.subr.bf16.mxu1 %v11354_v20 }
 0x655   : > { %9657 = vmatmul.mubr.bf16.gmra.mrb[104].mxu1 %v12522_v7 }
 0x656   : > { %9705 = vmatpush3.bf16.msra.mxu1 %v11354_v20  ;;  %9708 = vmatprep.mubr.bf16.mxu1 %v12450_v23 }
 0x657   : > { %9706 = vmatprep.subr.bf16.mxu1 %v11355_v59 }
 0x65a   : > { %9707 = vmatpush3.bf16.msra.mxu1 %v11355_v59 }
 0x65b   : > { %9756 = vmatprep.subr.bf16.mxu1 %v11356_v32 }
 0x65d   : > { %9709 = vmatmul.mubr.bf16.vlgmr.msra.gmra.mrb[108].mxu1 %v12446_v25 }
 0x65e   : > { %9712 = vmatprep.mubr.bf16.mxu1 %v12488_v13  ;;  %9757 = vmatpush3.bf16.msra.mxu1 %v11356_v32 }
 0x65f   : > { %9758 = vmatprep.subr.bf16.mxu1 %v11357_v60 }
 0x662   : > { %9759 = vmatpush3.bf16.msra.mxu1 %v11357_v60 }
 0x663   : > { %9760 = vmatprep.subr.bf16.mxu1 %v11358_v46 }
 0x665   : > { %9713 = vmatmul.mubr.bf16.gmra.mrb[112].mxu1 %v12484_v62 }
 0x666   : > { %9716 = vmatprep.mubr.bf16.mxu1 %v12511_v4  ;;  %9761 = vmatpush3.bf16.msra.mxu1 %v11358_v46 }
 0x667   : > { %9762 = vmatprep.subr.bf16.mxu1 %v11359_v61 }
 0x66a   : > { %9763 = vmatpush3.bf16.msra.mxu1 %v11359_v61 }
 0x66b   : > { %9764 = vmatprep.subr.bf16.mxu1 %v11360_v15 }
 0x66d   : > { %9717 = vmatmul.mubr.bf16.gmra.mrb[116].mxu1 %v12502_v47 }
 0x66e   : > { %9720 = vmatprep.mubr.bf16.mxu1 %v12529_v30  ;;  %9765 = vmatpush3.bf16.msra.mxu1 %v11360_v15 }
 0x66f   : > { %9766 = vmatprep.subr.bf16.mxu1 %v11361_v0 }
 0x672   : > { %9767 = vmatpush3.bf16.msra.mxu1 %v11361_v0 }
 0x673   : > { %9768 = vmatprep.subr.bf16.mxu1 %v11362_v36 }
 0x675   : > { %9721 = vmatmul.mubr.bf16.gmra.mrb[120].mxu1 %v12522_v7 }
 0x676   : > { %9769 = vmatpush3.bf16.msra.mxu1 %v11362_v36  ;;  %9772 = vmatprep.mubr.bf16.mxu1 %v12450_v23 }
 0x677   : > { %9770 = vmatprep.subr.bf16.mxu1 %v11363_v1 }
 0x67a   : > { %9771 = vmatpush3.bf16.msra.mxu1 %v11363_v1 }
 0x67b   : > { %9820 = vmatprep.subr.bf16.mxu1 %v11364_v49 }
 0x67d   : > { %9773 = vmatmul.mubr.bf16.vlgmr.msra.gmra.mrb[124].mxu1 %v12446_v25 }
 0x67e   : > { %9776 = vmatprep.mubr.bf16.mxu1 %v12488_v13  ;;  %9821 = vmatpush3.bf16.msra.mxu1 %v11364_v49 }
 0x67f   : > { %9822 = vmatprep.subr.bf16.mxu1 %v11365_v17 }
 0x682   : > { %9823 = vmatpush3.bf16.msra.mxu1 %v11365_v17 }
 0x683   : > { %9824 = vmatprep.subr.bf16.mxu1 %v11366_v26 }
 0x685   : > { %9777 = vmatmul.mubr.bf16.gmra.mrb[128].mxu1 %v12484_v62 }
 0x686   : > { %9780 = vmatprep.mubr.bf16.mxu1 %v12511_v4  ;;  %9825 = vmatpush3.bf16.msra.mxu1 %v11366_v26 }
 0x687   : > { %9826 = vmatprep.subr.bf16.mxu1 %v11367_v27 }
 0x68a   : > { %9827 = vmatpush3.bf16.msra.mxu1 %v11367_v27 }
 0x68b   : > { %9828 = vmatprep.subr.bf16.mxu1 %v11368_v37 }
 0x68d   : > { %9781 = vmatmul.mubr.bf16.gmra.mrb[132].mxu1 %v12502_v47 }
 0x68e   : > { %9784 = vmatprep.mubr.bf16.mxu1 %v12529_v30  ;;  %9829 = vmatpush3.bf16.msra.mxu1 %v11368_v37 }
 0x68f   : > { %9830 = vmatprep.subr.bf16.mxu1 %v11369_v10 }
 0x692   : > { %9831 = vmatpush3.bf16.msra.mxu1 %v11369_v10 }
 0x693   : > { %9832 = vmatprep.subr.bf16.mxu1 %v11370_v24 }
 0x695   : > { %9785 = vmatmul.mubr.bf16.gmra.mrb[136].mxu1 %v12522_v7 }
 0x696   : > { %9833 = vmatpush3.bf16.msra.mxu1 %v11370_v24  ;;  %9836 = vmatprep.mubr.bf16.mxu1 %v12450_v23 }
 0x697   : > { %9834 = vmatprep.subr.bf16.mxu1 %v11371_v50 }
 0x69a   : > { %9835 = vmatpush3.bf16.msra.mxu1 %v11371_v50 }
 0x69b   : > { %9884 = vmatprep.subr.bf16.mxu1 %v11372_v54 }
 0x69d   : > { %9837 = vmatmul.mubr.bf16.vlgmr.msra.gmra.mrb[140].mxu1 %v12446_v25 }
 0x69e   : > { %9840 = vmatprep.mubr.bf16.mxu1 %v12488_v13  ;;  %9885 = vmatpush3.bf16.msra.mxu1 %v11372_v54 }
 0x69f   : > { %9886 = vmatprep.subr.bf16.mxu1 %v11373_v52 }
 0x6a2   : > { %9887 = vmatpush3.bf16.msra.mxu1 %v11373_v52 }
 0x6a3   : > { %9888 = vmatprep.subr.bf16.mxu1 %v11374_v19 }
 0x6a5   : > { %9841 = vmatmul.mubr.bf16.gmra.mrb[144].mxu1 %v12484_v62 }
 0x6a6   : > { %9844 = vmatprep.mubr.bf16.mxu1 %v12511_v4  ;;  %9889 = vmatpush3.bf16.msra.mxu1 %v11374_v19 }
 0x6a7   : > { %9890 = vmatprep.subr.bf16.mxu1 %v11375_v42 }
 0x6aa   : > { %9891 = vmatpush3.bf16.msra.mxu1 %v11375_v42  ;;  %v11389_v42 = vld [vmem:[%s14096_s5 + $0x48] sm:$0xff]  }
 0x6ab   : > { %9892 = vmatprep.subr.bf16.mxu1 %v11376_v53 }
 0x6ad   : > { %9845 = vmatmul.mubr.bf16.gmra.mrb[148].mxu1 %v12502_v47 }
 0x6ae   : > { %9848 = vmatprep.mubr.bf16.mxu1 %v12529_v30  ;;  %9893 = vmatpush3.bf16.msra.mxu1 %v11376_v53 }
 0x6af   : > { %9894 = vmatprep.subr.bf16.mxu1 %v11377_v35 }
 0x6b2   : > { %9895 = vmatpush3.bf16.msra.mxu1 %v11377_v35 }
 0x6b3   : > { %9896 = vmatprep.subr.bf16.mxu1 %v11378_v3 }
 0x6b5   : > { %9849 = vmatmul.mubr.bf16.gmra.mrb[152].mxu1 %v12522_v7 }
 0x6b6   : > { %9897 = vmatpush3.bf16.msra.mxu1 %v11378_v3  ;;  %9900 = vmatprep.mubr.bf16.mxu1 %v12450_v23  ;;  %v11390_v3 = vld [vmem:[%s14096_s5 + $0x50] sm:$0xff]  }
 0x6b7   : > { %9898 = vmatprep.subr.bf16.mxu1 %v11379_v44 }
 0x6ba   : > { %9899 = vmatpush3.bf16.msra.mxu1 %v11379_v44 }
 0x6bb   : > { %9948 = vmatprep.subr.bf16.mxu1 %v11380_v40 }
 0x6bd   : > { %9901 = vmatmul.mubr.bf16.vlgmr.msra.gmra.mrb[156].mxu1 %v12446_v25 }
 0x6be   : > { %9904 = vmatprep.mubr.bf16.mxu1 %v12488_v13  ;;  %9949 = vmatpush3.bf16.msra.mxu1 %v11380_v40 }
 0x6bf   : > { %9950 = vmatprep.subr.bf16.mxu1 %v11381_v14 }
 0x6c2   : > { %9951 = vmatpush3.bf16.msra.mxu1 %v11381_v14 }
 0x6c3   : > { %9952 = vmatprep.subr.bf16.mxu1 %v11382_v51 }
 0x6c5   : > { %9905 = vmatmul.mubr.bf16.gmra.mrb[160].mxu1 %v12484_v62 }
 0x6c6   : > { %9908 = vmatprep.mubr.bf16.mxu1 %v12511_v4  ;;  %9953 = vmatpush3.bf16.msra.mxu1 %v11382_v51 }
 0x6c7   : > { %9954 = vmatprep.subr.bf16.mxu1 %v11383_v63 }
 0x6ca   : > { %9955 = vmatpush3.bf16.msra.mxu1 %v11383_v63  ;;  %v11391_v63 = vld [vmem:[%s14096_s5 + $0x58] sm:$0xff]  }
 0x6cb   : > { %9956 = vmatprep.subr.bf16.mxu1 %v11384_v5 }
 0x6cd   : > { %9909 = vmatmul.mubr.bf16.gmra.mrb[164].mxu1 %v12502_v47 }
 0x6ce   : > { %v9518_v6 = vpop.f32.mrb[60].mxu1  ;;  %9912 = vmatprep.mubr.bf16.mxu1 %v12529_v30  ;;  %9957 = vmatpush3.bf16.msra.mxu1 %v11384_v5 }
 0x6cf   : > { %v3111_v39 = vpop.f32.mrb[61].mxu1  ;;  %9958 = vmatprep.subr.bf16.mxu1 %v11385_v21 }
 0x6d0   : > { %v9519_v11 = vpop.f32.mrb[62].mxu1 }
 0x6d1   : > { %v12721_v48 = vpack.c.bf16 %v9519_v11, %v9518_v6  ;;  %v3114_v2 = vpop.f32.mrb[63].mxu1  ;;  %v11392_v6 = vld [vmem:[%s14096_s5 + $0x60] sm:$0xff]  }
 0x6d2   : > { %v12726_v34 = vpack.c.bf16 %v3114_v2, %v3111_v39  ;;  %9959 = vmatpush3.bf16.msra.mxu1 %v11385_v21 }
 0x6d3   : > { %9960 = vmatprep.subr.bf16.mxu1 %v11386_v9 }
 0x6d5   : > { %9913 = vmatmul.mubr.bf16.gmra.mrb[168].mxu1 %v12522_v7 }
 0x6d6   : > { %v9522_v43 = vpop.f32.mrb[64].mxu1  ;;  %9961 = vmatpush3.bf16.msra.mxu1 %v11386_v9  ;;  %9964 = vmatprep.mubr.bf16.mxu1 %v12450_v23 }
 0x6d7   : > { %v3127_v8 = vpop.f32.mrb[65].mxu1  ;;  %9962 = vmatprep.subr.bf16.mxu1 %v11387_v56 }
 0x6d8   : > { %v9523_v16 = vpop.f32.mrb[66].mxu1 }
 0x6d9   : > { %v12733_v57 = vpack.c.bf16 %v9523_v16, %v9522_v43  ;;  %v3130_v22 = vpop.f32.mrb[67].mxu1  ;;  %v11394_v43 = vld [vmem:[%s14096_s5 + $0x70] sm:$0xff]  }
 0x6da   : > { %v12735_v12 = vpack.c.bf16 %v3130_v22, %v3127_v8  ;;  %9963 = vmatpush3.bf16.msra.mxu1 %v11387_v56 }
 0x6dd   : > { %9965 = vmatmul.mubr.bf16.vlgmr.msra.gmra.mrb[172].mxu1 %v12446_v25 }
 0x6de   : > { %9968 = vmatprep.mubr.bf16.mxu1 %v12488_v13 }
 0x6e0   : > { %v9526_v28 = vpop.f32.mrb[68].mxu1 }
 0x6e1   : > { %v3143_v41 = vpop.f32.mrb[69].mxu1 }
 0x6e2   : > { %v9527_v55 = vpop.f32.mrb[70].mxu1 }
 0x6e3   : > { %v12739_v58 = vpack.c.bf16 %v9527_v55, %v9526_v28  ;;  %v3146_v18 = vpop.f32.mrb[71].mxu1  ;;  %v11396_v55 = vld [vmem:[%s14096_s5] sm:$0xff]  }
 0x6e4   : > { %v12741_v29 = vpack.c.bf16 %v3146_v18, %v3143_v41 }
 0x6e5   : > { %9969 = vmatmul.mubr.bf16.gmra.mrb[176].mxu1 %v12484_v62 }
 0x6e6   : > { %9972 = vmatprep.mubr.bf16.mxu1 %v12511_v4 }
 0x6e8   : > { %v9530_v23 = vpop.f32.mrb[72].mxu1 }
 0x6e9   : > { %v3159_v45 = vpop.f32.mrb[73].mxu1 }
 0x6ea   : > { %v9531_v31 = vpop.f32.mrb[74].mxu1 }
 0x6eb   : > { %v12745_v33 = vpack.c.bf16 %v9531_v31, %v9530_v23  ;;  %v3162_v25 = vpop.f32.mrb[75].mxu1 }
 0x6ec   : > { %v12747_v20 = vpack.c.bf16 %v3162_v25, %v3159_v45 }
 0x6ed   : > { %9973 = vmatmul.mubr.bf16.gmra.mrb[180].mxu1 %v12502_v47 }
 0x6ee   : > { %9976 = vmatprep.mubr.bf16.mxu1 %v12529_v30 }
 0x6f0   : > { %v9550_v13 = vpop.f32.mrb[76].mxu1 }
 0x6f1   : > { %v3297_v59 = vpop.f32.mrb[77].mxu1 }
 0x6f2   : > { %v9551_v32 = vpop.f32.mrb[78].mxu1 }
 0x6f3   : > { %v3378_v60 = vpack.c.bf16 %v9551_v32, %v9550_v13  ;;  %v3300_v46 = vpop.f32.mrb[79].mxu1  ;;  %v11398_v13 = vld [vmem:[%s14096_s5 + $0x10] sm:$0xff]  }
 0x6f4   : > { %v3377_v62 = vpack.c.bf16 %v3300_v46, %v3297_v59  ;;  %v11399_v46 = vld [vmem:[%s14096_s5 + $0x18] sm:$0xff]  }
 0x6f5   : > { %9977 = vmatmul.mubr.bf16.gmra.mrb[184].mxu1 %v12522_v7 }
 0x6f6   : > { %9564 = vmatprep.subr.bf16.mxu0 %v3377_v62 }
 0x6f7   : > { %9565 = vmatpush3.bf16.msra.mxu0 %v3377_v62 }
 0x6f8   : > { %v9554_v4 = vpop.f32.mrb[80].mxu1  ;;  %9566 = vmatprep.subr.bf16.mxu0 %v3378_v60 }
 0x6f9   : > { %v3313_v61 = vpop.f32.mrb[81].mxu1 }
 0x6fa   : > { %v9555_v15 = vpop.f32.mrb[82].mxu1 }
 0x6fb   : > { %v3380_v0 = vpack.c.bf16 %v9555_v15, %v9554_v4  ;;  %v3316_v36 = vpop.f32.mrb[83].mxu1  ;;  %9567 = vmatpush3.bf16.msra.mxu0 %v3378_v60  ;;  %v11400_v4 = vld [vmem:[%s14096_s5 + $0x20] sm:$0xff]  }
 0x6fc   : > { %v3379_v47 = vpack.c.bf16 %v3316_v36, %v3313_v61 }
 0x6fe   : > { %9568 = vmatprep.subr.bf16.mxu0 %v3379_v47 }
 0x6ff   : > { %9569 = vmatpush3.bf16.msra.mxu0 %v3379_v47  ;;  %v11401_v47 = vld [vmem:[%s14096_s5 + $0x28] sm:$0xff]  }
 0x700   : > { %v9558_v30 = vpop.f32.mrb[84].mxu1  ;;  %9570 = vmatprep.subr.bf16.mxu0 %v3380_v0 }
 0x701   : > { %v3329_v1 = vpop.f32.mrb[85].mxu1 }
 0x702   : > { %v9559_v49 = vpop.f32.mrb[86].mxu1 }
 0x703   : > { %v3382_v17 = vpack.c.bf16 %v9559_v49, %v9558_v30  ;;  %v3332_v26 = vpop.f32.mrb[87].mxu1  ;;  %9571 = vmatpush3.bf16.msra.mxu0 %v3380_v0  ;;  %v11402_v49 = vld [vmem:[%s14096_s5 + $0x30] sm:$0xff]  }
 0x704   : > { %v3381_v7 = vpack.c.bf16 %v3332_v26, %v3329_v1 }
 0x706   : > { %9572 = vmatprep.subr.bf16.mxu0 %v3381_v7 }
 0x707   : > { %9573 = vmatpush3.bf16.msra.mxu0 %v3381_v7 }
 0x708   : > { %v9562_v27 = vpop.f32.mrb[88].mxu1  ;;  %9574 = vmatprep.subr.bf16.mxu0 %v3382_v17 }
 0x709   : > { %v3345_v37 = vpop.f32.mrb[89].mxu1 }
 0x70a   : > { %v9563_v10 = vpop.f32.mrb[90].mxu1 }
 0x70b   : > { %v3384_v24 = vpack.c.bf16 %v9563_v10, %v9562_v27  ;;  %v3348_v50 = vpop.f32.mrb[91].mxu1  ;;  %9575 = vmatpush3.bf16.msra.mxu0 %v3382_v17 }
 0x70c   : > { %v3383_v38 = vpack.c.bf16 %v3348_v50, %v3345_v37  ;;  %v11403_v37 = vld [vmem:[%s14096_s5 + $0x38] sm:$0xff]   ;;  %v11404_v50 = vld [vmem:[%s14096_s5 + $0x80] sm:$0xff]  }
 0x70e   : > { %9576 = vmatprep.subr.bf16.mxu0 %v3383_v38 }
 0x70f   : > { %9577 = vmatpush3.bf16.msra.mxu0 %v3383_v38 }
 0x710   : > { %9578 = vmatprep.subr.bf16.mxu0 %v3384_v24  ;;  %v9646_v54 = vpop.f32.mrb[92].mxu1 }
 0x711   : > { %v3774_v52 = vpop.f32.mrb[93].mxu1 }
 0x712   : > { %v9647_v19 = vpop.f32.mrb[94].mxu1 }
 0x713   : > { %v12755_v53 = vpack.c.bf16 %v9647_v19, %v9646_v54  ;;  %9579 = vmatpush3.bf16.msra.mxu0 %v3384_v24  ;;  %v3777_v35 = vpop.f32.mrb[95].mxu1 }
 0x714   : > { %v3854_v44 = vpack.c.bf16 %v3777_v35, %v3774_v52  ;;  %9596 = vmatprep.subr.bf16.mxu0 %v12726_v34 }
 0x716   : > { %9581 = vmatmul.mubr.bf16.vlgmr.msra.gmra.mrb[68].mxu0 %v11389_v42  ;;  %v11405_v42 = vld [vmem:[%s14096_s5 + $0x88] sm:$0xff]  }
 0x717   : > { %9597 = vmatpush3.bf16.msra.mxu0 %v12726_v34  ;;  %9584 = vmatprep.mubr.bf16.mxu0 %v11390_v3  ;;  %v11406_v3 = vld [vmem:[%s14096_s5 + $0x90] sm:$0xff]  }
 0x718   : > { %9598 = vmatprep.subr.bf16.mxu0 %v12721_v48  ;;  %v9650_v40 = vpop.f32.mrb[96].mxu1 }
 0x719   : > { %v3790_v14 = vpop.f32.mrb[97].mxu1 }
 0x71a   : > { %v9651_v51 = vpop.f32.mrb[98].mxu1 }
 0x71b   : > { %v12766_v5 = vpack.c.bf16 %v9651_v51, %v9650_v40  ;;  %9599 = vmatpush3.bf16.msra.mxu0 %v12721_v48  ;;  %v3793_v21 = vpop.f32.mrb[99].mxu1  ;;  %v11393_v48 = vld [vmem:[%s14096_s5 + $0x68] sm:$0xff]  }
 0x71c   : > { %v3856_v39 = vpack.c.bf16 %v3793_v21, %v3790_v14  ;;  %9600 = vmatprep.subr.bf16.mxu0 %v12735_v12 }
 0x71e   : > { %9585 = vmatmul.mubr.bf16.gmra.mrb[72].mxu0 %v11391_v63  ;;  %v11407_v63 = vld [vmem:[%s14096_s5 + $0x98] sm:$0xff]  }
 0x71f   : > { %9601 = vmatpush3.bf16.msra.mxu0 %v12735_v12  ;;  %9588 = vmatprep.mubr.bf16.mxu0 %v11392_v6  ;;  %v11408_v6 = vld [vmem:[%s14096_s5 + $0xa0] sm:$0xff]  }
 0x720   : > { %9602 = vmatprep.subr.bf16.mxu0 %v12733_v57  ;;  %v9654_v11 = vpop.f32.mrb[100].mxu1 }
 0x721   : > { %v3806_v2 = vpop.f32.mrb[101].mxu1 }
 0x722   : > { %v9655_v9 = vpop.f32.mrb[102].mxu1 }
 0x723   : > { %v12778_v34 = vpack.c.bf16 %v9655_v9, %v9654_v11  ;;  %9603 = vmatpush3.bf16.msra.mxu0 %v12733_v57  ;;  %v3809_v56 = vpop.f32.mrb[103].mxu1  ;;  %v11395_v57 = vld [vmem:[%s14096_s5 + $0x78] sm:$0xff]  }
 0x724   : > { %v3858_v8 = vpack.c.bf16 %v3809_v56, %v3806_v2  ;;  %9604 = vmatprep.subr.bf16.mxu0 %v12741_v29 }
 0x726   : > { %9589 = vmatmul.mubr.bf16.gmra.mrb[76].mxu0 %v11393_v48  ;;  %v11409_v48 = vld [vmem:[%s14096_s5 + $0xa8] sm:$0xff]  }
 0x727   : > { %9605 = vmatpush3.bf16.msra.mxu0 %v12741_v29  ;;  %9592 = vmatprep.mubr.bf16.mxu0 %v11394_v43  ;;  %v11410_v43 = vld [vmem:[%s14096_s5 + $0xb0] sm:$0xff]  }
 0x728   : > { %9606 = vmatprep.subr.bf16.mxu0 %v12739_v58  ;;  %v9658_v16 = vpop.f32.mrb[104].mxu1 }
 0x729   : > { %v3822_v22 = vpop.f32.mrb[105].mxu1 }
 0x72a   : > { %v9659_v12 = vpop.f32.mrb[106].mxu1 }
 0x72b   : > { %v12790_v28 = vpack.c.bf16 %v9659_v12, %v9658_v16  ;;  %9607 = vmatpush3.bf16.msra.mxu0 %v12739_v58  ;;  %v3825_v41 = vpop.f32.mrb[107].mxu1  ;;  %v11397_v58 = vld [vmem:[%s14096_s5 + $0x8] sm:$0xff]  }
 0x72c   : > { %v3860_v18 = vpack.c.bf16 %v3825_v41, %v3822_v22  ;;  %9608 = vmatprep.subr.bf16.mxu0 %v12747_v20 }
 0x72e   : > { %9593 = vmatmul.mubr.bf16.gmra.mrb[80].mxu0 %v11395_v57  ;;  %v11411_v57 = vld [vmem:[%s14096_s5 + $0xb8] sm:$0xff]  }
 0x72f   : > { %9609 = vmatpush3.bf16.msra.mxu0 %v12747_v20  ;;  %9612 = vmatprep.mubr.bf16.mxu0 %v11396_v55  ;;  %v11412_v55 = vld [vmem:[%s14096_s5 + $0xc0] sm:$0xff]  }
 0x730   : > { %9610 = vmatprep.subr.bf16.mxu0 %v12745_v33  ;;  %v9710_v29 = vpop.f32.mrb[108].mxu1 }
 0x731   : > { %v4122_v23 = vpop.f32.mrb[109].mxu1 }
 0x732   : > { %v9711_v45 = vpop.f32.mrb[110].mxu1 }
 0x733   : > { %v12802_v31 = vpack.c.bf16 %v9711_v45, %v9710_v29  ;;  %9611 = vmatpush3.bf16.msra.mxu0 %v12745_v33  ;;  %v4125_v25 = vpop.f32.mrb[111].mxu1 }
 0x734   : > { %v4202_v20 = vpack.c.bf16 %v4125_v25, %v4122_v23  ;;  %9660 = vmatprep.subr.bf16.mxu0 %v3854_v44 }
 0x736   : > { %9613 = vmatmul.mubr.bf16.vlgmr.msra.gmra.mrb[68].mxu0 %v11397_v58  ;;  %v11413_v58 = vld [vmem:[%s14096_s5 + $0xc8] sm:$0xff]  }
 0x737   : > { %9661 = vmatpush3.bf16.msra.mxu0 %v3854_v44  ;;  %9616 = vmatprep.mubr.bf16.mxu0 %v11398_v13  ;;  %v11414_v13 = vld [vmem:[%s14096_s5 + $0xd0] sm:$0xff]  }
 0x738   : > { %9662 = vmatprep.subr.bf16.mxu0 %v12755_v53  ;;  %v9714_v59 = vpop.f32.mrb[112].mxu1 }
 0x739   : > { %v4138_v32 = vpop.f32.mrb[113].mxu1 }
 0x73a   : > { %v9715_v60 = vpop.f32.mrb[114].mxu1 }
 0x73b   : > { %v12812_v33 = vpack.c.bf16 %v9715_v60, %v9714_v59  ;;  %9663 = vmatpush3.bf16.msra.mxu0 %v12755_v53  ;;  %v4141_v62 = vpop.f32.mrb[115].mxu1 }
 0x73c   : > { %v4204_v61 = vpack.c.bf16 %v4141_v62, %v4138_v32  ;;  %9664 = vmatprep.subr.bf16.mxu0 %v3856_v39 }
 0x73e   : > { %9617 = vmatmul.mubr.bf16.gmra.mrb[72].mxu0 %v11399_v46  ;;  %v11415_v46 = vld [vmem:[%s14096_s5 + $0xd8] sm:$0xff]  }
 0x73f   : > { %9665 = vmatpush3.bf16.msra.mxu0 %v3856_v39  ;;  %9620 = vmatprep.mubr.bf16.mxu0 %v11400_v4  ;;  %v11416_v4 = vld [vmem:[%s14096_s5 + $0xe0] sm:$0xff]  }
 0x740   : > { %9666 = vmatprep.subr.bf16.mxu0 %v12766_v5  ;;  %v9718_v15 = vpop.f32.mrb[116].mxu1 }
 0x741   : > { %v4154_v0 = vpop.f32.mrb[117].mxu1 }
 0x742   : > { %v9719_v36 = vpop.f32.mrb[118].mxu1 }
 0x743   : > { %v12822_v30 = vpack.c.bf16 %v9719_v36, %v9718_v15  ;;  %9667 = vmatpush3.bf16.msra.mxu0 %v12766_v5  ;;  %v4157_v1 = vpop.f32.mrb[119].mxu1 }
 0x744   : > { %v4206_v17 = vpack.c.bf16 %v4157_v1, %v4154_v0  ;;  %9668 = vmatprep.subr.bf16.mxu0 %v3858_v8 }
 0x746   : > { %9621 = vmatmul.mubr.bf16.gmra.mrb[76].mxu0 %v11401_v47  ;;  %v11417_v47 = vld [vmem:[%s14096_s5 + $0xe8] sm:$0xff]  }
 0x747   : > { %9669 = vmatpush3.bf16.msra.mxu0 %v3858_v8  ;;  %9624 = vmatprep.mubr.bf16.mxu0 %v11402_v49  ;;  %v11418_v49 = vld [vmem:[%s14096_s5 + $0xf0] sm:$0xff]  }
 0x748   : > { %9670 = vmatprep.subr.bf16.mxu0 %v12778_v34  ;;  %v9722_v26 = vpop.f32.mrb[120].mxu1 }
 0x749   : > { %v4170_v7 = vpop.f32.mrb[121].mxu1 }
 0x74a   : > { %v9723_v27 = vpop.f32.mrb[122].mxu1 }
 0x74b   : > { %v12832_v10 = vpack.c.bf16 %v9723_v27, %v9722_v26  ;;  %9671 = vmatpush3.bf16.msra.mxu0 %v12778_v34  ;;  %v4173_v24 = vpop.f32.mrb[123].mxu1 }
 0x74c   : > { %v4208_v38 = vpack.c.bf16 %v4173_v24, %v4170_v7  ;;  %9672 = vmatprep.subr.bf16.mxu0 %v3860_v18 }
 0x74e   : > { %9625 = vmatmul.mubr.bf16.gmra.mrb[80].mxu0 %v11403_v37  ;;  %v11419_v37 = vld [vmem:[%s14096_s5 + $0xf8] sm:$0xff]  }
 0x74f   : > { %9673 = vmatpush3.bf16.msra.mxu0 %v3860_v18  ;;  %9676 = vmatprep.mubr.bf16.mxu0 %v11404_v50  ;;  %v11420_v50 = vld [vmem:[%s14096_s5 + $0x100] sm:$0xff]  }
 0x750   : > { %9674 = vmatprep.subr.bf16.mxu0 %v12790_v28  ;;  %v9774_v54 = vpop.f32.mrb[124].mxu1 }
 0x751   : > { %v4470_v52 = vpop.f32.mrb[125].mxu1 }
 0x752   : > { %v9775_v19 = vpop.f32.mrb[126].mxu1 }
 0x753   : > { %v12842_v53 = vpack.c.bf16 %v9775_v19, %v9774_v54  ;;  %9675 = vmatpush3.bf16.msra.mxu0 %v12790_v28  ;;  %v4473_v35 = vpop.f32.mrb[127].mxu1  ;;  %v8249_v54 = vld [vmem:[%s14098_s7 + $0x80] sm:$0xff] }
 0x754   : > { %v4550_v44 = vpack.c.bf16 %v4473_v35, %v4470_v52  ;;  %9724 = vmatprep.subr.bf16.mxu0 %v4202_v20  ;;  %v8250_v52 = vld [vmem:[%s14098_s7 + $0x88] sm:$0xff]  ;;  %v8251_v35 = vld [vmem:[%s14098_s7 + $0x90] sm:$0xff] }
 0x756   : > { %9677 = vmatmul.mubr.bf16.vlgmr.msra.gmra.mrb[68].mxu0 %v11405_v42  ;;  %v11527_v42 = vmov 0.0|0.0  }
 0x757   : > { %9725 = vmatpush3.bf16.msra.mxu0 %v4202_v20  ;;  %9680 = vmatprep.mubr.bf16.mxu0 %v11406_v3  ;;  %v8252_v3 = vld [vmem:[%s14098_s7 + $0x98] sm:$0xff] }
 0x758   : > { %9726 = vmatprep.subr.bf16.mxu0 %v12802_v31  ;;  %v9778_v40 = vpop.f32.mrb[128].mxu1  ;;  %10572 = vmatprep.subr.bf16.mxu1 %v11527_v42 }
 0x759   : > { %v4486_v14 = vpop.f32.mrb[129].mxu1 }
 0x75a   : > { %v9779_v51 = vpop.f32.mrb[130].mxu1 }
 0x75b   : > { %v12852_v5 = vpack.c.bf16 %v9779_v51, %v9778_v40  ;;  %9727 = vmatpush3.bf16.msra.mxu0 %v12802_v31  ;;  %v4489_v21 = vpop.f32.mrb[131].mxu1  ;;  %v10576_v51 = vpack.c.bf16 %v8252_v3, %v8251_v35  ;;  %v11436_v3 = vld [vmem:[%s14096_s5 + $0x180] sm:$0xff]  }
 0x75c   : > { %v4552_v39 = vpack.c.bf16 %v4489_v21, %v4486_v14  ;;  %9728 = vmatprep.subr.bf16.mxu0 %v4204_v61  ;;  %v11421_v14 = vld [vmem:[%s14096_s5 + $0x108] sm:$0xff]   ;;  %v11422_v21 = vld [vmem:[%s14096_s5 + $0x110] sm:$0xff]  }
 0x75e   : > { %9681 = vmatmul.mubr.bf16.gmra.mrb[72].mxu0 %v11407_v63 }
 0x75f   : > { %9729 = vmatpush3.bf16.msra.mxu0 %v4204_v61  ;;  %9684 = vmatprep.mubr.bf16.mxu0 %v11408_v6 }
 0x760   : > { %9730 = vmatprep.subr.bf16.mxu0 %v12812_v33  ;;  %v9782_v11 = vpop.f32.mrb[132].mxu1 }
 0x761   : > { %v4502_v2 = vpop.f32.mrb[133].mxu1 }
 0x762   : > { %v9783_v9 = vpop.f32.mrb[134].mxu1 }
 0x763   : > { %v12862_v34 = vpack.c.bf16 %v9783_v9, %v9782_v11  ;;  %9731 = vmatpush3.bf16.msra.mxu0 %v12812_v33  ;;  %v4505_v56 = vpop.f32.mrb[135].mxu1  ;;  %v11423_v9 = vld [vmem:[%s14096_s5 + $0x118] sm:$0xff]  }
 0x764   : > { %v4554_v8 = vpack.c.bf16 %v4505_v56, %v4502_v2  ;;  %9732 = vmatprep.subr.bf16.mxu0 %v4206_v17  ;;  %v11424_v56 = vld [vmem:[%s14096_s5 + $0x120] sm:$0xff]  }
 0x766   : > { %9685 = vmatmul.mubr.bf16.gmra.mrb[76].mxu0 %v11409_v48 }
 0x767   : > { %9733 = vmatpush3.bf16.msra.mxu0 %v4206_v17  ;;  %9688 = vmatprep.mubr.bf16.mxu0 %v11410_v43 }
 0x768   : > { %9734 = vmatprep.subr.bf16.mxu0 %v12822_v30  ;;  %v9786_v16 = vpop.f32.mrb[136].mxu1 }
 0x769   : > { %v4518_v22 = vpop.f32.mrb[137].mxu1 }
 0x76a   : > { %v9787_v12 = vpop.f32.mrb[138].mxu1 }
 0x76b   : > { %v12872_v28 = vpack.c.bf16 %v9787_v12, %v9786_v16  ;;  %9735 = vmatpush3.bf16.msra.mxu0 %v12822_v30  ;;  %v4521_v41 = vpop.f32.mrb[139].mxu1  ;;  %v11425_v12 = vld [vmem:[%s14096_s5 + $0x128] sm:$0xff]  }
 0x76c   : > { %v4556_v18 = vpack.c.bf16 %v4521_v41, %v4518_v22  ;;  %9736 = vmatprep.subr.bf16.mxu0 %v4208_v38  ;;  %v11426_v41 = vld [vmem:[%s14096_s5 + $0x130] sm:$0xff]  }
 0x76e   : > { %9689 = vmatmul.mubr.bf16.gmra.mrb[80].mxu0 %v11411_v57 }
 0x76f   : > { %9737 = vmatpush3.bf16.msra.mxu0 %v4208_v38  ;;  %9740 = vmatprep.mubr.bf16.mxu0 %v11412_v55 }
 0x770   : > { %9738 = vmatprep.subr.bf16.mxu0 %v12832_v10  ;;  %v9838_v29 = vpop.f32.mrb[140].mxu1 }
 0x771   : > { %v4818_v23 = vpop.f32.mrb[141].mxu1 }
 0x772   : > { %v9839_v45 = vpop.f32.mrb[142].mxu1 }
 0x773   : > { %v12882_v31 = vpack.c.bf16 %v9839_v45, %v9838_v29  ;;  %9739 = vmatpush3.bf16.msra.mxu0 %v12832_v10  ;;  %v4821_v25 = vpop.f32.mrb[143].mxu1  ;;  %v11427_v45 = vld [vmem:[%s14096_s5 + $0x138] sm:$0xff]  }
 0x774   : > { %v12888_v20 = vpack.c.bf16 %v4821_v25, %v4818_v23  ;;  %9788 = vmatprep.subr.bf16.mxu0 %v4550_v44  ;;  %v11428_v25 = vld [vmem:[%s14096_s5 + $0x140] sm:$0xff]  }
 0x776   : > { %9741 = vmatmul.mubr.bf16.vlgmr.msra.gmra.mrb[68].mxu0 %v11413_v58 }
 0x777   : > { %9789 = vmatpush3.bf16.msra.mxu0 %v4550_v44  ;;  %9744 = vmatprep.mubr.bf16.mxu0 %v11414_v13 }
 0x778   : > { %9790 = vmatprep.subr.bf16.mxu0 %v12842_v53  ;;  %v9842_v59 = vpop.f32.mrb[144].mxu1 }
 0x779   : > { %v4834_v32 = vpop.f32.mrb[145].mxu1 }
 0x77a   : > { %v9843_v60 = vpop.f32.mrb[146].mxu1 }
 0x77b   : > { %v12894_v33 = vpack.c.bf16 %v9843_v60, %v9842_v59  ;;  %9791 = vmatpush3.bf16.msra.mxu0 %v12842_v53  ;;  %v4837_v62 = vpop.f32.mrb[147].mxu1  ;;  %v10573_v53 = vpack.c.bf16 %v8250_v52, %v8249_v54  ;;  %v11429_v60 = vld [vmem:[%s14096_s5 + $0x148] sm:$0xff]  }
 0x77c   : > { %v12900_v61 = vpack.c.bf16 %v4837_v62, %v4834_v32  ;;  %9792 = vmatprep.subr.bf16.mxu0 %v4552_v39  ;;  %v11430_v62 = vld [vmem:[%s14096_s5 + $0x150] sm:$0xff]  }
 0x77d   : > { %10574 = vmatpush3.bf16.msra.mxu1 %v10573_v53 }
 0x77e   : > { %9745 = vmatmul.mubr.bf16.gmra.mrb[72].mxu0 %v11415_v46  ;;  %10575 = vmatprep.subr.bf16.mxu1 %v11527_v42 }
 0x77f   : > { %9793 = vmatpush3.bf16.msra.mxu0 %v4552_v39  ;;  %9748 = vmatprep.mubr.bf16.mxu0 %v11416_v4 }
 0x780   : > { %9794 = vmatprep.subr.bf16.mxu0 %v12852_v5  ;;  %v9846_v15 = vpop.f32.mrb[148].mxu1 }
 0x781   : > { %v4850_v0 = vpop.f32.mrb[149].mxu1  ;;  %10577 = vmatpush3.bf16.msra.mxu1 %v10576_v51  ;;  %v11439_v51 = vld [vmem:[%s14096_s5 + $0x198] sm:$0xff]  }
 0x782   : > { %v9847_v36 = vpop.f32.mrb[150].mxu1  ;;  %10578 = vmatprep.subr.bf16.mxu1 %v11527_v42 }
 0x783   : > { %v12906_v30 = vpack.c.bf16 %v9847_v36, %v9846_v15  ;;  %9795 = vmatpush3.bf16.msra.mxu0 %v12852_v5  ;;  %v4853_v1 = vpop.f32.mrb[151].mxu1  ;;  %v11431_v36 = vld [vmem:[%s14096_s5 + $0x158] sm:$0xff]  }
 0x784   : > { %v12912_v17 = vpack.c.bf16 %v4853_v1, %v4850_v0  ;;  %9796 = vmatprep.subr.bf16.mxu0 %v4554_v8  ;;  %v11432_v1 = vld [vmem:[%s14096_s5 + $0x160] sm:$0xff]  }
 0x786   : > { %9749 = vmatmul.mubr.bf16.gmra.mrb[76].mxu0 %v11417_v47 }
 0x787   : > { %9797 = vmatpush3.bf16.msra.mxu0 %v4554_v8  ;;  %9752 = vmatprep.mubr.bf16.mxu0 %v11418_v49 }
 0x788   : > { %9798 = vmatprep.subr.bf16.mxu0 %v12862_v34  ;;  %v9850_v26 = vpop.f32.mrb[152].mxu1 }
 0x789   : > { %v4866_v7 = vpop.f32.mrb[153].mxu1 }
 0x78a   : > { %v9851_v27 = vpop.f32.mrb[154].mxu1 }
 0x78b   : > { %v12918_v10 = vpack.c.bf16 %v9851_v27, %v9850_v26  ;;  %9799 = vmatpush3.bf16.msra.mxu0 %v12862_v34  ;;  %v4869_v24 = vpop.f32.mrb[155].mxu1  ;;  %v11433_v27 = vld [vmem:[%s14096_s5 + $0x168] sm:$0xff]  }
 0x78c   : > { %v12924_v38 = vpack.c.bf16 %v4869_v24, %v4866_v7  ;;  %9800 = vmatprep.subr.bf16.mxu0 %v4556_v18  ;;  %v11434_v24 = vld [vmem:[%s14096_s5 + $0x170] sm:$0xff]  }
 0x78e   : > { %9753 = vmatmul.mubr.bf16.gmra.mrb[80].mxu0 %v11419_v37 }
 0x78f   : > { %9801 = vmatpush3.bf16.msra.mxu0 %v4556_v18  ;;  %9804 = vmatprep.mubr.bf16.mxu0 %v11420_v50 }
 0x790   : > { %9802 = vmatprep.subr.bf16.mxu0 %v12872_v28  ;;  %v9902_v19 = vpop.f32.mrb[156].mxu1 }
 0x791   : > { %v5166_v44 = vpop.f32.mrb[157].mxu1 }
 0x792   : > { %v9903_v40 = vpop.f32.mrb[158].mxu1 }
 0x793   : > { %v12943_v63 = vpack.c.bf16 %v9903_v40, %v9902_v19  ;;  %9803 = vmatpush3.bf16.msra.mxu0 %v12872_v28  ;;  %v5169_v5 = vpop.f32.mrb[159].mxu1  ;;  %v11435_v19 = vld [vmem:[%s14096_s5 + $0x178] sm:$0xff]   ;;  %v11437_v40 = vld [vmem:[%s14096_s5 + $0x188] sm:$0xff]  }
 0x794   : > { %v5246_v6 = vpack.c.bf16 %v5169_v5, %v5166_v44  ;;  %9852 = vmatprep.subr.bf16.mxu0 %v12888_v20  ;;  %v11441_v5 = vld [vmem:[%s14096_s5 + $0x1a8] sm:$0xff]  }
 0x796   : > { %9805 = vmatmul.mubr.bf16.vlgmr.msra.gmra.mrb[68].mxu0 %v11421_v14  ;;  %v11438_v14 = vld [vmem:[%s14096_s5 + $0x190] sm:$0xff]  }
 0x797   : > { %9853 = vmatpush3.bf16.msra.mxu0 %v12888_v20  ;;  %9808 = vmatprep.mubr.bf16.mxu0 %v11422_v21  ;;  %v11442_v21 = vld [vmem:[%s14096_s5 + $0x1b0] sm:$0xff]  }
 0x798   : > { %9854 = vmatprep.subr.bf16.mxu0 %v12882_v31  ;;  %v9906_v39 = vpop.f32.mrb[160].mxu1 }
 0x799   : > { %v5182_v11 = vpop.f32.mrb[161].mxu1 }
 0x79a   : > { %v9907_v2 = vpop.f32.mrb[162].mxu1 }
 0x79b   : > { %v12957_v48 = vpack.c.bf16 %v9907_v2, %v9906_v39  ;;  %9855 = vmatpush3.bf16.msra.mxu0 %v12882_v31  ;;  %v5185_v34 = vpop.f32.mrb[163].mxu1  ;;  %v11444_v39 = vld [vmem:[%s14096_s5 + $0x1c0] sm:$0xff]   ;;  %v8266_v2 = vld [vmem:[%s14098_s7 + $0x108] sm:$0xff] }
 0x79c   : > { %v5248_v43 = vpack.c.bf16 %v5185_v34, %v5182_v11  ;;  %9856 = vmatprep.subr.bf16.mxu0 %v12900_v61  ;;  %v8265_v11 = vld [vmem:[%s14098_s7 + $0x100] sm:$0xff] }
 0x79d   : > { %v10621_v34 = vpack.c.bf16 %v8266_v2, %v8265_v11 }
 0x79e   : > { %9809 = vmatmul.mubr.bf16.gmra.mrb[72].mxu0 %v11423_v9  ;;  %v11445_v9 = vld [vmem:[%s14096_s5 + $0x1c8] sm:$0xff]  }
 0x79f   : > { %9857 = vmatpush3.bf16.msra.mxu0 %v12900_v61  ;;  %9812 = vmatprep.mubr.bf16.mxu0 %v11424_v56  ;;  %v8267_v56 = vld [vmem:[%s14098_s7 + $0x110] sm:$0xff] }
 0x7a0   : > { %9858 = vmatprep.subr.bf16.mxu0 %v12894_v33  ;;  %v9910_v8 = vpop.f32.mrb[164].mxu1 }
 0x7a1   : > { %v5198_v16 = vpop.f32.mrb[165].mxu1 }
 0x7a2   : > { %v9911_v22 = vpop.f32.mrb[166].mxu1 }
 0x7a3   : > { %v12969_v57 = vpack.c.bf16 %v9911_v22, %v9910_v8  ;;  %9859 = vmatpush3.bf16.msra.mxu0 %v12894_v33  ;;  %v5201_v28 = vpop.f32.mrb[167].mxu1  ;;  %v8270_v22 = vld [vmem:[%s14098_s7 + $0x128] sm:$0xff] }
 0x7a4   : > { %v5250_v55 = vpack.c.bf16 %v5201_v28, %v5198_v16  ;;  %9860 = vmatprep.subr.bf16.mxu0 %v12912_v17  ;;  %v8269_v16 = vld [vmem:[%s14098_s7 + $0x120] sm:$0xff] }
 0x7a5   : > { %v10627_v28 = vpack.c.bf16 %v8270_v22, %v8269_v16 }
 0x7a6   : > { %9813 = vmatmul.mubr.bf16.gmra.mrb[76].mxu0 %v11425_v12  ;;  %v11447_v12 = vld [vmem:[%s14096_s5 + $0x1d8] sm:$0xff]  }
 0x7a7   : > { %9861 = vmatpush3.bf16.msra.mxu0 %v12912_v17  ;;  %9816 = vmatprep.mubr.bf16.mxu0 %v11426_v41  ;;  %v11449_v41 = vld [vmem:[%s14096_s5 + $0x1e8] sm:$0xff]  }
 0x7a8   : > { %9862 = vmatprep.subr.bf16.mxu0 %v12906_v30  ;;  %v9914_v18 = vpop.f32.mrb[168].mxu1 }
 0x7a9   : > { %v5214_v29 = vpop.f32.mrb[169].mxu1 }
 0x7aa   : > { %v9915_v23 = vpop.f32.mrb[170].mxu1 }
 0x7ab   : > { %v12981_v58 = vpack.c.bf16 %v9915_v23, %v9914_v18  ;;  %9863 = vmatpush3.bf16.msra.mxu0 %v12906_v30  ;;  %v5217_v31 = vpop.f32.mrb[171].mxu1  ;;  %v11451_v18 = vld [vmem:[%s14096_s5 + $0x1f8] sm:$0xff]   ;;  %v8254_v23 = vld [vmem:[%s14098_s7 + $0xa8] sm:$0xff] }
 0x7ac   : > { %v5252_v13 = vpack.c.bf16 %v5217_v31, %v5214_v29  ;;  %9864 = vmatprep.subr.bf16.mxu0 %v12924_v38  ;;  %v8253_v29 = vld [vmem:[%s14098_s7 + $0xa0] sm:$0xff]  ;;  %v8272_v31 = vld [vmem:[%s14098_s7 + $0x138] sm:$0xff] }
 0x7ae   : > { %9817 = vmatmul.mubr.bf16.gmra.mrb[80].mxu0 %v11427_v45  ;;  %v10579_v45 = vpack.c.bf16 %v8254_v23, %v8253_v29 }
 0x7af   : > { %9865 = vmatpush3.bf16.msra.mxu0 %v12924_v38  ;;  %9868 = vmatprep.mubr.bf16.mxu0 %v11428_v25 }
 0x7b0   : > { %9866 = vmatprep.subr.bf16.mxu0 %v12918_v10  ;;  %v9966_v20 = vpop.f32.mrb[172].mxu1  ;;  %10580 = vmatpush3.bf16.msra.mxu1 %v10579_v45 }
 0x7b1   : > { %v5514_v59 = vpop.f32.mrb[173].mxu1  ;;  %10581 = vmatprep.subr.bf16.mxu1 %v11527_v42 }
 0x7b2   : > { %v9967_v32 = vpop.f32.mrb[174].mxu1 }
 0x7b3   : > { %v5595_v46 = vpack.c.bf16 %v9967_v32, %v9966_v20  ;;  %9867 = vmatpush3.bf16.msra.mxu0 %v12918_v10  ;;  %v5517_v33 = vpop.f32.mrb[175].mxu1  ;;  %v8256_v20 = vld [vmem:[%s14098_s7 + $0xb8] sm:$0xff]  ;;  %v8273_v32 = vld [vmem:[%s14098_s7 + $0x140] sm:$0xff] }
 0x7b4   : > { %v5594_v4 = vpack.c.bf16 %v5517_v33, %v5514_v59  ;;  %9916 = vmatprep.subr.bf16.mxu0 %v5246_v6  ;;  %v8257_v33 = vld [vmem:[%s14098_s7 + $0xc0] sm:$0xff] }
 0x7b6   : > { %9869 = vmatmul.mubr.bf16.vlgmr.msra.gmra.mrb[68].mxu0 %v11429_v60  ;;  %v8274_v60 = vld [vmem:[%s14098_s7 + $0x148] sm:$0xff] }
 0x7b7   : > { %9917 = vmatpush3.bf16.msra.mxu0 %v5246_v6  ;;  %9872 = vmatprep.mubr.bf16.mxu0 %v11430_v62  ;;  %v11443_v6 = vld [vmem:[%s14096_s5 + $0x1b8] sm:$0xff]   ;;  %v8258_v62 = vld [vmem:[%s14098_s7 + $0xc8] sm:$0xff] }
 0x7b8   : > { %9918 = vmatprep.subr.bf16.mxu0 %v12943_v63  ;;  %v9970_v61 = vpop.f32.mrb[176].mxu1 }
 0x7b9   : > { %v5530_v15 = vpop.f32.mrb[177].mxu1 }
 0x7ba   : > { %v9971_v0 = vpop.f32.mrb[178].mxu1 }
 0x7bb   : > { %v5597_v47 = vpack.c.bf16 %v9971_v0, %v9970_v61  ;;  %9919 = vmatpush3.bf16.msra.mxu0 %v12943_v63  ;;  %v5533_v30 = vpop.f32.mrb[179].mxu1  ;;  %v11440_v63 = vld [vmem:[%s14096_s5 + $0x1a0] sm:$0xff]   ;;  %v8275_v61 = vld [vmem:[%s14098_s7 + $0x150] sm:$0xff] }
 0x7bc   : > { %v5596_v49 = vpack.c.bf16 %v5533_v30, %v5530_v15  ;;  %9920 = vmatprep.subr.bf16.mxu0 %v5248_v43  ;;  %v8276_v15 = vld [vmem:[%s14098_s7 + $0x158] sm:$0xff] }
 0x7bd   : > { %v10636_v0 = vpack.c.bf16 %v8276_v15, %v8275_v61 }
 0x7be   : > { %9873 = vmatmul.mubr.bf16.gmra.mrb[72].mxu0 %v11431_v36  ;;  %v8259_v36 = vld [vmem:[%s14098_s7 + $0xd0] sm:$0xff] }
 0x7bf   : > { %9921 = vmatpush3.bf16.msra.mxu0 %v5248_v43  ;;  %9876 = vmatprep.mubr.bf16.mxu0 %v11432_v1  ;;  %v8268_v43 = vld [vmem:[%s14098_s7 + $0x118] sm:$0xff]  ;;  %v8277_v1 = vld [vmem:[%s14098_s7 + $0x160] sm:$0xff] }
 0x7c0   : > { %9922 = vmatprep.subr.bf16.mxu0 %v12957_v48  ;;  %v9974_v17 = vpop.f32.mrb[180].mxu1  ;;  %v10624_v8 = vpack.c.bf16 %v8268_v43, %v8267_v56 }
 0x7c1   : > { %v5546_v26 = vpop.f32.mrb[181].mxu1 }
 0x7c2   : > { %v9975_v7 = vpop.f32.mrb[182].mxu1 }
 0x7c3   : > { %v5599_v37 = vpack.c.bf16 %v9975_v7, %v9974_v17  ;;  %9923 = vmatpush3.bf16.msra.mxu0 %v12957_v48  ;;  %v5549_v10 = vpop.f32.mrb[183].mxu1  ;;  %v11446_v48 = vld [vmem:[%s14096_s5 + $0x1d0] sm:$0xff]   ;;  %v8262_v7 = vld [vmem:[%s14098_s7 + $0xe8] sm:$0xff] }
 0x7c4   : > { %v5598_v50 = vpack.c.bf16 %v5549_v10, %v5546_v26  ;;  %9924 = vmatprep.subr.bf16.mxu0 %v5250_v55  ;;  %v8261_v26 = vld [vmem:[%s14098_s7 + $0xe0] sm:$0xff]  ;;  %v8280_v10 = vld [vmem:[%s14098_s7 + $0x178] sm:$0xff] }
 0x7c6   : > { %9877 = vmatmul.mubr.bf16.gmra.mrb[76].mxu0 %v11433_v27  ;;  %v10591_v27 = vpack.c.bf16 %v8262_v7, %v8261_v26  ;;  %v8304_v26 = vld [vmem:[%s14098_s7 + $0x238] sm:$0xff] }
 0x7c7   : > { %9925 = vmatpush3.bf16.msra.mxu0 %v5250_v55  ;;  %9880 = vmatprep.mubr.bf16.mxu0 %v11434_v24  ;;  %v11450_v55 = vld [vmem:[%s14096_s5 + $0x1f0] sm:$0xff]  }
 0x7c8   : > { %9926 = vmatprep.subr.bf16.mxu0 %v12969_v57  ;;  %v9978_v38 = vpop.f32.mrb[184].mxu1 }
 0x7c9   : > { %v5562_v54 = vpop.f32.mrb[185].mxu1 }
 0x7ca   : > { %v9979_v52 = vpop.f32.mrb[186].mxu1 }
 0x7cb   : > { %v5601_v53 = vpack.c.bf16 %v9979_v52, %v9978_v38  ;;  %9927 = vmatpush3.bf16.msra.mxu0 %v12969_v57  ;;  %v5565_v35 = vpop.f32.mrb[187].mxu1  ;;  %v11448_v57 = vld [vmem:[%s14096_s5 + $0x1e0] sm:$0xff]   ;;  %v8264_v38 = vld [vmem:[%s14098_s7 + $0xf8] sm:$0xff]  ;;  %v11529_v52 = vmov 0.0  }
 0x7cc   : > { %v5600_v44 = vpack.c.bf16 %v5565_v35, %v5562_v54  ;;  %9928 = vmatprep.subr.bf16.mxu0 %v5252_v13  ;;  %10044 = vmatprep.mubr.msk.f32.mxu1 %vm11528_vm1, %v11529_v52 }
 0x7ce   : > { %9881 = vmatmul.mubr.bf16.gmra.mrb[80].mxu0 %v11435_v19  ;;  %v5787_v19 = vpop.permute.xlu0 %5786 }
 0x7cf   : > { %9929 = vmatpush3.bf16.msra.mxu0 %v5252_v13  ;;  %9932 = vmatprep.mubr.bf16.mxu0 %v11436_v3  ;;  %v8255_v13 = vld [vmem:[%s14098_s7 + $0xb0] sm:$0xff] }
 0x7d0   : > { %9930 = vmatprep.subr.bf16.mxu0 %v12981_v58  ;;  %v10582_v59 = vpack.c.bf16 %v8256_v20, %v8255_v13  ;;  %v5973_v13 = vld [vmem:[%s14098_s7 + $0x10] sm:$0xff]  ;;  %v5974_v20 = vld [vmem:[%s14098_s7 + $0x18] sm:$0xff] }
 0x7d1   : > { %v10600_v61 = vpack.c.bf16 %v5974_v20, %v5973_v13 }
 0x7d2   : > { %10583 = vmatpush3.bf16.msra.mxu1 %v10582_v59 }
 0x7d3   : > { %9931 = vmatpush3.bf16.msra.mxu0 %v12981_v58  ;;  %v8271_v58 = vld [vmem:[%s14098_s7 + $0x130] sm:$0xff]  ;;  %10584 = vmatprep.subr.bf16.mxu1 %v11527_v42 }
 0x7d4   : > { %9980 = vmatprep.subr.bf16.mxu0 %v5594_v4  ;;  %v10630_v25 = vpack.c.bf16 %v8272_v31, %v8271_v58 }
 0x7d6   : > { %9933 = vmatmul.mubr.bf16.vlgmr.msra.gmra.mrb[68].mxu0 %v11437_v40 }
 0x7d7   : > { %9981 = vmatpush3.bf16.msra.mxu0 %v5594_v4  ;;  %9936 = vmatprep.mubr.bf16.mxu0 %v11438_v14  ;;  %v10585_v4 = vpack.c.bf16 %v8258_v62, %v8257_v33  ;;  %v5782_v62 = vpop.permute.xlu1 %5781 }
 0x7d8   : > { %9982 = vmatprep.subr.bf16.mxu0 %v5595_v46 }
 0x7d9   : > { %10586 = vmatpush3.bf16.msra.mxu1 %v10585_v4 }
 0x7da   : > { %10587 = vmatprep.subr.bf16.mxu1 %v11527_v42 }
 0x7db   : > { %9983 = vmatpush3.bf16.msra.mxu0 %v5595_v46  ;;  %v10633_v46 = vpack.c.bf16 %v8274_v60, %v8273_v32  ;;  %v8301_v60 = vld [vmem:[%s14098_s7 + $0x220] sm:$0xff] }
 0x7dc   : > { %9984 = vmatprep.subr.bf16.mxu0 %v5596_v49 }
 0x7de   : > { %9937 = vmatmul.mubr.bf16.gmra.mrb[72].mxu0 %v11439_v51 }
 0x7df   : > { %9985 = vmatpush3.bf16.msra.mxu0 %v5596_v49  ;;  %9940 = vmatprep.mubr.bf16.mxu0 %v11440_v63  ;;  %v8278_v49 = vld [vmem:[%s14098_s7 + $0x168] sm:$0xff] }
 0x7e0   : > { %9986 = vmatprep.subr.bf16.mxu0 %v5597_v47  ;;  %v10639_v17 = vpack.c.bf16 %v8278_v49, %v8277_v1 }
 0x7e3   : > { %9987 = vmatpush3.bf16.msra.mxu0 %v5597_v47  ;;  %v8260_v47 = vld [vmem:[%s14098_s7 + $0xd8] sm:$0xff] }
 0x7e4   : > { %9988 = vmatprep.subr.bf16.mxu0 %v5598_v50  ;;  %v10588_v30 = vpack.c.bf16 %v8260_v47, %v8259_v36  ;;  %v5975_v47 = vld [vmem:[%s14098_s7 + $0x20] sm:$0xff] }
 0x7e6   : > { %9941 = vmatmul.mubr.bf16.gmra.mrb[76].mxu0 %v11441_v5  ;;  %10589 = vmatpush3.bf16.msra.mxu1 %v10588_v30  ;;  %v5976_v30 = vld [vmem:[%s14098_s7 + $0x28] sm:$0xff] }
 0x7e7   : > { %9989 = vmatpush3.bf16.msra.mxu0 %v5598_v50  ;;  %9944 = vmatprep.mubr.bf16.mxu0 %v11442_v21  ;;  %v8263_v50 = vld [vmem:[%s14098_s7 + $0xf0] sm:$0xff]  ;;  %v10603_v7 = vpack.c.bf16 %v5976_v30, %v5975_v47 }
 0x7e8   : > { %9990 = vmatprep.subr.bf16.mxu0 %v5599_v37  ;;  %10590 = vmatprep.subr.bf16.mxu1 %v11527_v42  ;;  %v10594_v54 = vpack.c.bf16 %v8264_v38, %v8263_v50  ;;  %v8305_v38 = vld [vmem:[%s14098_s7 + $0x240] sm:$0xff] }
 0x7ea   : > { %10592 = vmatpush3.bf16.msra.mxu1 %v10591_v27 }
 0x7eb   : > { %9991 = vmatpush3.bf16.msra.mxu0 %v5599_v37  ;;  %v8279_v37 = vld [vmem:[%s14098_s7 + $0x170] sm:$0xff]  ;;  %10593 = vmatprep.subr.bf16.mxu1 %v11527_v42 }
 0x7ec   : > { %9992 = vmatprep.subr.bf16.mxu0 %v5600_v44  ;;  %v10642_v24 = vpack.c.bf16 %v8280_v10, %v8279_v37  ;;  %v5977_v10 = vld [vmem:[%s14098_s7 + $0x30] sm:$0xff] }
 0x7ee   : > { %9945 = vmatmul.mubr.bf16.gmra.mrb[80].mxu0 %v11443_v6  ;;  %10595 = vmatpush3.bf16.msra.mxu1 %v10594_v54  ;;  %v8306_v54 = vld [vmem:[%s14098_s7 + $0x248] sm:$0xff] }
 0x7ef   : > { %9993 = vmatpush3.bf16.msra.mxu0 %v5600_v44  ;;  %9996 = vmatprep.mubr.bf16.mxu0 %v11444_v39 }
 0x7f0   : > { %9994 = vmatprep.subr.bf16.mxu0 %v5601_v53  ;;  %10596 = vmatprep.subr.bf16.mxu1 %v11527_v42 }
 0x7f3   : > { %9995 = vmatpush3.bf16.msra.mxu0 %v5601_v53  ;;  %v5792_v53 = vpop.permute.xlu0 %5791 }
 0x7f4   : > { %10620 = vmatprep.subr.bf16.mxu0 %v11527_v42 }
 0x7f6   : > { %9997 = vmatmul.mubr.bf16.vlgmr.msra.gmra.mrb[68].mxu0 %v11445_v9 }
 0x7f7   : > { %10000 = vmatprep.mubr.bf16.mxu0 %v11446_v48  ;;  %10622 = vmatpush3.bf16.msra.mxu0 %v10621_v34  ;;  %v8297_v48 = vld [vmem:[%s14098_s7 + $0x200] sm:$0xff]  ;;  %v8298_v34 = vld [vmem:[%s14098_s7 + $0x208] sm:$0xff]  ;;  %v5802_v31 = vpop.permute.xlu0 %5801 }
 0x7f8   : > { %10623 = vmatprep.subr.bf16.mxu0 %v11527_v42 }
 0x7fb   : > { %10625 = vmatpush3.bf16.msra.mxu0 %v10624_v8 }
 0x7fc   : > { %10626 = vmatprep.subr.bf16.mxu0 %v11527_v42 }
 0x7fe   : > { %10001 = vmatmul.mubr.bf16.gmra.mrb[72].mxu0 %v11447_v12  ;;  %v10669_v12 = vpack.c.bf16 %v8298_v34, %v8297_v48  ;;  %v8310_v48 = vld [vmem:[%s14098_s7 + $0x268] sm:$0xff] }
 0x7ff   : > { %10004 = vmatprep.mubr.bf16.mxu0 %v11448_v57  ;;  %10628 = vmatpush3.bf16.msra.mxu0 %v10627_v28  ;;  %v5971_v57 = vld [vmem:[%s14098_s7] sm:$0xff]  ;;  %v5972_v28 = vld [vmem:[%s14098_s7 + $0x8] sm:$0xff] }
 0x800   : > { %10629 = vmatprep.subr.bf16.mxu0 %v11527_v42  ;;  %v10597_v58 = vpack.c.bf16 %v5972_v28, %v5971_v57  ;;  %v8311_v57 = vld [vmem:[%s14098_s7 + $0x270] sm:$0xff]  ;;  %v8312_v28 = vld [vmem:[%s14098_s7 + $0x278] sm:$0xff] }
 0x803   : > { %10631 = vmatpush3.bf16.msra.mxu0 %v10630_v25 }
 0x804   : > { %10632 = vmatprep.subr.bf16.mxu0 %v11527_v42 }
 0x806   : > { %10005 = vmatmul.mubr.bf16.gmra.mrb[76].mxu0 %v11449_v41 }
 0x807   : > { %10008 = vmatprep.mubr.bf16.mxu0 %v11450_v55  ;;  %10634 = vmatpush3.bf16.msra.mxu0 %v10633_v46  ;;  %v8299_v55 = vld [vmem:[%s14098_s7 + $0x210] sm:$0xff]  ;;  %v8302_v46 = vld [vmem:[%s14098_s7 + $0x228] sm:$0xff] }
 0x808   : > { %10635 = vmatprep.subr.bf16.mxu0 %v11527_v42  ;;  %v10675_v36 = vpack.c.bf16 %v8302_v46, %v8301_v60  ;;  %v8281_v60 = vld [vmem:[%s14098_s7 + $0x180] sm:$0xff]  ;;  %v8282_v46 = vld [vmem:[%s14098_s7 + $0x188] sm:$0xff] }
 0x809   : > { %v10645_v30 = vpack.c.bf16 %v8282_v46, %v8281_v60 }
 0x80b   : > { %10637 = vmatpush3.bf16.msra.mxu0 %v10636_v0 }
 0x80c   : > { %10638 = vmatprep.subr.bf16.mxu0 %v11527_v42 }
 0x80e   : > { %10009 = vmatmul.mubr.bf16.gmra.mrb[80].mxu0 %v11451_v18  ;;  %v8300_v18 = vld [vmem:[%s14098_s7 + $0x218] sm:$0xff] }
 0x80f   : > { %10640 = vmatpush3.bf16.msra.mxu0 %v10639_v17  ;;  %10114 = vmatprep.mubr.msk.f32.mxu0 %vm11528_vm1, %v11529_v52  ;;  %v10672_v25 = vpack.c.bf16 %v8300_v18, %v8299_v55  ;;  %v8303_v17 = vld [vmem:[%s14098_s7 + $0x230] sm:$0xff] }
 0x810   : > { %10641 = vmatprep.subr.bf16.mxu0 %v11527_v42  ;;  %v10678_v37 = vpack.c.bf16 %v8304_v26, %v8303_v17  ;;  %v8283_v26 = vld [vmem:[%s14098_s7 + $0x190] sm:$0xff] }
 0x813   : > { %10643 = vmatpush3.bf16.msra.mxu0 %v10642_v24  ;;  %v5978_v24 = vld [vmem:[%s14098_s7 + $0x38] sm:$0xff] }
 0x814   : > { %10668 = vmatprep.subr.bf16.mxu0 %v11527_v42 }
 0x8c9   : > { %v9998_v35 = vpop.f32.mrb[68].mxu0 }
 0x8ca   : > { %v5861_v3 = vadd.f32 %v9998_v35, %v5792_v53  ;;  %v5684_v44 = vpop.f32.mrb[69].mxu0  ;;  %v10681_v35 = vpack.c.bf16 %v8306_v54, %v8305_v38  ;;  %v8285_v38 = vld [vmem:[%s14098_s7 + $0x1a0] sm:$0xff]  ;;  %v8286_v54 = vld [vmem:[%s14098_s7 + $0x1a8] sm:$0xff] }
 0x8cb   : > { %v13171_v40 = vpop.f32.mrb[70].mxu0  ;;  %v13228_v15 = vadd.f32 %v5782_v62, %v5684_v44  ;;  %v5980_v44 = vld [vmem:[%s14098_s7 + $0x48] sm:$0xff] }
 0x8cc   : > { %v5893_v14 = vmin.f32 %v5861_v3, 0.0  ;;  %v5687_v51 = vpop.f32.mrb[71].mxu0  ;;  %vm5877_vm2 = vcmp.gt.f32.partialorder %v5861_v3, 0.0 }
 0x8cd   : > { %v5860_v63 = vadd.f32 %v5787_v19, %v5687_v51  ;;  %v5891_v27 = vmin.f32 %v13228_v15, 0.0  ;;  %v10606_v19 = vpack.c.bf16 %v5978_v24, %v5977_v10  ;;  %v8308_v51 = vld [vmem:[%s14098_s7 + $0x258] sm:$0xff]  ;;  %vm5875_vm5 = vcmp.gt.f32.partialorder %v13228_v15, 0.0  ;;  %v8334_v10 = vld [vmem:[%s14098_s7 + $0x328] sm:$0xff]  ;;  %v5797_v24 = vpop.permute.xlu1 %5796 }
 0x8ce   : > { %v5911_v5 = vmul.f32 1.442695, %v5893_v14  ;;  %v8307_v14 = vld [vmem:[%s14098_s7 + $0x250] sm:$0xff] }
 0x8cf   : > { %v5892_v21 = vmin.f32 %v5860_v63, 0.0  ;;  %vm5876_vm3 = vcmp.gt.f32.partialorder %v5860_v63, 0.0  ;;  %v5907_v53 = vmul.f32 1.442695, %v5891_v27 }
 0x8d0   : > { %11484 = vpow2.f32 %v5911_v5  ;;  %v10684_v5 = vpack.c.bf16 %v8308_v51, %v8307_v14  ;;  %v8287_v14 = vld [vmem:[%s14098_s7 + $0x1b0] sm:$0xff]  ;;  %v8288_v51 = vld [vmem:[%s14098_s7 + $0x1b8] sm:$0xff] }
 0x8d1   : > { %v5909_v6 = vmul.f32 1.442695, %v5892_v21  ;;  %v13173_v39 = vpop.f32.mrb[72].mxu0  ;;  %v5981_v21 = vld [vmem:[%s14098_s7 + $0x50] sm:$0xff] }
 0x8d2   : > { %v5700_v11 = vpop.f32.mrb[73].mxu0 }
 0x8d3   : > { %11486 = vpow2.f32 %v5909_v6  ;;  %v13175_v2 = vpop.f32.mrb[74].mxu0  ;;  %v13213_v32 = vadd.f32 %v5802_v31, %v5700_v11  ;;  %v5982_v6 = vld [vmem:[%s14098_s7 + $0x58] sm:$0xff]  ;;  %v8309_v11 = vld [vmem:[%s14098_s7 + $0x260] sm:$0xff]  ;;  %v8330_v31 = vld [vmem:[%s14098_s7 + $0x308] sm:$0xff] }
 0x8d4   : > { %v13177_v9 = vpop.f32.mrb[75].mxu0  ;;  %v10612_v34 = vpack.c.bf16 %v5982_v6, %v5981_v21  ;;  %v8338_v21 = vld [vmem:[%s14098_s7 + $0x348] sm:$0xff]  ;;  %v10654_v6 = vpack.c.bf16 %v8288_v51, %v8287_v14  ;;  %v8317_v51 = vld [vmem:[%s14098_s7 + $0x2a0] sm:$0xff] }
 0x8d5   : > { %v5895_v1 = vmin.f32 %v13213_v32, 0.0  ;;  %vm5879_vm4 = vcmp.gt.f32.partialorder %v13213_v32, 0.0 }
 0x8d7   : > { %v5915_v50 = vmul.f32 1.442695, %v5895_v1  ;;  %v5812_v1 = vpop.permute.xlu0 %5811 }
 0x8d9   : > { %v13185_v56 = vpop.f32.mrb[76].mxu0  ;;  %11488 = vpow2.f32 %v5915_v50 }
 0x8da   : > { %v11485_v43 = vpop.eup %11484  ;;  %v13187_v8 = vpop.f32.mrb[77].mxu0  ;;  %11490 = vpow2.f32 %v5907_v53  ;;  %v8336_v53 = vld [vmem:[%s14098_s7 + $0x338] sm:$0xff] }
 0x8db   : > { %v8235_v16 = vadd.f32 -1.0, %v11485_v43  ;;  %v13189_v22 = vpop.f32.mrb[78].mxu0  ;;  %v10687_v43 = vpack.c.bf16 %v8310_v48, %v8309_v11 }
 0x8dc   : > { %v13197_v41 = vpop.f32.mrb[79].mxu0 }
 0x8dd   : > { %v11487_v29 = vpop.eup %11486  ;;  %v5957_v23 = vsel %vm5877_vm2, %v5861_v3, %v8235_v16  ;;  %v5979_v3 = vld [vmem:[%s14098_s7 + $0x40] sm:$0xff]  ;;  %vm7384_vm2 = vcmask 15360  }
 0x8de   : > { %v8234_v45 = vadd.f32 -1.0, %v11487_v29  ;;  %10115 = vmatmul.mubr.f32.vlgmr.msra.gmra.mrb[84].mxu0 %v5957_v23  ;;  %v5983_v16 = vld [vmem:[%s14098_s7 + $0x60] sm:$0xff]  ;;  %v10690_v29 = vpack.c.bf16 %v8312_v28, %v8311_v57  ;;  %v5985_v23 = vld [vmem:[%s14098_s7 + $0x70] sm:$0xff] }
 0x8df   : > { %10670 = vmatpush3.bf16.msra.mxu0 %v10669_v12  ;;  %10184 = vmatprep.mubr.msk.f32.mxu0 %vm11528_vm1, %v11529_v52  ;;  %v5984_v12 = vld [vmem:[%s14098_s7 + $0x68] sm:$0xff] }
 0x8e0   : > { %v5956_v59 = vsel %vm5876_vm3, %v5860_v63, %v8234_v45  ;;  %10671 = vmatprep.subr.bf16.mxu0 %v11527_v42  ;;  %v10609_v63 = vpack.c.bf16 %v5980_v44, %v5979_v3  ;;  %v10615_v18 = vpack.c.bf16 %v5984_v12, %v5983_v16  ;;  %v5986_v45 = vld [vmem:[%s14098_s7 + $0x78] sm:$0xff]  ;;  %v8339_v16 = vld [vmem:[%s14098_s7 + $0x350] sm:$0xff] }
 0x8e1   : > { %v13222_v33 = vpop.f32.mrb[80].mxu0  ;;  %10045 = vmatmul.mubr.f32.vlgmr.msra.gmra.mrb[188].mxu1 %v5956_v59  ;;  %v10618_v20 = vpack.c.bf16 %v5986_v45, %v5985_v23  ;;  %v8340_v12 = vld [vmem:[%s14098_s7 + $0x358] sm:$0xff]  ;;  %v8342_v23 = vld [vmem:[%s14098_s7 + $0x368] sm:$0xff] }
 0x8e2   : > { %10598 = vmatpush3.bf16.msra.mxu1 %v10597_v58  ;;  %v13224_v4 = vpop.f32.mrb[81].mxu0  ;;  %10079 = vmatprep.mubr.msk.f32.mxu1 %vm11528_vm1, %v11529_v52  ;;  %v8329_v58 = vld [vmem:[%s14098_s7 + $0x300] sm:$0xff]  ;;  %v10732_v28 = vpack.c.bf16 %v8340_v12, %v8339_v16 }
 0x8e3   : > { %10673 = vmatpush3.bf16.msra.mxu0 %v10672_v25  ;;  %v13230_v0 = vpop.f32.mrb[82].mxu0  ;;  %10599 = vmatprep.subr.bf16.mxu1 %v11527_v42  ;;  %v11489_v55 = vpop.eup %11488  ;;  %v10717_v59 = vpack.c.bf16 %v8330_v31, %v8329_v58  ;;  %v8293_v31 = vld [vmem:[%s14098_s7 + $0x1e0] sm:$0xff] }
 0x8e4   : > { %v13240_v49 = vpop.f32.mrb[83].mxu0  ;;  %10674 = vmatprep.subr.bf16.mxu0 %v11527_v42  ;;  %v11491_v25 = vpop.eup %11490  ;;  %v8237_v13 = vadd.f32 -1.0, %v11489_v55  ;;  %v8291_v55 = vld [vmem:[%s14098_s7 + $0x1d0] sm:$0xff]  ;;  %v8369_v12 = vld [vmem:[%s14098_s7 + $0x440] sm:$0xff] }
 0x8e5   : > { %v8233_v62 = vadd.f32 -1.0, %v11491_v25  ;;  %v8294_v25 = vld [vmem:[%s14098_s7 + $0x1e8] sm:$0xff] }
 0x8e6   : > { %10601 = vmatpush3.bf16.msra.mxu1 %v10600_v61  ;;  %v8331_v61 = vld [vmem:[%s14098_s7 + $0x310] sm:$0xff]  ;;  %v5959_v47 = vsel %vm5879_vm4, %v13213_v32, %v8237_v13  ;;  %v13345_v32 = vadd.f32 %v13173_v39, %v5812_v1  ;;  %v10663_v60 = vpack.c.bf16 %v8294_v25, %v8293_v31 }
 0x8e7   : > { %10676 = vmatpush3.bf16.msra.mxu0 %v10675_v36  ;;  %10602 = vmatprep.subr.bf16.mxu1 %v11527_v42  ;;  %v8332_v36 = vld [vmem:[%s14098_s7 + $0x318] sm:$0xff]  ;;  %v5955_v27 = vsel %vm5875_vm5, %v13228_v15, %v8233_v62  ;;  %v13360_v15 = vadd.f32 %v13171_v40, %v5797_v24  ;;  %v8335_v40 = vld [vmem:[%s14098_s7 + $0x330] sm:$0xff] }
 0x8e8   : > { %10677 = vmatprep.subr.bf16.mxu0 %v11527_v42  ;;  %v10720_v17 = vpack.c.bf16 %v8332_v36, %v8331_v61  ;;  %v10726_v44 = vpack.c.bf16 %v8336_v53, %v8335_v40  ;;  %v8343_v13 = vld [vmem:[%s14098_s7 + $0x370] sm:$0xff]  ;;  %v8296_v61 = vld [vmem:[%s14098_s7 + $0x1f8] sm:$0xff]  ;;  %v8361_v36 = vld [vmem:[%s14098_s7 + $0x400] sm:$0xff]  ;;  %vm5881_vm6 = vcmp.gt.f32.partialorder %v13345_v32, 0.0 }
 0x8e9   : > { %v5894_v3 = vmin.f32 %v13360_v15, 0.0  ;;  %v8295_v62 = vld [vmem:[%s14098_s7 + $0x1f0] sm:$0xff]  ;;  %v8364_v24 = vld [vmem:[%s14098_s7 + $0x418] sm:$0xff]  ;;  %vm5878_vm7 = vcmp.gt.f32.partialorder %v13360_v15, 0.0 }
 0x8ea   : > { %10604 = vmatpush3.bf16.msra.mxu1 %v10603_v7  ;;  %v8284_v7 = vld [vmem:[%s14098_s7 + $0x198] sm:$0xff] }
 0x8eb   : > { %10679 = vmatpush3.bf16.msra.mxu0 %v10678_v37  ;;  %10605 = vmatprep.subr.bf16.mxu1 %v11527_v42  ;;  %v8333_v37 = vld [vmem:[%s14098_s7 + $0x320] sm:$0xff]  ;;  %v10648_v39 = vpack.c.bf16 %v8284_v7, %v8283_v26  ;;  %v5913_v11 = vmul.f32 1.442695, %v5894_v3  ;;  %v8316_v40 = vld [vmem:[%s14098_s7 + $0x298] sm:$0xff]  ;;  %v8366_v3 = vld [vmem:[%s14098_s7 + $0x428] sm:$0xff] }
 0x8ec   : > { %10680 = vmatprep.subr.bf16.mxu0 %v11527_v42  ;;  %v10723_v50 = vpack.c.bf16 %v8334_v10, %v8333_v37  ;;  %v8313_v7 = vld [vmem:[%s14098_s7 + $0x280] sm:$0xff]  ;;  %v8363_v10 = vld [vmem:[%s14098_s7 + $0x410] sm:$0xff] }
 0x8ee   : > { %10607 = vmatpush3.bf16.msra.mxu1 %v10606_v19  ;;  %v5897_v19 = vmin.f32 %v13345_v32, 0.0 }
 0x8ef   : > { %10682 = vmatpush3.bf16.msra.mxu0 %v10681_v35  ;;  %10608 = vmatprep.subr.bf16.mxu1 %v11527_v42  ;;  %v10651_v35 = vpack.c.bf16 %v8286_v54, %v8285_v38  ;;  %v5822_v38 = vpop.permute.xlu0 %5821  ;;  %v10768_v54 = vpack.c.bf16 %v8364_v24, %v8363_v10  ;;  %v8394_v10 = vld [vmem:[%s14098_s7 + $0x508] sm:$0xff] }
 0x8f0   : > { %10683 = vmatprep.subr.bf16.mxu0 %v11527_v42 }
 0x8f2   : > { %10610 = vmatpush3.bf16.msra.mxu1 %v10609_v63  ;;  %v5919_v63 = vmul.f32 1.442695, %v5897_v19  ;;  %v8315_v19 = vld [vmem:[%s14098_s7 + $0x290] sm:$0xff] }
 0x8f3   : > { %10685 = vmatpush3.bf16.msra.mxu0 %v10684_v5  ;;  %10611 = vmatprep.subr.bf16.mxu1 %v11527_v42  ;;  %v8337_v5 = vld [vmem:[%s14098_s7 + $0x340] sm:$0xff] }
 0x8f4   : > { %10686 = vmatprep.subr.bf16.mxu0 %v11527_v42  ;;  %v10729_v48 = vpack.c.bf16 %v8338_v21, %v8337_v5  ;;  %11492 = vpow2.f32 %v5919_v63  ;;  %v8318_v63 = vld [vmem:[%s14098_s7 + $0x2a8] sm:$0xff]  ;;  %v8368_v21 = vld [vmem:[%s14098_s7 + $0x438] sm:$0xff] }
 0x8f5   : > { %11494 = vpow2.f32 %v5913_v11 }
 0x8f6   : > { %10613 = vmatpush3.bf16.msra.mxu1 %v10612_v34  ;;  %v8289_v34 = vld [vmem:[%s14098_s7 + $0x1c0] sm:$0xff] }
 0x8f7   : > { %10688 = vmatpush3.bf16.msra.mxu0 %v10687_v43  ;;  %10614 = vmatprep.subr.bf16.mxu1 %v11527_v42  ;;  %v8290_v43 = vld [vmem:[%s14098_s7 + $0x1c8] sm:$0xff] }
 0x8f8   : > { %10689 = vmatprep.subr.bf16.mxu0 %v11527_v42  ;;  %v10657_v57 = vpack.c.bf16 %v8290_v43, %v8289_v34  ;;  %v8319_v34 = vld [vmem:[%s14098_s7 + $0x2b0] sm:$0xff]  ;;  %v8320_v43 = vld [vmem:[%s14098_s7 + $0x2b8] sm:$0xff] }
 0x8fa   : > { %10616 = vmatpush3.bf16.msra.mxu1 %v10615_v18  ;;  %v8292_v18 = vld [vmem:[%s14098_s7 + $0x1d8] sm:$0xff] }
 0x8fb   : > { %10691 = vmatpush3.bf16.msra.mxu0 %v10690_v29  ;;  %10617 = vmatprep.subr.bf16.mxu1 %v11527_v42  ;;  %v8341_v29 = vld [vmem:[%s14098_s7 + $0x360] sm:$0xff]  ;;  %v10660_v45 = vpack.c.bf16 %v8292_v18, %v8291_v55 }
 0x8fc   : > { %10716 = vmatprep.subr.bf16.mxu0 %v11527_v42  ;;  %v10735_v58 = vpack.c.bf16 %v8342_v23, %v8341_v29  ;;  %v8321_v29 = vld [vmem:[%s14098_s7 + $0x2c0] sm:$0xff]  ;;  %v8322_v23 = vld [vmem:[%s14098_s7 + $0x2c8] sm:$0xff] }
 0x8fd   : > { %v10705_v31 = vpack.c.bf16 %v8322_v23, %v8321_v29  ;;  %v8401_v23 = vld [vmem:[%s14098_s7 + $0x540] sm:$0xff] }
 0x8fe   : > { %10619 = vmatpush3.bf16.msra.mxu1 %v10618_v20  ;;  %10185 = vmatmul.mubr.f32.vlgmr.msra.gmra.mrb[86].mxu0 %v5959_v47  ;;  %v8344_v20 = vld [vmem:[%s14098_s7 + $0x378] sm:$0xff]  ;;  %v8362_v47 = vld [vmem:[%s14098_s7 + $0x408] sm:$0xff] }
 0x8ff   : > { %10718 = vmatpush3.bf16.msra.mxu0 %v10717_v59  ;;  %10644 = vmatprep.subr.bf16.mxu1 %v11527_v42  ;;  %v11493_v59 = vpop.eup %11492  ;;  %v10738_v46 = vpack.c.bf16 %v8344_v20, %v8343_v13  ;;  %v10765_v26 = vpack.c.bf16 %v8362_v47, %v8361_v36  ;;  %v8323_v13 = vld [vmem:[%s14098_s7 + $0x2d0] sm:$0xff]  ;;  %v8324_v20 = vld [vmem:[%s14098_s7 + $0x2d8] sm:$0xff]  ;;  %v8326_v36 = vld [vmem:[%s14098_s7 + $0x2e8] sm:$0xff] }
 0x900   : > { %10719 = vmatprep.subr.bf16.mxu0 %v11527_v42  ;;  %10254 = vmatprep.mubr.msk.f32.mxu0 %vm11528_vm1, %v11529_v52  ;;  %v8239_v1 = vadd.f32 -1.0, %v11493_v59  ;;  %v8373_v59 = vld [vmem:[%s14098_s7 + $0x460] sm:$0xff]  ;;  %v8375_v47 = vld [vmem:[%s14098_s7 + $0x470] sm:$0xff] }
 0x901   : > { %10080 = vmatmul.mubr.f32.vlgmr.msra.gmra.mrb[190].mxu1 %v5955_v27  ;;  %v8314_v27 = vld [vmem:[%s14098_s7 + $0x288] sm:$0xff] }
 0x902   : > { %10646 = vmatpush3.bf16.msra.mxu1 %v10645_v30  ;;  %10149 = vmatprep.mubr.msk.f32.mxu1 %vm11528_vm1, %v11529_v52  ;;  %v11495_v30 = vpop.eup %11494 }
 0x903   : > { %10721 = vmatpush3.bf16.msra.mxu0 %v10720_v17  ;;  %10647 = vmatprep.subr.bf16.mxu1 %v11527_v42  ;;  %v10666_v17 = vpack.c.bf16 %v8296_v61, %v8295_v62  ;;  %v8236_v37 = vadd.f32 -1.0, %v11495_v30  ;;  %v8325_v61 = vld [vmem:[%s14098_s7 + $0x2e0] sm:$0xff]  ;;  %v8376_v30 = vld [vmem:[%s14098_s7 + $0x478] sm:$0xff] }
 0x904   : > { %10722 = vmatprep.subr.bf16.mxu0 %v11527_v42 }
 0x905   : > { %v5958_v53 = vsel %vm5878_vm7, %v13360_v15, %v8236_v37  ;;  %v8393_v37 = vld [vmem:[%s14098_s7 + $0x500] sm:$0xff] }
 0x906   : > { %10649 = vmatpush3.bf16.msra.mxu1 %v10648_v39  ;;  %v5961_v39 = vsel %vm5881_vm6, %v13345_v32, %v8239_v1  ;;  %v13473_v32 = vadd.f32 %v5822_v38, %v13187_v8  ;;  %v10696_v8 = vpack.c.bf16 %v8316_v40, %v8315_v19  ;;  %v10813_v38 = vpack.c.bf16 %v8394_v10, %v8393_v37  ;;  %v8346_v19 = vld [vmem:[%s14098_s7 + $0x388] sm:$0xff]  ;;  %v8408_v37 = vld [vmem:[%s14098_s7 + $0x578] sm:$0xff] }
 0x907   : > { %10724 = vmatpush3.bf16.msra.mxu0 %v10723_v50  ;;  %10650 = vmatprep.subr.bf16.mxu1 %v11527_v42  ;;  %v10693_v50 = vpack.c.bf16 %v8314_v27, %v8313_v7  ;;  %v8327_v7 = vld [vmem:[%s14098_s7 + $0x2f0] sm:$0xff]  ;;  %v8328_v27 = vld [vmem:[%s14098_s7 + $0x2f8] sm:$0xff] }
 0x908   : > { %10725 = vmatprep.subr.bf16.mxu0 %v11527_v42  ;;  %v5899_v5 = vmin.f32 %v13473_v32, 0.0  ;;  %vm5883_vm8 = vcmp.gt.f32.partialorder %v13473_v32, 0.0 }
 0x90a   : > { %10652 = vmatpush3.bf16.msra.mxu1 %v10651_v35  ;;  %v8365_v35 = vld [vmem:[%s14098_s7 + $0x420] sm:$0xff]  ;;  %v5923_v16 = vmul.f32 1.442695, %v5899_v5 }
 0x90b   : > { %10727 = vmatpush3.bf16.msra.mxu0 %v10726_v44  ;;  %10653 = vmatprep.subr.bf16.mxu1 %v11527_v42  ;;  %v5807_v44 = vpop.permute.xlu1 %5806  ;;  %v10771_v14 = vpack.c.bf16 %v8366_v3, %v8365_v35  ;;  %v8396_v35 = vld [vmem:[%s14098_s7 + $0x518] sm:$0xff] }
 0x90c   : > { %10728 = vmatprep.subr.bf16.mxu0 %v11527_v42  ;;  %v13488_v15 = vadd.f32 %v5807_v44, %v13177_v9  ;;  %v8367_v9 = vld [vmem:[%s14098_s7 + $0x430] sm:$0xff]  ;;  %11496 = vpow2.f32 %v5923_v16  ;;  %v8400_v16 = vld [vmem:[%s14098_s7 + $0x538] sm:$0xff] }
 0x90e   : > { %10655 = vmatpush3.bf16.msra.mxu1 %v10654_v6  ;;  %v10699_v6 = vpack.c.bf16 %v8318_v63, %v8317_v51  ;;  %v5896_v11 = vmin.f32 %v13488_v15, 0.0  ;;  %vm5880_vm9 = vcmp.gt.f32.partialorder %v13488_v15, 0.0  ;;  %v8347_v51 = vld [vmem:[%s14098_s7 + $0x390] sm:$0xff]  ;;  %v8348_v63 = vld [vmem:[%s14098_s7 + $0x398] sm:$0xff] }
 0x90f   : > { %10730 = vmatpush3.bf16.msra.mxu0 %v10729_v48  ;;  %10656 = vmatprep.subr.bf16.mxu1 %v11527_v42  ;;  %v10774_v48 = vpack.c.bf16 %v8368_v21, %v8367_v9  ;;  %v8397_v9 = vld [vmem:[%s14098_s7 + $0x520] sm:$0xff]  ;;  %v8398_v21 = vld [vmem:[%s14098_s7 + $0x528] sm:$0xff] }
 0x910   : > { %10731 = vmatprep.subr.bf16.mxu0 %v11527_v42  ;;  %v5917_v55 = vmul.f32 1.442695, %v5896_v11  ;;  %v10819_v11 = vpack.c.bf16 %v8398_v21, %v8397_v9 }
 0x912   : > { %10658 = vmatpush3.bf16.msra.mxu1 %v10657_v57  ;;  %v8370_v57 = vld [vmem:[%s14098_s7 + $0x448] sm:$0xff]  ;;  %11498 = vpow2.f32 %v5917_v55  ;;  %v8351_v55 = vld [vmem:[%s14098_s7 + $0x3b0] sm:$0xff] }
 0x913   : > { %10733 = vmatpush3.bf16.msra.mxu0 %v10732_v28  ;;  %10659 = vmatprep.subr.bf16.mxu1 %v11527_v42  ;;  %v10702_v28 = vpack.c.bf16 %v8320_v43, %v8319_v34  ;;  %v10777_v18 = vpack.c.bf16 %v8370_v57, %v8369_v12  ;;  %v8350_v34 = vld [vmem:[%s14098_s7 + $0x3a8] sm:$0xff] }
 0x914   : > { %10734 = vmatprep.subr.bf16.mxu0 %v11527_v42 }
 0x916   : > { %10661 = vmatpush3.bf16.msra.mxu1 %v10660_v45  ;;  %v8371_v45 = vld [vmem:[%s14098_s7 + $0x450] sm:$0xff]  ;;  %v11497_v1 = vpop.eup %11496 }
 0x917   : > { %10736 = vmatpush3.bf16.msra.mxu0 %v10735_v58  ;;  %10662 = vmatprep.subr.bf16.mxu1 %v11527_v42  ;;  %v8372_v58 = vld [vmem:[%s14098_s7 + $0x458] sm:$0xff] }
 0x918   : > { %10737 = vmatprep.subr.bf16.mxu0 %v11527_v42  ;;  %v10780_v25 = vpack.c.bf16 %v8372_v58, %v8371_v45  ;;  %v8402_v45 = vld [vmem:[%s14098_s7 + $0x548] sm:$0xff] }
 0x91a   : > { %10664 = vmatpush3.bf16.msra.mxu1 %v10663_v60  ;;  %v8374_v60 = vld [vmem:[%s14098_s7 + $0x468] sm:$0xff] }
 0x91b   : > { %10739 = vmatpush3.bf16.msra.mxu0 %v10738_v46  ;;  %10665 = vmatprep.subr.bf16.mxu1 %v11527_v42  ;;  %v10708_v46 = vpack.c.bf16 %v8324_v20, %v8323_v13  ;;  %v10783_v62 = vpack.c.bf16 %v8374_v60, %v8373_v59  ;;  %v8353_v13 = vld [vmem:[%s14098_s7 + $0x3c0] sm:$0xff]  ;;  %v8354_v20 = vld [vmem:[%s14098_s7 + $0x3c8] sm:$0xff]  ;;  %v8403_v59 = vld [vmem:[%s14098_s7 + $0x550] sm:$0xff] }
 0x91c   : > { %10764 = vmatprep.subr.bf16.mxu0 %v11527_v42  ;;  %v11499_v24 = vpop.eup %11498  ;;  %v8404_v60 = vld [vmem:[%s14098_s7 + $0x558] sm:$0xff] }
 0x91d   : > { %v8238_v40 = vadd.f32 -1.0, %v11499_v24 }
 0x91e   : > { %10667 = vmatpush3.bf16.msra.mxu1 %v10666_v17  ;;  %10255 = vmatmul.mubr.f32.vlgmr.msra.gmra.mrb[88].mxu0 %v5961_v39  ;;  %v10711_v17 = vpack.c.bf16 %v8326_v36, %v8325_v61  ;;  %v8241_v39 = vadd.f32 -1.0, %v11497_v1  ;;  %v8355_v61 = vld [vmem:[%s14098_s7 + $0x3d0] sm:$0xff]  ;;  %v8356_v36 = vld [vmem:[%s14098_s7 + $0x3d8] sm:$0xff] }
 0x91f   : > { %10766 = vmatpush3.bf16.msra.mxu0 %v10765_v26  ;;  %10692 = vmatprep.subr.bf16.mxu1 %v11527_v42  ;;  %v10786_v26 = vpack.c.bf16 %v8376_v30, %v8375_v47  ;;  %v5960_v5 = vsel %vm5880_vm9, %v13488_v15, %v8238_v40  ;;  %v8405_v47 = vld [vmem:[%s14098_s7 + $0x560] sm:$0xff]  ;;  %v8406_v30 = vld [vmem:[%s14098_s7 + $0x568] sm:$0xff]  ;;  %v10756_v1 = vpack.c.bf16 %v8356_v36, %v8355_v61  ;;  %v8435_v61 = vld [vmem:[%s14098_s7 + $0x650] sm:$0xff] }
 0x920   : > { %10767 = vmatprep.subr.bf16.mxu0 %v11527_v42  ;;  %10324 = vmatprep.mubr.msk.f32.mxu0 %vm11528_vm1, %v11529_v52  ;;  %v5963_v3 = vsel %vm5883_vm8, %v13473_v32, %v8241_v39  ;;  %v8436_v36 = vld [vmem:[%s14098_s7 + $0x658] sm:$0xff] }
 0x921   : > { %10150 = vmatmul.mubr.f32.vlgmr.msra.gmra.mrb[192].mxu1 %v5958_v53  ;;  %v8395_v53 = vld [vmem:[%s14098_s7 + $0x510] sm:$0xff] }
 0x922   : > { %10694 = vmatpush3.bf16.msra.mxu1 %v10693_v50  ;;  %10219 = vmatprep.mubr.msk.f32.mxu1 %vm11528_vm1, %v11529_v52  ;;  %v10714_v50 = vpack.c.bf16 %v8328_v27, %v8327_v7  ;;  %v8358_v7 = vld [vmem:[%s14098_s7 + $0x3e8] sm:$0xff]  ;;  %v8407_v27 = vld [vmem:[%s14098_s7 + $0x570] sm:$0xff] }
 0x923   : > { %10769 = vmatpush3.bf16.msra.mxu0 %v10768_v54  ;;  %10695 = vmatprep.subr.bf16.mxu1 %v11527_v42  ;;  %v8345_v54 = vld [vmem:[%s14098_s7 + $0x380] sm:$0xff]  ;;  %v10834_v39 = vpack.c.bf16 %v8408_v37, %v8407_v27 }
 0x924   : > { %10770 = vmatprep.subr.bf16.mxu0 %v11527_v42  ;;  %v10741_v44 = vpack.c.bf16 %v8346_v19, %v8345_v54  ;;  %v8425_v54 = vld [vmem:[%s14098_s7 + $0x600] sm:$0xff]  ;;  %v8426_v19 = vld [vmem:[%s14098_s7 + $0x608] sm:$0xff] }
 0x926   : > { %10697 = vmatpush3.bf16.msra.mxu1 %v10696_v8  ;;  %v5832_v8 = vpop.permute.xlu0 %5831 }
 0x927   : > { %10772 = vmatpush3.bf16.msra.mxu0 %v10771_v14  ;;  %10698 = vmatprep.subr.bf16.mxu1 %v11527_v42  ;;  %v10816_v14 = vpack.c.bf16 %v8396_v35, %v8395_v53  ;;  %v13601_v32 = vadd.f32 %v13185_v56, %v5832_v8  ;;  %v10744_v56 = vpack.c.bf16 %v8348_v63, %v8347_v51  ;;  %v8378_v8 = vld [vmem:[%s14098_s7 + $0x488] sm:$0xff]  ;;  %v8427_v51 = vld [vmem:[%s14098_s7 + $0x610] sm:$0xff]  ;;  %v8428_v63 = vld [vmem:[%s14098_s7 + $0x618] sm:$0xff] }
 0x928   : > { %10773 = vmatprep.subr.bf16.mxu0 %v11527_v42 }
 0x929   : > { %v5901_v43 = vmin.f32 %v13601_v32, 0.0  ;;  %vm5885_vm10 = vcmp.gt.f32.partialorder %v13601_v32, 0.0 }
 0x92a   : > { %10700 = vmatpush3.bf16.msra.mxu1 %v10699_v6  ;;  %v5817_v6 = vpop.permute.xlu1 %5816  ;;  %v5842_v21 = vpop.permute.xlu0 %5841 }
 0x92b   : > { %10775 = vmatpush3.bf16.msra.mxu0 %v10774_v48  ;;  %10701 = vmatprep.subr.bf16.mxu1 %v11527_v42  ;;  %v13616_v15 = vadd.f32 %v13175_v2, %v5817_v6  ;;  %v8349_v48 = vld [vmem:[%s14098_s7 + $0x3a0] sm:$0xff]  ;;  %v8399_v2 = vld [vmem:[%s14098_s7 + $0x530] sm:$0xff]  ;;  %v5927_v29 = vmul.f32 1.442695, %v5901_v43  ;;  %v10864_v6 = vpack.c.bf16 %v8428_v63, %v8427_v51  ;;  %v8430_v43 = vld [vmem:[%s14098_s7 + $0x628] sm:$0xff] }
 0x92c   : > { %10776 = vmatprep.subr.bf16.mxu0 %v11527_v42  ;;  %v10747_v12 = vpack.c.bf16 %v8350_v34, %v8349_v48  ;;  %v8429_v34 = vld [vmem:[%s14098_s7 + $0x620] sm:$0xff] }
 0x92d   : > { %v5898_v57 = vmin.f32 %v13616_v15, 0.0  ;;  %11500 = vpow2.f32 %v5927_v29  ;;  %vm5882_vm11 = vcmp.gt.f32.partialorder %v13616_v15, 0.0  ;;  %v8409_v63 = vld [vmem:[%s14098_s7 + $0x580] sm:$0xff] }
 0x92e   : > { %10703 = vmatpush3.bf16.msra.mxu1 %v10702_v28  ;;  %v10822_v28 = vpack.c.bf16 %v8400_v16, %v8399_v2  ;;  %v5827_v2 = vpop.permute.xlu1 %5826  ;;  %v10867_v16 = vpack.c.bf16 %v8430_v43, %v8429_v34  ;;  %v8411_v43 = vld [vmem:[%s14098_s7 + $0x590] sm:$0xff] }
 0x92f   : > { %10778 = vmatpush3.bf16.msra.mxu0 %v10777_v18  ;;  %10704 = vmatprep.subr.bf16.mxu1 %v11527_v42  ;;  %v8352_v18 = vld [vmem:[%s14098_s7 + $0x3b8] sm:$0xff] }
 0x930   : > { %10779 = vmatprep.subr.bf16.mxu0 %v11527_v42  ;;  %v10750_v58 = vpack.c.bf16 %v8352_v18, %v8351_v55  ;;  %v8432_v55 = vld [vmem:[%s14098_s7 + $0x638] sm:$0xff] }
 0x932   : > { %10706 = vmatpush3.bf16.msra.mxu1 %v10705_v31  ;;  %v5921_v31 = vmul.f32 1.442695, %v5898_v57  ;;  %v8382_v57 = vld [vmem:[%s14098_s7 + $0x4a8] sm:$0xff] }
 0x933   : > { %10781 = vmatpush3.bf16.msra.mxu0 %v10780_v25  ;;  %10707 = vmatprep.subr.bf16.mxu1 %v11527_v42  ;;  %v10825_v25 = vpack.c.bf16 %v8402_v45, %v8401_v23  ;;  %v8383_v45 = vld [vmem:[%s14098_s7 + $0x4b0] sm:$0xff] }
 0x934   : > { %10782 = vmatprep.subr.bf16.mxu0 %v11527_v42  ;;  %11502 = vpow2.f32 %v5921_v31 }
 0x936   : > { %10709 = vmatpush3.bf16.msra.mxu1 %v10708_v46  ;;  %v10753_v46 = vpack.c.bf16 %v8354_v20, %v8353_v13  ;;  %v8434_v13 = vld [vmem:[%s14098_s7 + $0x648] sm:$0xff] }
 0x937   : > { %10784 = vmatpush3.bf16.msra.mxu0 %v10783_v62  ;;  %10710 = vmatprep.subr.bf16.mxu1 %v11527_v42  ;;  %v10828_v62 = vpack.c.bf16 %v8404_v60, %v8403_v59  ;;  %v11501_v10 = vpop.eup %11500 }
 0x938   : > { %10785 = vmatprep.subr.bf16.mxu0 %v11527_v42  ;;  %v8243_v53 = vadd.f32 -1.0, %v11501_v10  ;;  %v8389_v10 = vld [vmem:[%s14098_s7 + $0x4e0] sm:$0xff] }
 0x93a   : > { %10712 = vmatpush3.bf16.msra.mxu1 %v10711_v17  ;;  %v10831_v17 = vpack.c.bf16 %v8406_v30, %v8405_v47  ;;  %v10876_v30 = vpack.c.bf16 %v8436_v36, %v8435_v61  ;;  %v8417_v61 = vld [vmem:[%s14098_s7 + $0x5c0] sm:$0xff]  ;;  %v8418_v36 = vld [vmem:[%s14098_s7 + $0x5c8] sm:$0xff] }
 0x93b   : > { %10787 = vmatpush3.bf16.msra.mxu0 %v10786_v26  ;;  %10713 = vmatprep.subr.bf16.mxu1 %v11527_v42  ;;  %v8357_v26 = vld [vmem:[%s14098_s7 + $0x3e0] sm:$0xff] }
 0x93c   : > { %10812 = vmatprep.subr.bf16.mxu0 %v11527_v42  ;;  %v10759_v24 = vpack.c.bf16 %v8358_v7, %v8357_v26  ;;  %v8437_v26 = vld [vmem:[%s14098_s7 + $0x660] sm:$0xff]  ;;  %v8438_v7 = vld [vmem:[%s14098_s7 + $0x668] sm:$0xff] }
 0x93d   : > { %v10879_v37 = vpack.c.bf16 %v8438_v7, %v8437_v26  ;;  %v8419_v26 = vld [vmem:[%s14098_s7 + $0x5d0] sm:$0xff]  ;;  %v8420_v7 = vld [vmem:[%s14098_s7 + $0x5d8] sm:$0xff] }
 0x93e   : > { %10715 = vmatpush3.bf16.msra.mxu1 %v10714_v50  ;;  %10325 = vmatmul.mubr.f32.vlgmr.msra.gmra.mrb[90].mxu0 %v5963_v3  ;;  %v8359_v50 = vld [vmem:[%s14098_s7 + $0x3f0] sm:$0xff]  ;;  %v11503_v40 = vpop.eup %11502  ;;  %v10861_v3 = vpack.c.bf16 %v8426_v19, %v8425_v54 }
 0x93f   : > { %10814 = vmatpush3.bf16.msra.mxu0 %v10813_v38  ;;  %10740 = vmatprep.subr.bf16.mxu1 %v11527_v42  ;;  %v8360_v38 = vld [vmem:[%s14098_s7 + $0x3f8] sm:$0xff] }
 0x940   : > { %10815 = vmatprep.subr.bf16.mxu0 %v11527_v42  ;;  %10394 = vmatprep.mubr.msk.f32.mxu0 %vm11528_vm1, %v11529_v52  ;;  %v10762_v35 = vpack.c.bf16 %v8360_v38, %v8359_v50  ;;  %v8440_v50 = vld [vmem:[%s14098_s7 + $0x678] sm:$0xff] }
 0x941   : > { %10220 = vmatmul.mubr.f32.vlgmr.msra.gmra.mrb[194].mxu1 %v5960_v5  ;;  %v5965_v5 = vsel %vm5885_vm10, %v13601_v32, %v8243_v53  ;;  %v13729_v32 = vadd.f32 %v5842_v21, %v13224_v4  ;;  %v8392_v53 = vld [vmem:[%s14098_s7 + $0x4f8] sm:$0xff]  ;;  %v8459_v21 = vld [vmem:[%s14098_s7 + $0x710] sm:$0xff] }
 0x942   : > { %10742 = vmatpush3.bf16.msra.mxu1 %v10741_v44  ;;  %10289 = vmatprep.mubr.msk.f32.mxu1 %vm11528_vm1, %v11529_v52  ;;  %v8377_v44 = vld [vmem:[%s14098_s7 + $0x480] sm:$0xff] }
 0x943   : > { %10817 = vmatpush3.bf16.msra.mxu0 %v10816_v14  ;;  %10743 = vmatprep.subr.bf16.mxu1 %v11527_v42  ;;  %v8240_v14 = vadd.f32 -1.0, %v11503_v40  ;;  %v10789_v9 = vpack.c.bf16 %v8378_v8, %v8377_v44  ;;  %v8391_v40 = vld [vmem:[%s14098_s7 + $0x4f0] sm:$0xff]  ;;  %vm5887_vm12 = vcmp.gt.f32.partialorder %v13729_v32, 0.0 }
 0x944   : > { %10818 = vmatprep.subr.bf16.mxu0 %v11527_v42 }
 0x945   : > { %v5962_v48 = vsel %vm5882_vm11, %v13616_v15, %v8240_v14  ;;  %v13744_v15 = vadd.f32 %v5827_v2, %v13197_v41  ;;  %v8431_v41 = vld [vmem:[%s14098_s7 + $0x630] sm:$0xff]  ;;  %v10810_v14 = vpack.c.bf16 %v8392_v53, %v8391_v40  ;;  %v8412_v2 = vld [vmem:[%s14098_s7 + $0x598] sm:$0xff] }
 0x946   : > { %10745 = vmatpush3.bf16.msra.mxu1 %v10744_v56  ;;  %v8379_v56 = vld [vmem:[%s14098_s7 + $0x490] sm:$0xff]  ;;  %v10870_v23 = vpack.c.bf16 %v8432_v55, %v8431_v41  ;;  %v8413_v41 = vld [vmem:[%s14098_s7 + $0x5a0] sm:$0xff]  ;;  %v8414_v55 = vld [vmem:[%s14098_s7 + $0x5a8] sm:$0xff] }
 0x947   : > { %10820 = vmatpush3.bf16.msra.mxu0 %v10819_v11  ;;  %10746 = vmatprep.subr.bf16.mxu1 %v11527_v42  ;;  %v8380_v11 = vld [vmem:[%s14098_s7 + $0x498] sm:$0xff]  ;;  %v5900_v29 = vmin.f32 %v13744_v15, 0.0  ;;  %vm5884_vm13 = vcmp.gt.f32.partialorder %v13744_v15, 0.0 }
 0x948   : > { %10821 = vmatprep.subr.bf16.mxu0 %v11527_v42  ;;  %v10792_v4 = vpack.c.bf16 %v8380_v11, %v8379_v56 }
 0x949   : > { %v5925_v59 = vmul.f32 1.442695, %v5900_v29  ;;  %v8464_v29 = vld [vmem:[%s14098_s7 + $0x738] sm:$0xff] }
 0x94a   : > { %10748 = vmatpush3.bf16.msra.mxu1 %v10747_v12  ;;  %v8381_v12 = vld [vmem:[%s14098_s7 + $0x4a0] sm:$0xff] }
 0x94b   : > { %10823 = vmatpush3.bf16.msra.mxu0 %v10822_v28  ;;  %10749 = vmatprep.subr.bf16.mxu1 %v11527_v42  ;;  %v5903_v28 = vmin.f32 %v13729_v32, 0.0  ;;  %v10795_v18 = vpack.c.bf16 %v8382_v57, %v8381_v12  ;;  %v8462_v12 = vld [vmem:[%s14098_s7 + $0x728] sm:$0xff]  ;;  %v5837_v57 = vpop.permute.xlu1 %5836 }
 0x94c   : > { %10824 = vmatprep.subr.bf16.mxu0 %v11527_v42 }
 0x94d   : > { %v5931_v31 = vmul.f32 1.442695, %v5903_v28 }
 0x94e   : > { %10751 = vmatpush3.bf16.msra.mxu1 %v10750_v58  ;;  %v8384_v58 = vld [vmem:[%s14098_s7 + $0x4b8] sm:$0xff] }
 0x94f   : > { %10826 = vmatpush3.bf16.msra.mxu0 %v10825_v25  ;;  %10752 = vmatprep.subr.bf16.mxu1 %v11527_v42  ;;  %v8433_v25 = vld [vmem:[%s14098_s7 + $0x640] sm:$0xff]  ;;  %v10798_v20 = vpack.c.bf16 %v8384_v58, %v8383_v45  ;;  %11504 = vpow2.f32 %v5931_v31  ;;  %v8415_v31 = vld [vmem:[%s14098_s7 + $0x5b0] sm:$0xff] }
 0x950   : > { %10827 = vmatprep.subr.bf16.mxu0 %v11527_v42  ;;  %v10873_v60 = vpack.c.bf16 %v8434_v13, %v8433_v25  ;;  %11506 = vpow2.f32 %v5925_v59  ;;  %v8416_v25 = vld [vmem:[%s14098_s7 + $0x5b8] sm:$0xff]  ;;  %v8466_v59 = vld [vmem:[%s14098_s7 + $0x748] sm:$0xff] }
 0x952   : > { %10754 = vmatpush3.bf16.msra.mxu1 %v10753_v46  ;;  %v8385_v46 = vld [vmem:[%s14098_s7 + $0x4c0] sm:$0xff] }
 0x953   : > { %10829 = vmatpush3.bf16.msra.mxu0 %v10828_v62  ;;  %10755 = vmatprep.subr.bf16.mxu1 %v11527_v42  ;;  %v8386_v62 = vld [vmem:[%s14098_s7 + $0x4c8] sm:$0xff] }
 0x954   : > { %10830 = vmatprep.subr.bf16.mxu0 %v11527_v42  ;;  %v10801_v47 = vpack.c.bf16 %v8386_v62, %v8385_v46 }
 0x956   : > { %10757 = vmatpush3.bf16.msra.mxu1 %v10756_v1  ;;  %v8387_v1 = vld [vmem:[%s14098_s7 + $0x4d0] sm:$0xff] }
 0x957   : > { %10832 = vmatpush3.bf16.msra.mxu0 %v10831_v17  ;;  %10758 = vmatprep.subr.bf16.mxu1 %v11527_v42  ;;  %v8388_v17 = vld [vmem:[%s14098_s7 + $0x4d8] sm:$0xff] }
 0x958   : > { %10833 = vmatprep.subr.bf16.mxu0 %v11527_v42  ;;  %v10804_v27 = vpack.c.bf16 %v8388_v17, %v8387_v1  ;;  %v10849_v1 = vpack.c.bf16 %v8418_v36, %v8417_v61  ;;  %v8474_v61 = vld [vmem:[%s14098_s7 + $0x788] sm:$0xff] }
 0x959   : > { %v11505_v38 = vpop.eup %11504 }
 0x95a   : > { %10760 = vmatpush3.bf16.msra.mxu1 %v10759_v24  ;;  %v8390_v24 = vld [vmem:[%s14098_s7 + $0x4e8] sm:$0xff]  ;;  %v11507_v44 = vpop.eup %11506  ;;  %v8245_v8 = vadd.f32 -1.0, %v11505_v38  ;;  %v8471_v38 = vld [vmem:[%s14098_s7 + $0x770] sm:$0xff] }
 0x95b   : > { %10835 = vmatpush3.bf16.msra.mxu0 %v10834_v39  ;;  %10761 = vmatprep.subr.bf16.mxu1 %v11527_v42  ;;  %v8439_v39 = vld [vmem:[%s14098_s7 + $0x670] sm:$0xff]  ;;  %v10807_v54 = vpack.c.bf16 %v8390_v24, %v8389_v10  ;;  %v10852_v10 = vpack.c.bf16 %v8420_v7, %v8419_v26 }
 0x95c   : > { %10860 = vmatprep.subr.bf16.mxu0 %v11527_v42  ;;  %v10882_v19 = vpack.c.bf16 %v8440_v50, %v8439_v39  ;;  %v5967_v56 = vsel %vm5887_vm12, %v13729_v32, %v8245_v8  ;;  %v8421_v39 = vld [vmem:[%s14098_s7 + $0x5e0] sm:$0xff]  ;;  %v8422_v50 = vld [vmem:[%s14098_s7 + $0x5e8] sm:$0xff] }
 0x95d   : > { %v10855_v40 = vpack.c.bf16 %v8422_v50, %v8421_v39 }
 0x95e   : > { %10763 = vmatpush3.bf16.msra.mxu1 %v10762_v35  ;;  %10395 = vmatmul.mubr.f32.vlgmr.msra.gmra.mrb[92].mxu0 %v5965_v5  ;;  %v8457_v35 = vld [vmem:[%s14098_s7 + $0x700] sm:$0xff]  ;;  %v8410_v5 = vld [vmem:[%s14098_s7 + $0x588] sm:$0xff] }
 0x95f   : > { %10862 = vmatpush3.bf16.msra.mxu0 %v10861_v3  ;;  %10788 = vmatprep.subr.bf16.mxu1 %v11527_v42  ;;  %v8458_v3 = vld [vmem:[%s14098_s7 + $0x708] sm:$0xff]  ;;  %v10837_v11 = vpack.c.bf16 %v8410_v5, %v8409_v63 }
 0x960   : > { %10863 = vmatprep.subr.bf16.mxu0 %v11527_v42  ;;  %10464 = vmatprep.mubr.msk.f32.mxu0 %vm11528_vm1, %v11529_v52  ;;  %v10909_v51 = vpack.c.bf16 %v8458_v3, %v8457_v35  ;;  %v8423_v35 = vld [vmem:[%s14098_s7 + $0x5f0] sm:$0xff]  ;;  %v8424_v3 = vld [vmem:[%s14098_s7 + $0x5f8] sm:$0xff]  ;;  %v8442_v63 = vld [vmem:[%s14098_s7 + $0x688] sm:$0xff] }
 0x961   : > { %10290 = vmatmul.mubr.f32.vlgmr.msra.gmra.mrb[196].mxu1 %v5962_v48  ;;  %v5852_v48 = vpop.permute.xlu0 %5851 }
 0x962   : > { %10790 = vmatpush3.bf16.msra.mxu1 %v10789_v9  ;;  %10359 = vmatprep.mubr.msk.f32.mxu1 %vm11528_vm1, %v11529_v52  ;;  %v8242_v9 = vadd.f32 -1.0, %v11507_v44  ;;  %v13857_v32 = vadd.f32 %v13222_v33, %v5852_v48  ;;  %v10840_v33 = vpack.c.bf16 %v8412_v2, %v8411_v43  ;;  %v5847_v48 = vpop.permute.xlu1 %5846  ;;  %v8445_v2 = vld [vmem:[%s14098_s7 + $0x6a0] sm:$0xff] }
 0x963   : > { %10865 = vmatpush3.bf16.msra.mxu0 %v10864_v6  ;;  %10791 = vmatprep.subr.bf16.mxu1 %v11527_v42  ;;  %v8460_v6 = vld [vmem:[%s14098_s7 + $0x718] sm:$0xff]  ;;  %v5872_v43 = vadd.f32 %v5847_v48, %v13240_v49 }
 0x964   : > { %10866 = vmatprep.subr.bf16.mxu0 %v11527_v42  ;;  %v10912_v34 = vpack.c.bf16 %v8460_v6, %v8459_v21  ;;  %vm5889_vm14 = vcmp.gt.f32.partialorder %v13857_v32, 0.0  ;;  %v8443_v6 = vld [vmem:[%s14098_s7 + $0x690] sm:$0xff]  ;;  %v8448_v49 = vld [vmem:[%s14098_s7 + $0x6b8] sm:$0xff] }
 0x965   : > { %vm5888_vm0 = vcmp.gt.f32.partialorder %v5872_v43, 0.0 }
 0x966   : > { %10793 = vmatpush3.bf16.msra.mxu1 %v10792_v4  ;;  %v5964_v4 = vsel %vm5884_vm13, %v13744_v15, %v8242_v9  ;;  %v13872_v15 = vadd.f32 %v13189_v22, %v5837_v57  ;;  %v8463_v22 = vld [vmem:[%s14098_s7 + $0x730] sm:$0xff]  ;;  %v5857_v26 = vpop.permute.xlu1 %5856 }
 0x967   : > { %10868 = vmatpush3.bf16.msra.mxu0 %v10867_v16  ;;  %10794 = vmatprep.subr.bf16.mxu1 %v11527_v42  ;;  %v8461_v16 = vld [vmem:[%s14098_s7 + $0x720] sm:$0xff]  ;;  %v10918_v58 = vpack.c.bf16 %v8464_v29, %v8463_v22 }
 0x968   : > { %10869 = vmatprep.subr.bf16.mxu0 %v11527_v42  ;;  %v10915_v28 = vpack.c.bf16 %v8462_v12, %v8461_v16  ;;  %v5902_v45 = vmin.f32 %v13872_v15, 0.0  ;;  %vm5886_vm15 = vcmp.gt.f32.partialorder %v13872_v15, 0.0  ;;  %v5904_v16 = vmin.f32 %v5872_v43, 0.0  ;;  %v8447_v12 = vld [vmem:[%s14098_s7 + $0x6b0] sm:$0xff] }
 0x969   : > { %v10894_v57 = vpack.c.bf16 %v8448_v49, %v8447_v12 }
 0x96a   : > { %10796 = vmatpush3.bf16.msra.mxu1 %v10795_v18  ;;  %v5905_v18 = vmin.f32 %v13857_v32, 0.0  ;;  %v5929_v46 = vmul.f32 1.442695, %v5902_v45  ;;  %v8453_v45 = vld [vmem:[%s14098_s7 + $0x6e0] sm:$0xff] }
 0x96b   : > { %10871 = vmatpush3.bf16.msra.mxu0 %v10870_v23  ;;  %10797 = vmatprep.subr.bf16.mxu1 %v11527_v42  ;;  %v10843_v23 = vpack.c.bf16 %v8414_v55, %v8413_v41  ;;  %v8451_v55 = vld [vmem:[%s14098_s7 + $0x6d0] sm:$0xff] }
 0x96c   : > { %10872 = vmatprep.subr.bf16.mxu0 %v11527_v42  ;;  %v5935_v13 = vmul.f32 1.442695, %v5905_v18  ;;  %v8452_v18 = vld [vmem:[%s14098_s7 + $0x6d8] sm:$0xff] }
 0x96e   : > { %10799 = vmatpush3.bf16.msra.mxu1 %v10798_v20  ;;  %v8465_v20 = vld [vmem:[%s14098_s7 + $0x740] sm:$0xff]  ;;  %11508 = vpow2.f32 %v5935_v13 }
 0x96f   : > { %10874 = vmatpush3.bf16.msra.mxu0 %v10873_v60  ;;  %10800 = vmatprep.subr.bf16.mxu1 %v11527_v42  ;;  %v10846_v60 = vpack.c.bf16 %v8416_v25, %v8415_v31  ;;  %v10921_v62 = vpack.c.bf16 %v8466_v59, %v8465_v20  ;;  %11510 = vpow2.f32 %v5929_v46  ;;  %v8455_v20 = vld [vmem:[%s14098_s7 + $0x6f0] sm:$0xff]  ;;  %v8456_v59 = vld [vmem:[%s14098_s7 + $0x6f8] sm:$0xff] }
 0x970   : > { %10875 = vmatprep.subr.bf16.mxu0 %v11527_v42  ;;  %v10906_v46 = vpack.c.bf16 %v8456_v59, %v8455_v20 }
 0x972   : > { %10802 = vmatpush3.bf16.msra.mxu1 %v10801_v47  ;;  %v8467_v47 = vld [vmem:[%s14098_s7 + $0x750] sm:$0xff] }
 0x973   : > { %10877 = vmatpush3.bf16.msra.mxu0 %v10876_v30  ;;  %10803 = vmatprep.subr.bf16.mxu1 %v11527_v42  ;;  %v8468_v30 = vld [vmem:[%s14098_s7 + $0x758] sm:$0xff] }
 0x974   : > { %10878 = vmatprep.subr.bf16.mxu0 %v11527_v42  ;;  %v10924_v17 = vpack.c.bf16 %v8468_v30, %v8467_v47  ;;  %v8475_v30 = vld [vmem:[%s14098_s7 + $0x790] sm:$0xff] }
 0x976   : > { %10805 = vmatpush3.bf16.msra.mxu1 %v10804_v27  ;;  %v8469_v27 = vld [vmem:[%s14098_s7 + $0x760] sm:$0xff] }
 0x977   : > { %10880 = vmatpush3.bf16.msra.mxu0 %v10879_v37  ;;  %10806 = vmatprep.subr.bf16.mxu1 %v11527_v42  ;;  %v8470_v37 = vld [vmem:[%s14098_s7 + $0x768] sm:$0xff] }
 0x978   : > { %10881 = vmatprep.subr.bf16.mxu0 %v11527_v42  ;;  %v10927_v24 = vpack.c.bf16 %v8470_v37, %v8469_v27  ;;  %v5874_v27 = vadd.f32 %v13230_v0, %v5857_v26  ;;  %v8477_v37 = vld [vmem:[%s14098_s7 + $0x7a0] sm:$0xff]  ;;  %v8480_v0 = vld [vmem:[%s14098_s7 + $0x7b8] sm:$0xff] }
 0x97a   : > { %10808 = vmatpush3.bf16.msra.mxu1 %v10807_v54  ;;  %v8472_v54 = vld [vmem:[%s14098_s7 + $0x778] sm:$0xff]  ;;  %v5906_v39 = vmin.f32 %v5874_v27, 0.0 }
 0x97b   : > { %10883 = vmatpush3.bf16.msra.mxu0 %v10882_v19  ;;  %10809 = vmatprep.subr.bf16.mxu1 %v11527_v42  ;;  %v11509_v19 = vpop.eup %11508  ;;  %v10930_v53 = vpack.c.bf16 %v8472_v54, %v8471_v38  ;;  %v8481_v54 = vld [vmem:[%s14098_s7 + $0x7c0] sm:$0xff] }
 0x97c   : > { %10908 = vmatprep.subr.bf16.mxu0 %v11527_v42  ;;  %v11511_v44 = vpop.eup %11510  ;;  %v8247_v8 = vadd.f32 -1.0, %v11509_v19  ;;  %v5937_v38 = vmul.f32 1.442695, %v5906_v39  ;;  %v8482_v19 = vld [vmem:[%s14098_s7 + $0x7c8] sm:$0xff] }
 0x97d   : > { %v8244_v5 = vadd.f32 -1.0, %v11511_v44 }
 0x97e   : > { %10811 = vmatpush3.bf16.msra.mxu1 %v10810_v14  ;;  %10465 = vmatmul.mubr.f32.vlgmr.msra.gmra.mrb[94].mxu0 %v5967_v56  ;;  %v10858_v14 = vpack.c.bf16 %v8424_v3, %v8423_v35  ;;  %v5969_v9 = vsel %vm5889_vm14, %v13857_v32, %v8247_v8  ;;  %v8444_v56 = vld [vmem:[%s14098_s7 + $0x698] sm:$0xff]  ;;  %v8446_v32 = vld [vmem:[%s14098_s7 + $0x6a8] sm:$0xff] }
 0x97f   : > { %10910 = vmatpush3.bf16.msra.mxu0 %v10909_v51  ;;  %10836 = vmatprep.subr.bf16.mxu1 %v11527_v42  ;;  %v8441_v51 = vld [vmem:[%s14098_s7 + $0x680] sm:$0xff]  ;;  %v8484_v35 = vld [vmem:[%s14098_s7 + $0x7d8] sm:$0xff] }
 0x980   : > { %10911 = vmatprep.subr.bf16.mxu0 %v11527_v42  ;;  %10534 = vmatprep.mubr.msk.f32.mxu0 %vm11528_vm1, %v11529_v52  ;;  %v10885_v21 = vpack.c.bf16 %v8442_v63, %v8441_v51  ;;  %v8486_v51 = vld [vmem:[%s14098_s7 + $0x7e8] sm:$0xff] }
 0x981   : > { %10360 = vmatmul.mubr.f32.vlgmr.msra.gmra.mrb[198].mxu1 %v5964_v4  ;;  %v10891_v4 = vpack.c.bf16 %v8446_v32, %v8445_v2 }
 0x982   : > { %10838 = vmatpush3.bf16.msra.mxu1 %v10837_v11  ;;  %10429 = vmatprep.mubr.msk.f32.mxu1 %vm11528_vm1, %v11529_v52  ;;  %v5966_v11 = vsel %vm5886_vm15, %v13872_v15, %v8244_v5  ;;  %v8449_v15 = vld [vmem:[%s14098_s7 + $0x6c0] sm:$0xff] }
 0x983   : > { %10913 = vmatpush3.bf16.msra.mxu0 %v10912_v34  ;;  %10839 = vmatprep.subr.bf16.mxu1 %v11527_v42  ;;  %v10888_v34 = vpack.c.bf16 %v8444_v56, %v8443_v6  ;;  %v8487_v6 = vld [vmem:[%s14098_s7 + $0x7f0] sm:$0xff]  ;;  %v8488_v56 = vld [vmem:[%s14098_s7 + $0x7f8] sm:$0xff] }
 0x984   : > { %10914 = vmatprep.subr.bf16.mxu0 %v11527_v42 }
 0x986   : > { %10841 = vmatpush3.bf16.msra.mxu1 %v10840_v33  ;;  %v5933_v33 = vmul.f32 1.442695, %v5904_v16 }
 0x987   : > { %10916 = vmatpush3.bf16.msra.mxu0 %v10915_v28  ;;  %10842 = vmatprep.subr.bf16.mxu1 %v11527_v42  ;;  %v8450_v28 = vld [vmem:[%s14098_s7 + $0x6c8] sm:$0xff] }
 0x988   : > { %10917 = vmatprep.subr.bf16.mxu0 %v11527_v42  ;;  %v10897_v41 = vpack.c.bf16 %v8450_v28, %v8449_v15  ;;  %11512 = vpow2.f32 %v5933_v33 }
 0x989   : > { %11514 = vpow2.f32 %v5937_v38 }
 0x98a   : > { %10844 = vmatpush3.bf16.msra.mxu1 %v10843_v23  ;;  %v10900_v23 = vpack.c.bf16 %v8452_v18, %v8451_v55 }
 0x98b   : > { %10919 = vmatpush3.bf16.msra.mxu0 %v10918_v58  ;;  %10845 = vmatprep.subr.bf16.mxu1 %v11527_v42  ;;  %v8454_v58 = vld [vmem:[%s14098_s7 + $0x6e8] sm:$0xff] }
 0x98c   : > { %10920 = vmatprep.subr.bf16.mxu0 %v11527_v42  ;;  %v10903_v13 = vpack.c.bf16 %v8454_v58, %v8453_v45 }
 0x98e   : > { %10847 = vmatpush3.bf16.msra.mxu1 %v10846_v60 }
 0x98f   : > { %10922 = vmatpush3.bf16.msra.mxu0 %v10921_v62  ;;  %10848 = vmatprep.subr.bf16.mxu1 %v11527_v42  ;;  %v8473_v62 = vld [vmem:[%s14098_s7 + $0x780] sm:$0xff] }
 0x990   : > { %10923 = vmatprep.subr.bf16.mxu0 %v11527_v42  ;;  %v10933_v47 = vpack.c.bf16 %v8474_v61, %v8473_v62 }
 0x992   : > { %10850 = vmatpush3.bf16.msra.mxu1 %v10849_v1  ;;  %v11513_v60 = vpop.eup %11512  ;;  %v8476_v1 = vld [vmem:[%s14098_s7 + $0x798] sm:$0xff] }
 0x993   : > { %10925 = vmatpush3.bf16.msra.mxu0 %v10924_v17  ;;  %10851 = vmatprep.subr.bf16.mxu1 %v11527_v42  ;;  %v8246_v36 = vadd.f32 -1.0, %v11513_v60  ;;  %v10936_v7 = vpack.c.bf16 %v8476_v1, %v8475_v30  ;;  %v11515_v48 = vpop.eup %11514 }
 0x994   : > { %10926 = vmatprep.subr.bf16.mxu0 %v11527_v42 }
 0x995   : > { %v5968_v17 = vsel %vm5888_vm0, %v5872_v43, %v8246_v36  ;;  %v8248_v43 = vadd.f32 -1.0, %v11515_v48 }
 0x996   : > { %10853 = vmatpush3.bf16.msra.mxu1 %v10852_v10  ;;  %v8478_v10 = vld [vmem:[%s14098_s7 + $0x7a8] sm:$0xff] }
 0x997   : > { %10928 = vmatpush3.bf16.msra.mxu0 %v10927_v24  ;;  %10854 = vmatprep.subr.bf16.mxu1 %v11527_v42  ;;  %v10939_v24 = vpack.c.bf16 %v8478_v10, %v8477_v37  ;;  %v8489_v37 = vld [vmem:[%s14099_s8] ss:$0 sm:$0xff] }
 0x998   : > { %10929 = vmatprep.subr.bf16.mxu0 %v11527_v42 }
 0x99a   : > { %10856 = vmatpush3.bf16.msra.mxu1 %v10855_v40  ;;  %v10945_v40 = vpack.c.bf16 %v8482_v19, %v8481_v54 }
 0x99b   : > { %10931 = vmatpush3.bf16.msra.mxu0 %v10930_v53  ;;  %10857 = vmatprep.subr.bf16.mxu1 %v11527_v42  ;;  %v8483_v53 = vld [vmem:[%s14098_s7 + $0x7d0] sm:$0xff] }
 0x99c   : > { %v10948_v8 = vpack.c.bf16 %v8484_v35, %v8483_v53 }
 0x99e   : > { %10859 = vmatpush3.bf16.msra.mxu1 %v10858_v14  ;;  %10535 = vmatmul.mubr.f32.vlgmr.msra.gmra.mrb[96].mxu0 %v5969_v9  ;;  %v8485_v14 = vld [vmem:[%s14098_s7 + $0x7e0] sm:$0xff] }
 0x99f   : > { %10884 = vmatprep.subr.bf16.mxu1 %v11527_v42 }
 0x9a1   : > { %10430 = vmatmul.mubr.f32.vlgmr.msra.gmra.mrb[200].mxu1 %v5966_v11 }
 0x9a2   : > { %10886 = vmatpush3.bf16.msra.mxu1 %v10885_v21  ;;  %10499 = vmatprep.mubr.msk.f32.mxu1 %vm11528_vm1, %v11529_v52  ;;  %v10951_v21 = vpack.c.bf16 %v8486_v51, %v8485_v14 }
 0x9a3   : > { %10887 = vmatprep.subr.bf16.mxu1 %v11527_v42 }
 0x9a6   : > { %10889 = vmatpush3.bf16.msra.mxu1 %v10888_v34  ;;  %v10954_v34 = vpack.c.bf16 %v8488_v56, %v8487_v6 }
 0x9a7   : > { %10890 = vmatprep.subr.bf16.mxu1 %v11527_v42 }
 0x9aa   : > { %10892 = vmatpush3.bf16.msra.mxu1 %v10891_v4 }
 0x9ab   : > { %10893 = vmatprep.subr.bf16.mxu1 %v11527_v42 }
 0x9ae   : > { %10895 = vmatpush3.bf16.msra.mxu1 %v10894_v57 }
 0x9af   : > { %10896 = vmatprep.subr.bf16.mxu1 %v11527_v42 }
 0x9b1   : > { %v14003_v22 = vpop.f32.mrb[84].mxu0 }
 0x9b2   : > { %10898 = vmatpush3.bf16.msra.mxu1 %v10897_v41  ;;  %v10116_v29 = vpop.f32.mrb[85].mxu0 }
 0x9b3   : > { %10899 = vmatprep.subr.bf16.mxu1 %v11527_v42 }
 0x9b4   : > { %v6070_v31 = vpop.f32.mrb[188].mxu1 }
 0x9b5   : > { %v10046_v25 = vpop.f32.mrb[189].mxu1 }
 0x9b6   : > { %10901 = vmatpush3.bf16.msra.mxu1 %v10900_v23 }
 0x9b7   : > { %10902 = vmatprep.subr.bf16.mxu1 %v11527_v42 }
 0x9ba   : > { %10904 = vmatpush3.bf16.msra.mxu1 %v10903_v13 }
 0x9bb   : > { %10905 = vmatprep.subr.bf16.mxu1 %v11527_v42 }
 0x9be   : > { %10907 = vmatpush3.bf16.msra.mxu1 %v10906_v46 }
 0x9bf   : > { %10932 = vmatprep.subr.bf16.mxu1 %v11527_v42 }
 0x9c1   : > { %10500 = vmatmul.mubr.f32.vlgmr.msra.gmra.mrb[202].mxu1 %v5968_v17 }
 0x9c2   : > { %10934 = vmatpush3.bf16.msra.mxu1 %v10933_v47  ;;  %10569 = vmatprep.mubr.msk.f32.mxu1 %vm11528_vm1, %v11529_v52  ;;  %v8479_v52 = vld [vmem:[%s14098_s7 + $0x7b0] sm:$0xff]  ;;  %vm5890_vm1 = vcmp.gt.f32.partialorder %v5874_v27, 0.0 }
 0x9c3   : > { %10935 = vmatprep.subr.bf16.mxu1 %v11527_v42  ;;  %v10942_v50 = vpack.c.bf16 %v8480_v0, %v8479_v52  ;;  %v5970_v2 = vsel %vm5890_vm1, %v5874_v27, %v8248_v43 }
 0x9c6   : > { %10937 = vmatpush3.bf16.msra.mxu1 %v10936_v7 }
 0x9c7   : > { %10938 = vmatprep.subr.bf16.mxu1 %v11527_v42 }
 0x9ca   : > { %10940 = vmatpush3.bf16.msra.mxu1 %v10939_v24 }
 0x9cb   : > { %10941 = vmatprep.subr.bf16.mxu1 %v11527_v42 }
 0x9ce   : > { %10943 = vmatpush3.bf16.msra.mxu1 %v10942_v50 }
 0x9cf   : > { %10944 = vmatprep.subr.bf16.mxu1 %v11527_v42 }
 0x9d1   : > { %v6403_v3 = vpop.f32.mrb[86].mxu0 }
 0x9d2   : > { %v10186_v44 = vpop.f32.mrb[87].mxu0  ;;  %10946 = vmatpush3.bf16.msra.mxu1 %v10945_v40 }
 0x9d3   : > { %10947 = vmatprep.subr.bf16.mxu1 %v11527_v42 }
 0x9d4   : > { %v6140_v63 = vpop.f32.mrb[190].mxu1 }
 0x9d5   : > { %v6141_v5 = vadd.f32 %v6140_v63, %v6070_v31  ;;  %v10081_v9 = vpop.f32.mrb[191].mxu1 }
 0x9d6   : > { %10949 = vmatpush3.bf16.msra.mxu1 %v10948_v8 }
 0x9d7   : > { %10950 = vmatprep.subr.bf16.mxu1 %v11527_v42  ;;  %v6231_v11 = vadd.f32 %v14003_v22, %v6141_v5 }
 0x9da   : > { %10952 = vmatpush3.bf16.msra.mxu1 %v10951_v21 }
 0x9db   : > { %10953 = vmatprep.subr.bf16.mxu1 %v11527_v42 }
 0x9de   : > { %10955 = vmatpush3.bf16.msra.mxu1 %v10954_v34 }
 0x9e1   : > { %10570 = vmatmul.mubr.f32.vlgmr.msra.gmra.mrb[204].mxu1 %v5970_v2 }
 0x9f1   : > { %v6579_v32 = vpop.f32.mrb[88].mxu0 }
 0x9f2   : > { %v10256_v4 = vpop.f32.mrb[89].mxu0 }
 0x9f4   : > { %v6315_v16 = vpop.f32.mrb[192].mxu1 }
 0x9f5   : > { %v6319_v12 = vadd.f32 %v6315_v16, %v6231_v11  ;;  %v10151_v49 = vpop.f32.mrb[193].mxu1 }
 0x9f7   : > { %v6407_v57 = vadd.f32 %v6403_v3, %v6319_v12 }
 0xa11   : > { %v6755_v33 = vpop.f32.mrb[90].mxu0 }
 0xa12   : > { %v10326_v15 = vpop.f32.mrb[91].mxu0 }
 0xa14   : > { %v6491_v28 = vpop.f32.mrb[194].mxu1 }
 0xa15   : > { %v6495_v41 = vadd.f32 %v6491_v28, %v6407_v57  ;;  %v10221_v55 = vpop.f32.mrb[195].mxu1 }
 0xa17   : > { %v6583_v18 = vadd.f32 %v6579_v32, %v6495_v41 }
 0xa31   : > { %v6931_v22 = vpop.f32.mrb[92].mxu0 }
 0xa32   : > { %v10396_v29 = vpop.f32.mrb[93].mxu0 }
 0xa34   : > { %v6667_v42 = vpop.f32.mrb[196].mxu1 }
 0xa35   : > { %v6671_v23 = vadd.f32 %v6667_v42, %v6583_v18  ;;  %v10291_v45 = vpop.f32.mrb[197].mxu1 }
 0xa37   : > { %v6759_v58 = vadd.f32 %v6755_v33, %v6671_v23 }
 0xa51   : > { %v7107_v31 = vpop.f32.mrb[94].mxu0 }
 0xa52   : > { %v10466_v25 = vpop.f32.mrb[95].mxu0 }
 0xa54   : > { %v6843_v13 = vpop.f32.mrb[198].mxu1 }
 0xa55   : > { %v6847_v20 = vadd.f32 %v6843_v13, %v6759_v58  ;;  %v10361_v59 = vpop.f32.mrb[199].mxu1 }
 0xa57   : > { %v6935_v60 = vadd.f32 %v6931_v22, %v6847_v20 }
 0xa71   : > { %v7283_v46 = vpop.f32.mrb[96].mxu0 }
 0xa72   : > { %v10536_v62 = vpop.f32.mrb[97].mxu0 }
 0xa74   : > { %v7019_v61 = vpop.f32.mrb[200].mxu1 }
 0xa75   : > { %v7023_v36 = vadd.f32 %v7019_v61, %v6935_v60  ;;  %v10431_v47 = vpop.f32.mrb[201].mxu1 }
 0xa77   : > { %v7111_v30 = vadd.f32 %v7107_v31, %v7023_v36 }
 0xa94   : > { %v7195_v1 = vpop.f32.mrb[202].mxu1 }
 0xa95   : > { %v7199_v17 = vadd.f32 %v7195_v1, %v7111_v30  ;;  %v10501_v26 = vpop.f32.mrb[203].mxu1 }
 0xa97   : > { %v7287_v7 = vadd.f32 %v7283_v46, %v7199_v17 }
 0xab4   : > { %v7371_v27 = vpop.f32.mrb[204].mxu1 }
 0xab5   : > { %v7375_v10 = vadd.f32 %v7371_v27, %v7287_v7  ;;  %v10571_v24 = vpop.f32.mrb[205].mxu1 }
 0xab7   : > { %v7383_v39 = vadd.f32 %v8489_v37, %v7375_v10 }
 0xab9   : > { %7385 = vst.msk [vmem:[%s332_s28] sm:$0xff] %vm7384_vm2, %v7383_v39 }
 0xaba PF: > { %s19_s30 = sadd.s32 1, %s11524_s30  }
 0xabb   : > { %p16_p5 = scmp.ge.s32.totalorder %s19_s30, 4  }
 0xabd   :  { %18 = sbr.rel (!%p16_p5) target bundleno = 1 (0x1), region = 129 }

</bundles_post_ra>
